<compile_context>
chip_gen: v7x
topology: tpu7x:2x2x1
jax: 0.10.0
libtpu: 0.0.40
codegen_flags: <defaults>
</compile_context>

<pallas_src>
import numpy as np
import jax
import jax.numpy as jnp
from jax import lax
from jax.experimental import pallas as pl
from jax.experimental.pallas import tpu as pltpu

# ----------------------------- model config ---------------------------------
BASE_CH = 8            # base_ch
IN_CHANS = 1           # in_chans
NUM_CLASSES = 10       # num_classes
LAYERS = [1, 1, 1, 1]  # BasicBlock counts per stage (expansion = 1)
BN_EPS = 1e-5
TAIL = 64              # zero lanes appended to every grid value (safe tap shifts)
OUT_LANES = 128        # lane-dense logits writeback
F32 = jnp.float32


# ------------------------------ static plan ----------------------------------
def _build_plan(in_hw):
    stem_out = (in_hw + 2 * 3 - 7) // 2 + 1          # conv1: 7x7 s2 p3
    mp_out = (stem_out + 2 * 1 - 3) // 2 + 1         # maxpool: 3x3 s2 p1
    blocks = []
    inplanes, s_in = BASE_CH, mp_out
    for mult, nblocks, stride in [(1, LAYERS[0], 1), (2, LAYERS[1], 2),
                                  (4, LAYERS[2], 2), (8, LAYERS[3], 2)]:
        planes = BASE_CH * mult
        for b in range(nblocks):
            s = stride if b == 0 else 1
            s_out = (s_in + 2 * 1 - 3) // s + 1
            blocks.append(dict(cin=inplanes, cout=planes, stride=s,
                               has_ds=(s != 1 or inplanes != planes),
                               s_in=s_in, s_out=s_out))
            inplanes, s_in = planes, s_out
    return stem_out, mp_out, blocks


# --------------------------- in-kernel helpers --------------------------------
def _mm(a, b):
    return lax.dot_general(a, b, (((1,), (0,)), ((), ())),
                           preferred_element_type=F32)


def _make_kernel(plan, n_ops):
    stem_out, mp_out, blocks = plan
    mp_wp = stem_out + 2
    L_mp = mp_wp * mp_wp

    def conv3x3(x, w3, cin, cout, wp, L):
        """3x3/s1 tap conv on a zero-padded flattened grid value.

        x: (cin, >= L + 2*wp + 2); w3: (3, cout, 3*cin) column-tap-major.
        acc[:, r*wp + c] = conv value whose receptive-field top-left sits at
        grid position (r, c).  Three K=3*cin GEMMs (column taps)."""
        x3 = jnp.concatenate(
            [x[:, di * wp: di * wp + L + 2] for di in range(3)], axis=0)
        acc = None
        for dj in range(3):
            part = _mm(w3[dj], x3[:, dj:dj + L])
            acc = part if acc is None else acc + part
        return acc

    def kernel(x_ref, *refs):
        o_ref = refs[n_ops]
        it = iter(refs[:n_ops])

        def nxt():
            return next(it)[...]

        # ----- stem: 7x7/s2 conv (+folded BN +ReLU) as one MXU GEMM ----------
        patches = x_ref[0]                               # (49, stem_out^2)
        w1 = nxt(); b1 = nxt()
        acc = jnp.maximum(_mm(w1, patches) + b1, 0.0)    # (8, stem_out^2)

        # scatter stem output onto the padded maxpool grid (one GEMM)
        grid_mp = _mm(acc, nxt())                        # (8, L_mp + TAIL)

        # ----- maxpool 3x3/s2/p1 (zero pad == -inf pad: inputs post-ReLU) ----
        m = None
        for di in range(3):
            for dj in range(3):
                off = di * mp_wp + dj
                sl = grid_mp[:, off:off + L_mp]
                m = sl if m is None else jnp.maximum(m, sl)
        x_grid = _mm(m, nxt())                           # layer1 padded grid

        # ----- BasicBlocks ----------------------------------------------------
        for i, cfg in enumerate(blocks):
            cin, cout, s = cfg['cin'], cfg['cout'], cfg['stride']
            wp_in, wp_out = cfg['s_in'] + 2, cfg['s_out'] + 2
            L_in, L_out = wp_in * wp_in, wp_out * wp_out

            c1w = nxt(); c1b = nxt(); c2w = nxt(); c2b = nxt()
            if cfg['has_ds']:
                dsw = nxt(); dsb = nxt(); s_ds = nxt()
            s_tr = nxt()

            # conv1 (+bn1 folded, relu), scatter onto conv2's padded grid
            a1 = jnp.maximum(conv3x3(x_grid, c1w, cin, cout, wp_in, L_in) + c1b,
                             0.0)
            x2 = _mm(a1, s_tr)                           # (cout, L_out + TAIL)

            # conv2 (+bn2 folded)
            a2 = conv3x3(x2, c2w, cout, cout, wp_out, L_out) + c2b

            # identity / downsample residual, aligned to conv2's output layout
            if cfg['has_ds']:
                res = _mm(_mm(dsw, x_grid[:, :L_in]), s_ds) + dsb
            else:
                res = x_grid[:, wp_out + 1: wp_out + 1 + L_out]
            a3 = jnp.maximum(a2 + res, 0.0)

            if i + 1 < len(blocks):
                x_grid = _mm(a3, nxt())                  # next block's grid
            else:
                # ----- global average pool + fc (lane-dense logits) ----------
                gap = nxt()                              # (1, L_out)
                pooled = jnp.sum(a3 * gap, axis=1, keepdims=True)   # (cout,1)
                fcw = nxt(); fcb = nxt()                 # (cout,128), (1,128)
                logits = jnp.sum(pooled * fcw, axis=0, keepdims=True) + fcb
                o_ref[0] = logits

    return kernel


# ------------------------------ forward wrapper -------------------------------
def _const_idx(ndim):
    if ndim == 2:
        return lambda n: (0, 0)
    return lambda n: (0, 0, 0)


@jax.jit
def resnet_forward(x_nchw, ops):
    """x_nchw: (N, 1, H, W); ops: pre-folded kernel operands (built once)."""
    N, C, H, W = x_nchw.shape
    assert C == IN_CHANS == 1 and H == W
    plan = _build_plan(H)
    stem_out, mp_out, blocks = plan
    assert TAIL >= 2 * (stem_out + 2) + 2     # tap shifts never leave a grid

    # stem im2col (layout plumbing only): 7x7/s2/p3 patches -> (N, 49, S*S)
    xpad = jnp.pad(x_nchw[:, 0], ((0, 0), (3, 3), (3, 3)))
    rows = [xpad[:, di:di + 2 * stem_out:2, dj:dj + 2 * stem_out:2].reshape(N, -1)
            for di in range(7) for dj in range(7)]
    patches = jnp.stack(rows, axis=1)

    in_specs = [pl.BlockSpec((1, 49, stem_out * stem_out), lambda n: (n, 0, 0))]
    for a in ops:
        in_specs.append(pl.BlockSpec(tuple(a.shape), _const_idx(a.ndim)))

    kernel = _make_kernel(plan, len(ops))
    out = pl.pallas_call(
        kernel,
        out_shape=jax.ShapeDtypeStruct((N, 1, OUT_LANES), F32),
        grid=(N,),
        in_specs=in_specs,
        out_specs=pl.BlockSpec((1, 1, OUT_LANES), lambda n: (n, 0, 0)),
        compiler_params=pltpu.CompilerParams(
            dimension_semantics=("parallel",)),
    )(patches, *ops)
    return out[:, 0, :NUM_CLASSES]


# --------------------------- parameter construction --------------------------
def _fold_bn(gamma, beta, mean, var):
    scale = gamma / jnp.sqrt(var + BN_EPS)
    bias = beta - mean * scale
    return scale.reshape(1, -1), bias.reshape(1, -1)


def init_params(key):
    keys = iter(jax.random.split(key, 128))

    def conv_w(c_out, c_in, k):
        std = (2.0 / (c_out * k * k)) ** 0.5  # kaiming_normal_ fan_out / relu
        return std * jax.random.normal(next(keys), (c_out, c_in, k, k), F32)

    def bn(c):
        gamma = 1.0 + 0.1 * jax.random.normal(next(keys), (c,), F32)
        beta = 0.1 * jax.random.normal(next(keys), (c,), F32)
        mean = 0.1 * jax.random.normal(next(keys), (c,), F32)
        var = jax.random.uniform(next(keys), (c,), F32, 0.5, 1.5)
        return _fold_bn(gamma, beta, mean, var)

    params = {'conv1_w': conv_w(BASE_CH, IN_CHANS, 7)}
    params['bn1_scale'], params['bn1_bias'] = bn(BASE_CH)

    inplanes = BASE_CH
    stages = []
    for mult, n_blocks, stride in [(1, LAYERS[0], 1), (2, LAYERS[1], 2),
                                   (4, LAYERS[2], 2), (8, LAYERS[3], 2)]:
        planes = BASE_CH * mult
        layer = []
        for b in range(n_blocks):
            s = stride if b == 0 else 1
            bp = {'stride': s,
                  'conv1_w': conv_w(planes, inplanes, 3),
                  'conv2_w': conv_w(planes, planes, 3)}
            bp['bn1_scale'], bp['bn1_bias'] = bn(planes)
            bp['bn2_scale'], bp['bn2_bias'] = bn(planes)
            if s != 1 or inplanes != planes:
                bp['ds_w'] = conv_w(planes, inplanes, 1)
                bp['ds_scale'], bp['ds_bias'] = bn(planes)
            inplanes = planes
            layer.append(bp)
        stages.append(layer)
    params['layers'] = stages

    fan_in = BASE_CH * 8  # * block.expansion (=1)
    bound = 1.0 / fan_in ** 0.5
    params['fc_w'] = jax.random.uniform(next(keys), (fan_in, NUM_CLASSES),
                                        F32, -bound, bound)
    params['fc_b'] = jax.random.uniform(next(keys), (1, NUM_CLASSES),
                                        F32, -bound, bound)
    return params


def _scatter(n_src, n_dst, pairs):
    s = np.zeros((n_src, n_dst), np.float32)
    for src, dst in pairs:
        s[src, dst] = 1.0
    return jnp.asarray(s)


def _kernel_operands(params, in_hw):
    """Fold BN scales into conv weights, pre-build all scatter/GAP/FC operands
    in exactly the order the kernel consumes them (done once, outside jit)."""
    stem_out, mp_out, blocks = _build_plan(in_hw)
    mp_wp = stem_out + 2

    def fold_w(w, scale):                    # scale: (1, cout)
        return w * scale.reshape(-1, 1, 1, 1)

    def col_major(w):                        # (cout,cin,3,3) -> (3, cout, 3*cin)
        cout, cin = w.shape[0], w.shape[1]
        return jnp.transpose(w, (3, 0, 2, 1)).reshape(3, cout, 3 * cin)

    ops = [fold_w(params['conv1_w'], params['bn1_scale']).reshape(BASE_CH, 49),
           params['bn1_bias'].reshape(-1, 1)]
    # stem output (h,w) -> padded maxpool grid (1+h, 1+w)
    ops.append(_scatter(stem_out * stem_out, mp_wp * mp_wp + TAIL,
                        [(h * stem_out + w, (1 + h) * mp_wp + (1 + w))
                         for h in range(stem_out) for w in range(stem_out)]))
    # maxpool window top-left (2h,2w) on mp grid -> layer1 padded grid (1+h,1+w)
    wp1 = mp_out + 2
    ops.append(_scatter(mp_wp * mp_wp, wp1 * wp1 + TAIL,
                        [((2 * h) * mp_wp + 2 * w, (1 + h) * wp1 + (1 + w))
                         for h in range(mp_out) for w in range(mp_out)]))

    bi = 0
    for layer in params['layers']:
        for bp in layer:
            cfg = blocks[bi]; bi += 1
            s, so = cfg['stride'], cfg['s_out']
            wp_in, wp_out = cfg['s_in'] + 2, cfg['s_out'] + 2
            ops.append(col_major(fold_w(bp['conv1_w'], bp['bn1_scale'])))
            ops.append(bp['bn1_bias'].reshape(-1, 1))
            ops.append(col_major(fold_w(bp['conv2_w'], bp['bn2_scale'])))
            ops.append(bp['bn2_bias'].reshape(-1, 1))
            if 'ds_w' in bp:
                dsw = bp['ds_w'][:, :, 0, 0] * bp['ds_scale'].reshape(-1, 1)
                ops.append(dsw)
                ops.append(bp['ds_bias'].reshape(-1, 1))
                # ds pixel at grid (1+s*h, 1+s*w) -> conv2-output index h*wp_out+w
                ops.append(_scatter(wp_in * wp_in, wp_out * wp_out,
                                    [((1 + s * h) * wp_in + (1 + s * w),
                                      h * wp_out + w)
                                     for h in range(so) for w in range(so)]))
            # conv1 output top-left (s*h, s*w) -> conv2 padded grid (1+h, 1+w)
            ops.append(_scatter(wp_in * wp_in, wp_out * wp_out + TAIL,
                                [((s * h) * wp_in + s * w,
                                  (1 + h) * wp_out + (1 + w))
                                 for h in range(so) for w in range(so)]))
            if bi < len(blocks):
                wp_nxt = blocks[bi]['s_in'] + 2          # == wp_out
                ops.append(_scatter(wp_out * wp_out, wp_nxt * wp_nxt + TAIL,
                                    [(h * wp_out + w,
                                      (1 + h) * wp_nxt + (1 + w))
                                     for h in range(so) for w in range(so)]))
            else:
                gap = np.zeros((1, wp_out * wp_out), np.float32)
                for h in range(so):
                    for w in range(so):
                        gap[0, h * wp_out + w] = 1.0 / float(so * so)
                ops.append(jnp.asarray(gap))
    # FC padded to 128 lanes for a lane-dense writeback
    fcw = jnp.zeros((BASE_CH * 8, OUT_LANES), F32).at[:, :NUM_CLASSES].set(
        params['fc_w'])
    fcb = jnp.zeros((1, OUT_LANES), F32).at[:, :NUM_CLASSES].set(params['fc_b'])
    ops.append(fcw)
    ops.append(fcb)
    return ops


# ------------------------------ pure-JAX reference ----------------------------
def ref_forward(x_nchw, params):
    x = jnp.transpose(x_nchw, (0, 2, 3, 1))

    def conv(x, w, stride, pad):
        return lax.conv_general_dilated(
            x, jnp.transpose(w, (2, 3, 1, 0)), (stride, stride),
            ((pad, pad), (pad, pad)),
            dimension_numbers=('NHWC', 'HWIO', 'NHWC'),
            precision=lax.Precision.HIGHEST)

    def cbr(x, w, s, b, stride, pad, relu):
        y = conv(x, w, stride, pad) * s.reshape(1, 1, 1, -1) + b.reshape(1, 1, 1, -1)
        return jnp.maximum(y, 0.0) if relu else y

    x = cbr(x, params['conv1_w'], params['bn1_scale'], params['bn1_bias'], 2, 3, True)
    x = lax.reduce_window(x, -jnp.inf, lax.max, (1, 3, 3, 1), (1, 2, 2, 1),
                          ((0, 0), (1, 1), (1, 1), (0, 0)))
    for layer in params['layers']:
        for bp in layer:
            idn = x
            out = cbr(x, bp['conv1_w'], bp['bn1_scale'], bp['bn1_bias'],
                      bp['stride'], 1, True)
            out = cbr(out, bp['conv2_w'], bp['bn2_scale'], bp['bn2_bias'], 1, 1, False)
            if 'ds_w' in bp:
                idn = cbr(x, bp['ds_w'], bp['ds_scale'], bp['ds_bias'],
                          bp['stride'], 0, False)
            x = jnp.maximum(out + idn, 0.0)
    pooled = x.mean(axis=(1, 2))
    return pooled @ params['fc_w'] + params['fc_b']


# ----------------------------------- main -------------------------------------
if __name__ == "__main__":
    key = jax.random.PRNGKey(0)
    k_x, k_p = jax.random.split(key)
    x = jax.random.normal(k_x, (2, IN_CHANS, 32, 32), jnp.float32)  # NCHW
    params = init_params(k_p)
    ops = _kernel_operands(params, 32)   # weights folded / re-laid-out once

    logits = jax.block_until_ready(resnet_forward(x, ops))

    ref = jax.block_until_ready(ref_forward(x, params))
    np.testing.assert_allclose(np.asarray(logits), np.asarray(ref),
                               rtol=1e-2, atol=1e-2)
    assert logits.shape == (2, NUM_CLASSES)
    print("KERNEL_OK")
</pallas_src>

<mosaic_0001>
module attributes {stable_mosaic.version = 11 : i64} {
  func.func @kernel(%arg0: i32, %arg1: memref<1x49x256xf32, #tpu.memory_space<vmem>>, %arg2: memref<8x49xf32, #tpu.memory_space<vmem>>, %arg3: memref<8x1xf32, #tpu.memory_space<vmem>>, %arg4: memref<256x388xf32, #tpu.memory_space<vmem>>, %arg5: memref<324x164xf32, #tpu.memory_space<vmem>>, %arg6: memref<3x8x24xf32, #tpu.memory_space<vmem>>, %arg7: memref<8x1xf32, #tpu.memory_space<vmem>>, %arg8: memref<3x8x24xf32, #tpu.memory_space<vmem>>, %arg9: memref<8x1xf32, #tpu.memory_space<vmem>>, %arg10: memref<100x164xf32, #tpu.memory_space<vmem>>, %arg11: memref<100x164xf32, #tpu.memory_space<vmem>>, %arg12: memref<3x16x24xf32, #tpu.memory_space<vmem>>, %arg13: memref<16x1xf32, #tpu.memory_space<vmem>>, %arg14: memref<3x16x48xf32, #tpu.memory_space<vmem>>, %arg15: memref<16x1xf32, #tpu.memory_space<vmem>>, %arg16: memref<16x8xf32, #tpu.memory_space<vmem>>, %arg17: memref<16x1xf32, #tpu.memory_space<vmem>>, %arg18: memref<100x36xf32, #tpu.memory_space<vmem>>, %arg19: memref<100x100xf32, #tpu.memory_space<vmem>>, %arg20: memref<36x100xf32, #tpu.memory_space<vmem>>, %arg21: memref<3x32x48xf32, #tpu.memory_space<vmem>>, %arg22: memref<32x1xf32, #tpu.memory_space<vmem>>, %arg23: memref<3x32x96xf32, #tpu.memory_space<vmem>>, %arg24: memref<32x1xf32, #tpu.memory_space<vmem>>, %arg25: memref<32x16xf32, #tpu.memory_space<vmem>>, %arg26: memref<32x1xf32, #tpu.memory_space<vmem>>, %arg27: memref<36x16xf32, #tpu.memory_space<vmem>>, %arg28: memref<36x80xf32, #tpu.memory_space<vmem>>, %arg29: memref<16x80xf32, #tpu.memory_space<vmem>>, %arg30: memref<3x64x96xf32, #tpu.memory_space<vmem>>, %arg31: memref<64x1xf32, #tpu.memory_space<vmem>>, %arg32: memref<3x64x192xf32, #tpu.memory_space<vmem>>, %arg33: memref<64x1xf32, #tpu.memory_space<vmem>>, %arg34: memref<64x32xf32, #tpu.memory_space<vmem>>, %arg35: memref<64x1xf32, #tpu.memory_space<vmem>>, %arg36: memref<16x9xf32, #tpu.memory_space<vmem>>, %arg37: memref<16x73xf32, #tpu.memory_space<vmem>>, %arg38: memref<1x9xf32, #tpu.memory_space<vmem>>, %arg39: memref<64x128xf32, #tpu.memory_space<vmem>>, %arg40: memref<1x128xf32, #tpu.memory_space<vmem>>, %arg41: memref<1x1x128xf32, #tpu.memory_space<vmem>>) attributes {dimension_semantics = [#tpu.dimension_semantics<parallel>], iteration_bounds = array<i64: 2>, scalar_prefetch = 0 : i64, scratch_operands = 0 : i64, tpu.core_type = #tpu.core_type<tc>, window_params = [{transform_indices = @transform_0, window_bounds = array<i64: 1, 49, 256>}, {pipeline_mode = #tpu.pipeline_mode<synchronous>, transform_indices = @transform_1, window_bounds = array<i64: 8, 49>}, {pipeline_mode = #tpu.pipeline_mode<synchronous>, transform_indices = @transform_2, window_bounds = array<i64: 8, 1>}, {pipeline_mode = #tpu.pipeline_mode<synchronous>, transform_indices = @transform_3, window_bounds = array<i64: 256, 388>}, {pipeline_mode = #tpu.pipeline_mode<synchronous>, transform_indices = @transform_4, window_bounds = array<i64: 324, 164>}, {pipeline_mode = #tpu.pipeline_mode<synchronous>, transform_indices = @transform_5, window_bounds = array<i64: 3, 8, 24>}, {pipeline_mode = #tpu.pipeline_mode<synchronous>, transform_indices = @transform_6, window_bounds = array<i64: 8, 1>}, {pipeline_mode = #tpu.pipeline_mode<synchronous>, transform_indices = @transform_7, window_bounds = array<i64: 3, 8, 24>}, {pipeline_mode = #tpu.pipeline_mode<synchronous>, transform_indices = @transform_8, window_bounds = array<i64: 8, 1>}, {pipeline_mode = #tpu.pipeline_mode<synchronous>, transform_indices = @transform_9, window_bounds = array<i64: 100, 164>}, {pipeline_mode = #tpu.pipeline_mode<synchronous>, transform_indices = @transform_10, window_bounds = array<i64: 100, 164>}, {pipeline_mode = #tpu.pipeline_mode<synchronous>, transform_indices = @transform_11, window_bounds = array<i64: 3, 16, 24>}, {pipeline_mode = #tpu.pipeline_mode<synchronous>, transform_indices = @transform_12, window_bounds = array<i64: 16, 1>}, {pipeline_mode = #tpu.pipeline_mode<synchronous>, transform_indices = @transform_13, window_bounds = array<i64: 3, 16, 48>}, {pipeline_mode = #tpu.pipeline_mode<synchronous>, transform_indices = @transform_14, window_bounds = array<i64: 16, 1>}, {pipeline_mode = #tpu.pipeline_mode<synchronous>, transform_indices = @transform_15, window_bounds = array<i64: 16, 8>}, {pipeline_mode = #tpu.pipeline_mode<synchronous>, transform_indices = @transform_16, window_bounds = array<i64: 16, 1>}, {pipeline_mode = #tpu.pipeline_mode<synchronous>, transform_indices = @transform_17, window_bounds = array<i64: 100, 36>}, {pipeline_mode = #tpu.pipeline_mode<synchronous>, transform_indices = @transform_18, window_bounds = array<i64: 100, 100>}, {pipeline_mode = #tpu.pipeline_mode<synchronous>, transform_indices = @transform_19, window_bounds = array<i64: 36, 100>}, {pipeline_mode = #tpu.pipeline_mode<synchronous>, transform_indices = @transform_20, window_bounds = array<i64: 3, 32, 48>}, {pipeline_mode = #tpu.pipeline_mode<synchronous>, transform_indices = @transform_21, window_bounds = array<i64: 32, 1>}, {pipeline_mode = #tpu.pipeline_mode<synchronous>, transform_indices = @transform_22, window_bounds = array<i64: 3, 32, 96>}, {pipeline_mode = #tpu.pipeline_mode<synchronous>, transform_indices = @transform_23, window_bounds = array<i64: 32, 1>}, {pipeline_mode = #tpu.pipeline_mode<synchronous>, transform_indices = @transform_24, window_bounds = array<i64: 32, 16>}, {pipeline_mode = #tpu.pipeline_mode<synchronous>, transform_indices = @transform_25, window_bounds = array<i64: 32, 1>}, {pipeline_mode = #tpu.pipeline_mode<synchronous>, transform_indices = @transform_26, window_bounds = array<i64: 36, 16>}, {pipeline_mode = #tpu.pipeline_mode<synchronous>, transform_indices = @transform_27, window_bounds = array<i64: 36, 80>}, {pipeline_mode = #tpu.pipeline_mode<synchronous>, transform_indices = @transform_28, window_bounds = array<i64: 16, 80>}, {pipeline_mode = #tpu.pipeline_mode<synchronous>, transform_indices = @transform_29, window_bounds = array<i64: 3, 64, 96>}, {pipeline_mode = #tpu.pipeline_mode<synchronous>, transform_indices = @transform_30, window_bounds = array<i64: 64, 1>}, {pipeline_mode = #tpu.pipeline_mode<synchronous>, transform_indices = @transform_31, window_bounds = array<i64: 3, 64, 192>}, {pipeline_mode = #tpu.pipeline_mode<synchronous>, transform_indices = @transform_32, window_bounds = array<i64: 64, 1>}, {pipeline_mode = #tpu.pipeline_mode<synchronous>, transform_indices = @transform_33, window_bounds = array<i64: 64, 32>}, {pipeline_mode = #tpu.pipeline_mode<synchronous>, transform_indices = @transform_34, window_bounds = array<i64: 64, 1>}, {pipeline_mode = #tpu.pipeline_mode<synchronous>, transform_indices = @transform_35, window_bounds = array<i64: 16, 9>}, {pipeline_mode = #tpu.pipeline_mode<synchronous>, transform_indices = @transform_36, window_bounds = array<i64: 16, 73>}, {pipeline_mode = #tpu.pipeline_mode<synchronous>, transform_indices = @transform_37, window_bounds = array<i64: 1, 9>}, {pipeline_mode = #tpu.pipeline_mode<synchronous>, transform_indices = @transform_38, window_bounds = array<i64: 64, 128>}, {pipeline_mode = #tpu.pipeline_mode<synchronous>, transform_indices = @transform_39, window_bounds = array<i64: 1, 128>}, {transform_indices = @transform_40, window_bounds = array<i64: 1, 1, 128>}]} {
    %c0 = arith.constant 0 : index
    %c0_0 = arith.constant 0 : index
    %c0_1 = arith.constant 0 : index
    %0 = vector.load %arg1[%c0, %c0_0, %c0_1] : memref<1x49x256xf32, #tpu.memory_space<vmem>>, vector<1x49x256xf32>
    %1 = vector.shape_cast %0 : vector<1x49x256xf32> to vector<49x256xf32>
    %c0_2 = arith.constant 0 : index
    %c0_3 = arith.constant 0 : index
    %2 = vector.load %arg2[%c0_2, %c0_3] : memref<8x49xf32, #tpu.memory_space<vmem>>, vector<8x49xf32>
    %c0_4 = arith.constant 0 : index
    %c0_5 = arith.constant 0 : index
    %3 = vector.load %arg3[%c0_4, %c0_5] : memref<8x1xf32, #tpu.memory_space<vmem>>, vector<8x1xf32>
    %cst = arith.constant dense<0.000000e+00> : vector<8x256xf32>
    %4 = tpu.matmul %2, %1, %cst {dimension_numbers = #tpu.dot_dimension_numbers<[1], [0], [0], [1], [0, 0, 1, 1], [], []>} : vector<8x49xf32>, vector<49x256xf32>, vector<8x256xf32> -> vector<8x256xf32>
    %5 = vector.broadcast %3 : vector<8x1xf32> to vector<8x256xf32>
    %6 = arith.addf %4, %5 : vector<8x256xf32>
    %cst_6 = arith.constant 0.000000e+00 : f32
    %7 = vector.broadcast %cst_6 : f32 to vector<8x256xf32>
    %8 = arith.maximumf %6, %7 : vector<8x256xf32>
    %c0_7 = arith.constant 0 : index
    %c0_8 = arith.constant 0 : index
    %9 = vector.load %arg4[%c0_7, %c0_8] : memref<256x388xf32, #tpu.memory_space<vmem>>, vector<256x388xf32>
    %cst_9 = arith.constant dense<0.000000e+00> : vector<8x388xf32>
    %10 = tpu.matmul %8, %9, %cst_9 {dimension_numbers = #tpu.dot_dimension_numbers<[1], [0], [0], [1], [0, 0, 1, 1], [], []>} : vector<8x256xf32>, vector<256x388xf32>, vector<8x388xf32> -> vector<8x388xf32>
    %11 = vector.extract_strided_slice %10 {offsets = [0, 0], sizes = [8, 324], strides = [1, 1]} : vector<8x388xf32> to vector<8x324xf32>
    %12 = vector.extract_strided_slice %10 {offsets = [0, 1], sizes = [8, 324], strides = [1, 1]} : vector<8x388xf32> to vector<8x324xf32>
    %13 = arith.maximumf %11, %12 : vector<8x324xf32>
    %14 = vector.extract_strided_slice %10 {offsets = [0, 2], sizes = [8, 324], strides = [1, 1]} : vector<8x388xf32> to vector<8x324xf32>
    %15 = arith.maximumf %13, %14 : vector<8x324xf32>
    %16 = vector.extract_strided_slice %10 {offsets = [0, 18], sizes = [8, 324], strides = [1, 1]} : vector<8x388xf32> to vector<8x324xf32>
    %17 = arith.maximumf %15, %16 : vector<8x324xf32>
    %18 = vector.extract_strided_slice %10 {offsets = [0, 19], sizes = [8, 324], strides = [1, 1]} : vector<8x388xf32> to vector<8x324xf32>
    %19 = arith.maximumf %17, %18 : vector<8x324xf32>
    %20 = vector.extract_strided_slice %10 {offsets = [0, 20], sizes = [8, 324], strides = [1, 1]} : vector<8x388xf32> to vector<8x324xf32>
    %21 = arith.maximumf %19, %20 : vector<8x324xf32>
    %22 = vector.extract_strided_slice %10 {offsets = [0, 36], sizes = [8, 324], strides = [1, 1]} : vector<8x388xf32> to vector<8x324xf32>
    %23 = arith.maximumf %21, %22 : vector<8x324xf32>
    %24 = vector.extract_strided_slice %10 {offsets = [0, 37], sizes = [8, 324], strides = [1, 1]} : vector<8x388xf32> to vector<8x324xf32>
    %25 = arith.maximumf %23, %24 : vector<8x324xf32>
    %26 = vector.extract_strided_slice %10 {offsets = [0, 38], sizes = [8, 324], strides = [1, 1]} : vector<8x388xf32> to vector<8x324xf32>
    %27 = arith.maximumf %25, %26 : vector<8x324xf32>
    %c0_10 = arith.constant 0 : index
    %c0_11 = arith.constant 0 : index
    %28 = vector.load %arg5[%c0_10, %c0_11] : memref<324x164xf32, #tpu.memory_space<vmem>>, vector<324x164xf32>
    %cst_12 = arith.constant dense<0.000000e+00> : vector<8x164xf32>
    %29 = tpu.matmul %27, %28, %cst_12 {dimension_numbers = #tpu.dot_dimension_numbers<[1], [0], [0], [1], [0, 0, 1, 1], [], []>} : vector<8x324xf32>, vector<324x164xf32>, vector<8x164xf32> -> vector<8x164xf32>
    %c0_13 = arith.constant 0 : index
    %c0_14 = arith.constant 0 : index
    %c0_15 = arith.constant 0 : index
    %30 = vector.load %arg6[%c0_13, %c0_14, %c0_15] : memref<3x8x24xf32, #tpu.memory_space<vmem>>, vector<3x8x24xf32>
    %c0_16 = arith.constant 0 : index
    %c0_17 = arith.constant 0 : index
    %31 = vector.load %arg7[%c0_16, %c0_17] : memref<8x1xf32, #tpu.memory_space<vmem>>, vector<8x1xf32>
    %c0_18 = arith.constant 0 : index
    %c0_19 = arith.constant 0 : index
    %c0_20 = arith.constant 0 : index
    %32 = vector.load %arg8[%c0_18, %c0_19, %c0_20] : memref<3x8x24xf32, #tpu.memory_space<vmem>>, vector<3x8x24xf32>
    %c0_21 = arith.constant 0 : index
    %c0_22 = arith.constant 0 : index
    %33 = vector.load %arg9[%c0_21, %c0_22] : memref<8x1xf32, #tpu.memory_space<vmem>>, vector<8x1xf32>
    %c0_23 = arith.constant 0 : index
    %c0_24 = arith.constant 0 : index
    %34 = vector.load %arg10[%c0_23, %c0_24] : memref<100x164xf32, #tpu.memory_space<vmem>>, vector<100x164xf32>
    %35 = vector.extract_strided_slice %29 {offsets = [0, 0], sizes = [8, 102], strides = [1, 1]} : vector<8x164xf32> to vector<8x102xf32>
    %36 = vector.extract_strided_slice %29 {offsets = [0, 10], sizes = [8, 102], strides = [1, 1]} : vector<8x164xf32> to vector<8x102xf32>
    %37 = vector.extract_strided_slice %29 {offsets = [0, 20], sizes = [8, 102], strides = [1, 1]} : vector<8x164xf32> to vector<8x102xf32>
    %38 = tpu.concatenate %35, %36, %37 in 0 : vector<8x102xf32>, vector<8x102xf32>, vector<8x102xf32> -> vector<24x102xf32>
    %39 = vector.extract_strided_slice %30 {offsets = [0, 0, 0], sizes = [1, 8, 24], strides = [1, 1, 1]} : vector<3x8x24xf32> to vector<1x8x24xf32>
    %40 = vector.shape_cast %39 : vector<1x8x24xf32> to vector<8x24xf32>
    %41 = vector.extract_strided_slice %38 {offsets = [0, 0], sizes = [24, 100], strides = [1, 1]} : vector<24x102xf32> to vector<24x100xf32>
    %cst_25 = arith.constant dense<0.000000e+00> : vector<8x100xf32>
    %42 = tpu.matmul %40, %41, %cst_25 {dimension_numbers = #tpu.dot_dimension_numbers<[1], [0], [0], [1], [0, 0, 1, 1], [], []>} : vector<8x24xf32>, vector<24x100xf32>, vector<8x100xf32> -> vector<8x100xf32>
    %43 = vector.extract_strided_slice %30 {offsets = [1, 0, 0], sizes = [1, 8, 24], strides = [1, 1, 1]} : vector<3x8x24xf32> to vector<1x8x24xf32>
    %44 = vector.shape_cast %43 : vector<1x8x24xf32> to vector<8x24xf32>
    %45 = vector.extract_strided_slice %38 {offsets = [0, 1], sizes = [24, 100], strides = [1, 1]} : vector<24x102xf32> to vector<24x100xf32>
    %cst_26 = arith.constant dense<0.000000e+00> : vector<8x100xf32>
    %46 = tpu.matmul %44, %45, %cst_26 {dimension_numbers = #tpu.dot_dimension_numbers<[1], [0], [0], [1], [0, 0, 1, 1], [], []>} : vector<8x24xf32>, vector<24x100xf32>, vector<8x100xf32> -> vector<8x100xf32>
    %47 = arith.addf %42, %46 : vector<8x100xf32>
    %48 = vector.extract_strided_slice %30 {offsets = [2, 0, 0], sizes = [1, 8, 24], strides = [1, 1, 1]} : vector<3x8x24xf32> to vector<1x8x24xf32>
    %49 = vector.shape_cast %48 : vector<1x8x24xf32> to vector<8x24xf32>
    %50 = vector.extract_strided_slice %38 {offsets = [0, 2], sizes = [24, 100], strides = [1, 1]} : vector<24x102xf32> to vector<24x100xf32>
    %cst_27 = arith.constant dense<0.000000e+00> : vector<8x100xf32>
    %51 = tpu.matmul %49, %50, %cst_27 {dimension_numbers = #tpu.dot_dimension_numbers<[1], [0], [0], [1], [0, 0, 1, 1], [], []>} : vector<8x24xf32>, vector<24x100xf32>, vector<8x100xf32> -> vector<8x100xf32>
    %52 = arith.addf %47, %51 : vector<8x100xf32>
    %53 = vector.broadcast %31 : vector<8x1xf32> to vector<8x100xf32>
    %54 = arith.addf %52, %53 : vector<8x100xf32>
    %cst_28 = arith.constant 0.000000e+00 : f32
    %55 = vector.broadcast %cst_28 : f32 to vector<8x100xf32>
    %56 = arith.maximumf %54, %55 : vector<8x100xf32>
    %cst_29 = arith.constant dense<0.000000e+00> : vector<8x164xf32>
    %57 = tpu.matmul %56, %34, %cst_29 {dimension_numbers = #tpu.dot_dimension_numbers<[1], [0], [0], [1], [0, 0, 1, 1], [], []>} : vector<8x100xf32>, vector<100x164xf32>, vector<8x164xf32> -> vector<8x164xf32>
    %58 = vector.extract_strided_slice %57 {offsets = [0, 0], sizes = [8, 102], strides = [1, 1]} : vector<8x164xf32> to vector<8x102xf32>
    %59 = vector.extract_strided_slice %57 {offsets = [0, 10], sizes = [8, 102], strides = [1, 1]} : vector<8x164xf32> to vector<8x102xf32>
    %60 = vector.extract_strided_slice %57 {offsets = [0, 20], sizes = [8, 102], strides = [1, 1]} : vector<8x164xf32> to vector<8x102xf32>
    %61 = tpu.concatenate %58, %59, %60 in 0 : vector<8x102xf32>, vector<8x102xf32>, vector<8x102xf32> -> vector<24x102xf32>
    %62 = vector.extract_strided_slice %32 {offsets = [0, 0, 0], sizes = [1, 8, 24], strides = [1, 1, 1]} : vector<3x8x24xf32> to vector<1x8x24xf32>
    %63 = vector.shape_cast %62 : vector<1x8x24xf32> to vector<8x24xf32>
    %64 = vector.extract_strided_slice %61 {offsets = [0, 0], sizes = [24, 100], strides = [1, 1]} : vector<24x102xf32> to vector<24x100xf32>
    %cst_30 = arith.constant dense<0.000000e+00> : vector<8x100xf32>
    %65 = tpu.matmul %63, %64, %cst_30 {dimension_numbers = #tpu.dot_dimension_numbers<[1], [0], [0], [1], [0, 0, 1, 1], [], []>} : vector<8x24xf32>, vector<24x100xf32>, vector<8x100xf32> -> vector<8x100xf32>
    %66 = vector.extract_strided_slice %32 {offsets = [1, 0, 0], sizes = [1, 8, 24], strides = [1, 1, 1]} : vector<3x8x24xf32> to vector<1x8x24xf32>
    %67 = vector.shape_cast %66 : vector<1x8x24xf32> to vector<8x24xf32>
    %68 = vector.extract_strided_slice %61 {offsets = [0, 1], sizes = [24, 100], strides = [1, 1]} : vector<24x102xf32> to vector<24x100xf32>
    %cst_31 = arith.constant dense<0.000000e+00> : vector<8x100xf32>
    %69 = tpu.matmul %67, %68, %cst_31 {dimension_numbers = #tpu.dot_dimension_numbers<[1], [0], [0], [1], [0, 0, 1, 1], [], []>} : vector<8x24xf32>, vector<24x100xf32>, vector<8x100xf32> -> vector<8x100xf32>
    %70 = arith.addf %65, %69 : vector<8x100xf32>
    %71 = vector.extract_strided_slice %32 {offsets = [2, 0, 0], sizes = [1, 8, 24], strides = [1, 1, 1]} : vector<3x8x24xf32> to vector<1x8x24xf32>
    %72 = vector.shape_cast %71 : vector<1x8x24xf32> to vector<8x24xf32>
    %73 = vector.extract_strided_slice %61 {offsets = [0, 2], sizes = [24, 100], strides = [1, 1]} : vector<24x102xf32> to vector<24x100xf32>
    %cst_32 = arith.constant dense<0.000000e+00> : vector<8x100xf32>
    %74 = tpu.matmul %72, %73, %cst_32 {dimension_numbers = #tpu.dot_dimension_numbers<[1], [0], [0], [1], [0, 0, 1, 1], [], []>} : vector<8x24xf32>, vector<24x100xf32>, vector<8x100xf32> -> vector<8x100xf32>
    %75 = arith.addf %70, %74 : vector<8x100xf32>
    %76 = vector.broadcast %33 : vector<8x1xf32> to vector<8x100xf32>
    %77 = arith.addf %75, %76 : vector<8x100xf32>
    %78 = vector.extract_strided_slice %29 {offsets = [0, 11], sizes = [8, 100], strides = [1, 1]} : vector<8x164xf32> to vector<8x100xf32>
    %79 = arith.addf %77, %78 : vector<8x100xf32>
    %cst_33 = arith.constant 0.000000e+00 : f32
    %80 = vector.broadcast %cst_33 : f32 to vector<8x100xf32>
    %81 = arith.maximumf %79, %80 : vector<8x100xf32>
    %c0_34 = arith.constant 0 : index
    %c0_35 = arith.constant 0 : index
    %82 = vector.load %arg11[%c0_34, %c0_35] : memref<100x164xf32, #tpu.memory_space<vmem>>, vector<100x164xf32>
    %cst_36 = arith.constant dense<0.000000e+00> : vector<8x164xf32>
    %83 = tpu.matmul %81, %82, %cst_36 {dimension_numbers = #tpu.dot_dimension_numbers<[1], [0], [0], [1], [0, 0, 1, 1], [], []>} : vector<8x100xf32>, vector<100x164xf32>, vector<8x164xf32> -> vector<8x164xf32>
    %c0_37 = arith.constant 0 : index
    %c0_38 = arith.constant 0 : index
    %c0_39 = arith.constant 0 : index
    %84 = vector.load %arg12[%c0_37, %c0_38, %c0_39] : memref<3x16x24xf32, #tpu.memory_space<vmem>>, vector<3x16x24xf32>
    %c0_40 = arith.constant 0 : index
    %c0_41 = arith.constant 0 : index
    %85 = vector.load %arg13[%c0_40, %c0_41] : memref<16x1xf32, #tpu.memory_space<vmem>>, vector<16x1xf32>
    %c0_42 = arith.constant 0 : index
    %c0_43 = arith.constant 0 : index
    %c0_44 = arith.constant 0 : index
    %86 = vector.load %arg14[%c0_42, %c0_43, %c0_44] : memref<3x16x48xf32, #tpu.memory_space<vmem>>, vector<3x16x48xf32>
    %c0_45 = arith.constant 0 : index
    %c0_46 = arith.constant 0 : index
    %87 = vector.load %arg15[%c0_45, %c0_46] : memref<16x1xf32, #tpu.memory_space<vmem>>, vector<16x1xf32>
    %c0_47 = arith.constant 0 : index
    %c0_48 = arith.constant 0 : index
    %88 = vector.load %arg16[%c0_47, %c0_48] : memref<16x8xf32, #tpu.memory_space<vmem>>, vector<16x8xf32>
    %c0_49 = arith.constant 0 : index
    %c0_50 = arith.constant 0 : index
    %89 = vector.load %arg17[%c0_49, %c0_50] : memref<16x1xf32, #tpu.memory_space<vmem>>, vector<16x1xf32>
    %c0_51 = arith.constant 0 : index
    %c0_52 = arith.constant 0 : index
    %90 = vector.load %arg18[%c0_51, %c0_52] : memref<100x36xf32, #tpu.memory_space<vmem>>, vector<100x36xf32>
    %c0_53 = arith.constant 0 : index
    %c0_54 = arith.constant 0 : index
    %91 = vector.load %arg19[%c0_53, %c0_54] : memref<100x100xf32, #tpu.memory_space<vmem>>, vector<100x100xf32>
    %92 = vector.extract_strided_slice %83 {offsets = [0, 0], sizes = [8, 102], strides = [1, 1]} : vector<8x164xf32> to vector<8x102xf32>
    %93 = vector.extract_strided_slice %83 {offsets = [0, 10], sizes = [8, 102], strides = [1, 1]} : vector<8x164xf32> to vector<8x102xf32>
    %94 = vector.extract_strided_slice %83 {offsets = [0, 20], sizes = [8, 102], strides = [1, 1]} : vector<8x164xf32> to vector<8x102xf32>
    %95 = tpu.concatenate %92, %93, %94 in 0 : vector<8x102xf32>, vector<8x102xf32>, vector<8x102xf32> -> vector<24x102xf32>
    %96 = vector.extract_strided_slice %84 {offsets = [0, 0, 0], sizes = [1, 16, 24], strides = [1, 1, 1]} : vector<3x16x24xf32> to vector<1x16x24xf32>
    %97 = vector.shape_cast %96 : vector<1x16x24xf32> to vector<16x24xf32>
    %98 = vector.extract_strided_slice %95 {offsets = [0, 0], sizes = [24, 100], strides = [1, 1]} : vector<24x102xf32> to vector<24x100xf32>
    %cst_55 = arith.constant dense<0.000000e+00> : vector<16x100xf32>
    %99 = tpu.matmul %97, %98, %cst_55 {dimension_numbers = #tpu.dot_dimension_numbers<[1], [0], [0], [1], [0, 0, 1, 1], [], []>} : vector<16x24xf32>, vector<24x100xf32>, vector<16x100xf32> -> vector<16x100xf32>
    %100 = vector.extract_strided_slice %84 {offsets = [1, 0, 0], sizes = [1, 16, 24], strides = [1, 1, 1]} : vector<3x16x24xf32> to vector<1x16x24xf32>
    %101 = vector.shape_cast %100 : vector<1x16x24xf32> to vector<16x24xf32>
    %102 = vector.extract_strided_slice %95 {offsets = [0, 1], sizes = [24, 100], strides = [1, 1]} : vector<24x102xf32> to vector<24x100xf32>
    %cst_56 = arith.constant dense<0.000000e+00> : vector<16x100xf32>
    %103 = tpu.matmul %101, %102, %cst_56 {dimension_numbers = #tpu.dot_dimension_numbers<[1], [0], [0], [1], [0, 0, 1, 1], [], []>} : vector<16x24xf32>, vector<24x100xf32>, vector<16x100xf32> -> vector<16x100xf32>
    %104 = arith.addf %99, %103 : vector<16x100xf32>
    %105 = vector.extract_strided_slice %84 {offsets = [2, 0, 0], sizes = [1, 16, 24], strides = [1, 1, 1]} : vector<3x16x24xf32> to vector<1x16x24xf32>
    %106 = vector.shape_cast %105 : vector<1x16x24xf32> to vector<16x24xf32>
    %107 = vector.extract_strided_slice %95 {offsets = [0, 2], sizes = [24, 100], strides = [1, 1]} : vector<24x102xf32> to vector<24x100xf32>
    %cst_57 = arith.constant dense<0.000000e+00> : vector<16x100xf32>
    %108 = tpu.matmul %106, %107, %cst_57 {dimension_numbers = #tpu.dot_dimension_numbers<[1], [0], [0], [1], [0, 0, 1, 1], [], []>} : vector<16x24xf32>, vector<24x100xf32>, vector<16x100xf32> -> vector<16x100xf32>
    %109 = arith.addf %104, %108 : vector<16x100xf32>
    %110 = vector.broadcast %85 : vector<16x1xf32> to vector<16x100xf32>
    %111 = arith.addf %109, %110 : vector<16x100xf32>
    %cst_58 = arith.constant 0.000000e+00 : f32
    %112 = vector.broadcast %cst_58 : f32 to vector<16x100xf32>
    %113 = arith.maximumf %111, %112 : vector<16x100xf32>
    %cst_59 = arith.constant dense<0.000000e+00> : vector<16x100xf32>
    %114 = tpu.matmul %113, %91, %cst_59 {dimension_numbers = #tpu.dot_dimension_numbers<[1], [0], [0], [1], [0, 0, 1, 1], [], []>} : vector<16x100xf32>, vector<100x100xf32>, vector<16x100xf32> -> vector<16x100xf32>
    %115 = vector.extract_strided_slice %114 {offsets = [0, 0], sizes = [16, 38], strides = [1, 1]} : vector<16x100xf32> to vector<16x38xf32>
    %116 = vector.extract_strided_slice %114 {offsets = [0, 6], sizes = [16, 38], strides = [1, 1]} : vector<16x100xf32> to vector<16x38xf32>
    %117 = vector.extract_strided_slice %114 {offsets = [0, 12], sizes = [16, 38], strides = [1, 1]} : vector<16x100xf32> to vector<16x38xf32>
    %118 = tpu.concatenate %115, %116, %117 in 0 : vector<16x38xf32>, vector<16x38xf32>, vector<16x38xf32> -> vector<48x38xf32>
    %119 = vector.extract_strided_slice %86 {offsets = [0, 0, 0], sizes = [1, 16, 48], strides = [1, 1, 1]} : vector<3x16x48xf32> to vector<1x16x48xf32>
    %120 = vector.shape_cast %119 : vector<1x16x48xf32> to vector<16x48xf32>
    %121 = vector.extract_strided_slice %118 {offsets = [0, 0], sizes = [48, 36], strides = [1, 1]} : vector<48x38xf32> to vector<48x36xf32>
    %cst_60 = arith.constant dense<0.000000e+00> : vector<16x36xf32>
    %122 = tpu.matmul %120, %121, %cst_60 {dimension_numbers = #tpu.dot_dimension_numbers<[1], [0], [0], [1], [0, 0, 1, 1], [], []>} : vector<16x48xf32>, vector<48x36xf32>, vector<16x36xf32> -> vector<16x36xf32>
    %123 = vector.extract_strided_slice %86 {offsets = [1, 0, 0], sizes = [1, 16, 48], strides = [1, 1, 1]} : vector<3x16x48xf32> to vector<1x16x48xf32>
    %124 = vector.shape_cast %123 : vector<1x16x48xf32> to vector<16x48xf32>
    %125 = vector.extract_strided_slice %118 {offsets = [0, 1], sizes = [48, 36], strides = [1, 1]} : vector<48x38xf32> to vector<48x36xf32>
    %cst_61 = arith.constant dense<0.000000e+00> : vector<16x36xf32>
    %126 = tpu.matmul %124, %125, %cst_61 {dimension_numbers = #tpu.dot_dimension_numbers<[1], [0], [0], [1], [0, 0, 1, 1], [], []>} : vector<16x48xf32>, vector<48x36xf32>, vector<16x36xf32> -> vector<16x36xf32>
    %127 = arith.addf %122, %126 : vector<16x36xf32>
    %128 = vector.extract_strided_slice %86 {offsets = [2, 0, 0], sizes = [1, 16, 48], strides = [1, 1, 1]} : vector<3x16x48xf32> to vector<1x16x48xf32>
    %129 = vector.shape_cast %128 : vector<1x16x48xf32> to vector<16x48xf32>
    %130 = vector.extract_strided_slice %118 {offsets = [0, 2], sizes = [48, 36], strides = [1, 1]} : vector<48x38xf32> to vector<48x36xf32>
    %cst_62 = arith.constant dense<0.000000e+00> : vector<16x36xf32>
    %131 = tpu.matmul %129, %130, %cst_62 {dimension_numbers = #tpu.dot_dimension_numbers<[1], [0], [0], [1], [0, 0, 1, 1], [], []>} : vector<16x48xf32>, vector<48x36xf32>, vector<16x36xf32> -> vector<16x36xf32>
    %132 = arith.addf %127, %131 : vector<16x36xf32>
    %133 = vector.broadcast %87 : vector<16x1xf32> to vector<16x36xf32>
    %134 = arith.addf %132, %133 : vector<16x36xf32>
    %135 = vector.extract_strided_slice %83 {offsets = [0, 0], sizes = [8, 100], strides = [1, 1]} : vector<8x164xf32> to vector<8x100xf32>
    %cst_63 = arith.constant dense<0.000000e+00> : vector<16x100xf32>
    %136 = tpu.matmul %88, %135, %cst_63 {dimension_numbers = #tpu.dot_dimension_numbers<[1], [0], [0], [1], [0, 0, 1, 1], [], []>} : vector<16x8xf32>, vector<8x100xf32>, vector<16x100xf32> -> vector<16x100xf32>
    %cst_64 = arith.constant dense<0.000000e+00> : vector<16x36xf32>
    %137 = tpu.matmul %136, %90, %cst_64 {dimension_numbers = #tpu.dot_dimension_numbers<[1], [0], [0], [1], [0, 0, 1, 1], [], []>} : vector<16x100xf32>, vector<100x36xf32>, vector<16x36xf32> -> vector<16x36xf32>
    %138 = vector.broadcast %89 : vector<16x1xf32> to vector<16x36xf32>
    %139 = arith.addf %137, %138 : vector<16x36xf32>
    %140 = arith.addf %134, %139 : vector<16x36xf32>
    %cst_65 = arith.constant 0.000000e+00 : f32
    %141 = vector.broadcast %cst_65 : f32 to vector<16x36xf32>
    %142 = arith.maximumf %140, %141 : vector<16x36xf32>
    %c0_66 = arith.constant 0 : index
    %c0_67 = arith.constant 0 : index
    %143 = vector.load %arg20[%c0_66, %c0_67] : memref<36x100xf32, #tpu.memory_space<vmem>>, vector<36x100xf32>
    %cst_68 = arith.constant dense<0.000000e+00> : vector<16x100xf32>
    %144 = tpu.matmul %142, %143, %cst_68 {dimension_numbers = #tpu.dot_dimension_numbers<[1], [0], [0], [1], [0, 0, 1, 1], [], []>} : vector<16x36xf32>, vector<36x100xf32>, vector<16x100xf32> -> vector<16x100xf32>
    %c0_69 = arith.constant 0 : index
    %c0_70 = arith.constant 0 : index
    %c0_71 = arith.constant 0 : index
    %145 = vector.load %arg21[%c0_69, %c0_70, %c0_71] : memref<3x32x48xf32, #tpu.memory_space<vmem>>, vector<3x32x48xf32>
    %c0_72 = arith.constant 0 : index
    %c0_73 = arith.constant 0 : index
    %146 = vector.load %arg22[%c0_72, %c0_73] : memref<32x1xf32, #tpu.memory_space<vmem>>, vector<32x1xf32>
    %c0_74 = arith.constant 0 : index
    %c0_75 = arith.constant 0 : index
    %c0_76 = arith.constant 0 : index
    %147 = vector.load %arg23[%c0_74, %c0_75, %c0_76] : memref<3x32x96xf32, #tpu.memory_space<vmem>>, vector<3x32x96xf32>
    %c0_77 = arith.constant 0 : index
    %c0_78 = arith.constant 0 : index
    %148 = vector.load %arg24[%c0_77, %c0_78] : memref<32x1xf32, #tpu.memory_space<vmem>>, vector<32x1xf32>
    %c0_79 = arith.constant 0 : index
    %c0_80 = arith.constant 0 : index
    %149 = vector.load %arg25[%c0_79, %c0_80] : memref<32x16xf32, #tpu.memory_space<vmem>>, vector<32x16xf32>
    %c0_81 = arith.constant 0 : index
    %c0_82 = arith.constant 0 : index
    %150 = vector.load %arg26[%c0_81, %c0_82] : memref<32x1xf32, #tpu.memory_space<vmem>>, vector<32x1xf32>
    %c0_83 = arith.constant 0 : index
    %c0_84 = arith.constant 0 : index
    %151 = vector.load %arg27[%c0_83, %c0_84] : memref<36x16xf32, #tpu.memory_space<vmem>>, vector<36x16xf32>
    %c0_85 = arith.constant 0 : index
    %c0_86 = arith.constant 0 : index
    %152 = vector.load %arg28[%c0_85, %c0_86] : memref<36x80xf32, #tpu.memory_space<vmem>>, vector<36x80xf32>
    %153 = vector.extract_strided_slice %144 {offsets = [0, 0], sizes = [16, 38], strides = [1, 1]} : vector<16x100xf32> to vector<16x38xf32>
    %154 = vector.extract_strided_slice %144 {offsets = [0, 6], sizes = [16, 38], strides = [1, 1]} : vector<16x100xf32> to vector<16x38xf32>
    %155 = vector.extract_strided_slice %144 {offsets = [0, 12], sizes = [16, 38], strides = [1, 1]} : vector<16x100xf32> to vector<16x38xf32>
    %156 = tpu.concatenate %153, %154, %155 in 0 : vector<16x38xf32>, vector<16x38xf32>, vector<16x38xf32> -> vector<48x38xf32>
    %157 = vector.extract_strided_slice %145 {offsets = [0, 0, 0], sizes = [1, 32, 48], strides = [1, 1, 1]} : vector<3x32x48xf32> to vector<1x32x48xf32>
    %158 = vector.shape_cast %157 : vector<1x32x48xf32> to vector<32x48xf32>
    %159 = vector.extract_strided_slice %156 {offsets = [0, 0], sizes = [48, 36], strides = [1, 1]} : vector<48x38xf32> to vector<48x36xf32>
    %cst_87 = arith.constant dense<0.000000e+00> : vector<32x36xf32>
    %160 = tpu.matmul %158, %159, %cst_87 {dimension_numbers = #tpu.dot_dimension_numbers<[1], [0], [0], [1], [0, 0, 1, 1], [], []>} : vector<32x48xf32>, vector<48x36xf32>, vector<32x36xf32> -> vector<32x36xf32>
    %161 = vector.extract_strided_slice %145 {offsets = [1, 0, 0], sizes = [1, 32, 48], strides = [1, 1, 1]} : vector<3x32x48xf32> to vector<1x32x48xf32>
    %162 = vector.shape_cast %161 : vector<1x32x48xf32> to vector<32x48xf32>
    %163 = vector.extract_strided_slice %156 {offsets = [0, 1], sizes = [48, 36], strides = [1, 1]} : vector<48x38xf32> to vector<48x36xf32>
    %cst_88 = arith.constant dense<0.000000e+00> : vector<32x36xf32>
    %164 = tpu.matmul %162, %163, %cst_88 {dimension_numbers = #tpu.dot_dimension_numbers<[1], [0], [0], [1], [0, 0, 1, 1], [], []>} : vector<32x48xf32>, vector<48x36xf32>, vector<32x36xf32> -> vector<32x36xf32>
    %165 = arith.addf %160, %164 : vector<32x36xf32>
    %166 = vector.extract_strided_slice %145 {offsets = [2, 0, 0], sizes = [1, 32, 48], strides = [1, 1, 1]} : vector<3x32x48xf32> to vector<1x32x48xf32>
    %167 = vector.shape_cast %166 : vector<1x32x48xf32> to vector<32x48xf32>
    %168 = vector.extract_strided_slice %156 {offsets = [0, 2], sizes = [48, 36], strides = [1, 1]} : vector<48x38xf32> to vector<48x36xf32>
    %cst_89 = arith.constant dense<0.000000e+00> : vector<32x36xf32>
    %169 = tpu.matmul %167, %168, %cst_89 {dimension_numbers = #tpu.dot_dimension_numbers<[1], [0], [0], [1], [0, 0, 1, 1], [], []>} : vector<32x48xf32>, vector<48x36xf32>, vector<32x36xf32> -> vector<32x36xf32>
    %170 = arith.addf %165, %169 : vector<32x36xf32>
    %171 = vector.broadcast %146 : vector<32x1xf32> to vector<32x36xf32>
    %172 = arith.addf %170, %171 : vector<32x36xf32>
    %cst_90 = arith.constant 0.000000e+00 : f32
    %173 = vector.broadcast %cst_90 : f32 to vector<32x36xf32>
    %174 = arith.maximumf %172, %173 : vector<32x36xf32>
    %cst_91 = arith.constant dense<0.000000e+00> : vector<32x80xf32>
    %175 = tpu.matmul %174, %152, %cst_91 {dimension_numbers = #tpu.dot_dimension_numbers<[1], [0], [0], [1], [0, 0, 1, 1], [], []>} : vector<32x36xf32>, vector<36x80xf32>, vector<32x80xf32> -> vector<32x80xf32>
    %176 = vector.extract_strided_slice %175 {offsets = [0, 0], sizes = [32, 18], strides = [1, 1]} : vector<32x80xf32> to vector<32x18xf32>
    %177 = vector.extract_strided_slice %175 {offsets = [0, 4], sizes = [32, 18], strides = [1, 1]} : vector<32x80xf32> to vector<32x18xf32>
    %178 = vector.extract_strided_slice %175 {offsets = [0, 8], sizes = [32, 18], strides = [1, 1]} : vector<32x80xf32> to vector<32x18xf32>
    %179 = tpu.concatenate %176, %177, %178 in 0 : vector<32x18xf32>, vector<32x18xf32>, vector<32x18xf32> -> vector<96x18xf32>
    %180 = vector.extract_strided_slice %147 {offsets = [0, 0, 0], sizes = [1, 32, 96], strides = [1, 1, 1]} : vector<3x32x96xf32> to vector<1x32x96xf32>
    %181 = vector.shape_cast %180 : vector<1x32x96xf32> to vector<32x96xf32>
    %182 = vector.extract_strided_slice %179 {offsets = [0, 0], sizes = [96, 16], strides = [1, 1]} : vector<96x18xf32> to vector<96x16xf32>
    %cst_92 = arith.constant dense<0.000000e+00> : vector<32x16xf32>
    %183 = tpu.matmul %181, %182, %cst_92 {dimension_numbers = #tpu.dot_dimension_numbers<[1], [0], [0], [1], [0, 0, 1, 1], [], []>} : vector<32x96xf32>, vector<96x16xf32>, vector<32x16xf32> -> vector<32x16xf32>
    %184 = vector.extract_strided_slice %147 {offsets = [1, 0, 0], sizes = [1, 32, 96], strides = [1, 1, 1]} : vector<3x32x96xf32> to vector<1x32x96xf32>
    %185 = vector.shape_cast %184 : vector<1x32x96xf32> to vector<32x96xf32>
    %186 = vector.extract_strided_slice %179 {offsets = [0, 1], sizes = [96, 16], strides = [1, 1]} : vector<96x18xf32> to vector<96x16xf32>
    %cst_93 = arith.constant dense<0.000000e+00> : vector<32x16xf32>
    %187 = tpu.matmul %185, %186, %cst_93 {dimension_numbers = #tpu.dot_dimension_numbers<[1], [0], [0], [1], [0, 0, 1, 1], [], []>} : vector<32x96xf32>, vector<96x16xf32>, vector<32x16xf32> -> vector<32x16xf32>
    %188 = arith.addf %183, %187 : vector<32x16xf32>
    %189 = vector.extract_strided_slice %147 {offsets = [2, 0, 0], sizes = [1, 32, 96], strides = [1, 1, 1]} : vector<3x32x96xf32> to vector<1x32x96xf32>
    %190 = vector.shape_cast %189 : vector<1x32x96xf32> to vector<32x96xf32>
    %191 = vector.extract_strided_slice %179 {offsets = [0, 2], sizes = [96, 16], strides = [1, 1]} : vector<96x18xf32> to vector<96x16xf32>
    %cst_94 = arith.constant dense<0.000000e+00> : vector<32x16xf32>
    %192 = tpu.matmul %190, %191, %cst_94 {dimension_numbers = #tpu.dot_dimension_numbers<[1], [0], [0], [1], [0, 0, 1, 1], [], []>} : vector<32x96xf32>, vector<96x16xf32>, vector<32x16xf32> -> vector<32x16xf32>
    %193 = arith.addf %188, %192 : vector<32x16xf32>
    %194 = vector.broadcast %148 : vector<32x1xf32> to vector<32x16xf32>
    %195 = arith.addf %193, %194 : vector<32x16xf32>
    %196 = vector.extract_strided_slice %144 {offsets = [0, 0], sizes = [16, 36], strides = [1, 1]} : vector<16x100xf32> to vector<16x36xf32>
    %cst_95 = arith.constant dense<0.000000e+00> : vector<32x36xf32>
    %197 = tpu.matmul %149, %196, %cst_95 {dimension_numbers = #tpu.dot_dimension_numbers<[1], [0], [0], [1], [0, 0, 1, 1], [], []>} : vector<32x16xf32>, vector<16x36xf32>, vector<32x36xf32> -> vector<32x36xf32>
    %cst_96 = arith.constant dense<0.000000e+00> : vector<32x16xf32>
    %198 = tpu.matmul %197, %151, %cst_96 {dimension_numbers = #tpu.dot_dimension_numbers<[1], [0], [0], [1], [0, 0, 1, 1], [], []>} : vector<32x36xf32>, vector<36x16xf32>, vector<32x16xf32> -> vector<32x16xf32>
    %199 = vector.broadcast %150 : vector<32x1xf32> to vector<32x16xf32>
    %200 = arith.addf %198, %199 : vector<32x16xf32>
    %201 = arith.addf %195, %200 : vector<32x16xf32>
    %cst_97 = arith.constant 0.000000e+00 : f32
    %202 = vector.broadcast %cst_97 : f32 to vector<32x16xf32>
    %203 = arith.maximumf %201, %202 : vector<32x16xf32>
    %c0_98 = arith.constant 0 : index
    %c0_99 = arith.constant 0 : index
    %204 = vector.load %arg29[%c0_98, %c0_99] : memref<16x80xf32, #tpu.memory_space<vmem>>, vector<16x80xf32>
    %cst_100 = arith.constant dense<0.000000e+00> : vector<32x80xf32>
    %205 = tpu.matmul %203, %204, %cst_100 {dimension_numbers = #tpu.dot_dimension_numbers<[1], [0], [0], [1], [0, 0, 1, 1], [], []>} : vector<32x16xf32>, vector<16x80xf32>, vector<32x80xf32> -> vector<32x80xf32>
    %c0_101 = arith.constant 0 : index
    %c0_102 = arith.constant 0 : index
    %c0_103 = arith.constant 0 : index
    %206 = vector.load %arg30[%c0_101, %c0_102, %c0_103] : memref<3x64x96xf32, #tpu.memory_space<vmem>>, vector<3x64x96xf32>
    %c0_104 = arith.constant 0 : index
    %c0_105 = arith.constant 0 : index
    %207 = vector.load %arg31[%c0_104, %c0_105] : memref<64x1xf32, #tpu.memory_space<vmem>>, vector<64x1xf32>
    %c0_106 = arith.constant 0 : index
    %c0_107 = arith.constant 0 : index
    %c0_108 = arith.constant 0 : index
    %208 = vector.load %arg32[%c0_106, %c0_107, %c0_108] : memref<3x64x192xf32, #tpu.memory_space<vmem>>, vector<3x64x192xf32>
    %c0_109 = arith.constant 0 : index
    %c0_110 = arith.constant 0 : index
    %209 = vector.load %arg33[%c0_109, %c0_110] : memref<64x1xf32, #tpu.memory_space<vmem>>, vector<64x1xf32>
    %c0_111 = arith.constant 0 : index
    %c0_112 = arith.constant 0 : index
    %210 = vector.load %arg34[%c0_111, %c0_112] : memref<64x32xf32, #tpu.memory_space<vmem>>, vector<64x32xf32>
    %c0_113 = arith.constant 0 : index
    %c0_114 = arith.constant 0 : index
    %211 = vector.load %arg35[%c0_113, %c0_114] : memref<64x1xf32, #tpu.memory_space<vmem>>, vector<64x1xf32>
    %c0_115 = arith.constant 0 : index
    %c0_116 = arith.constant 0 : index
    %212 = vector.load %arg36[%c0_115, %c0_116] : memref<16x9xf32, #tpu.memory_space<vmem>>, vector<16x9xf32>
    %c0_117 = arith.constant 0 : index
    %c0_118 = arith.constant 0 : index
    %213 = vector.load %arg37[%c0_117, %c0_118] : memref<16x73xf32, #tpu.memory_space<vmem>>, vector<16x73xf32>
    %214 = vector.extract_strided_slice %205 {offsets = [0, 0], sizes = [32, 18], strides = [1, 1]} : vector<32x80xf32> to vector<32x18xf32>
    %215 = vector.extract_strided_slice %205 {offsets = [0, 4], sizes = [32, 18], strides = [1, 1]} : vector<32x80xf32> to vector<32x18xf32>
    %216 = vector.extract_strided_slice %205 {offsets = [0, 8], sizes = [32, 18], strides = [1, 1]} : vector<32x80xf32> to vector<32x18xf32>
    %217 = tpu.concatenate %214, %215, %216 in 0 : vector<32x18xf32>, vector<32x18xf32>, vector<32x18xf32> -> vector<96x18xf32>
    %218 = vector.extract_strided_slice %206 {offsets = [0, 0, 0], sizes = [1, 64, 96], strides = [1, 1, 1]} : vector<3x64x96xf32> to vector<1x64x96xf32>
    %219 = vector.shape_cast %218 : vector<1x64x96xf32> to vector<64x96xf32>
    %220 = vector.extract_strided_slice %217 {offsets = [0, 0], sizes = [96, 16], strides = [1, 1]} : vector<96x18xf32> to vector<96x16xf32>
    %cst_119 = arith.constant dense<0.000000e+00> : vector<64x16xf32>
    %221 = tpu.matmul %219, %220, %cst_119 {dimension_numbers = #tpu.dot_dimension_numbers<[1], [0], [0], [1], [0, 0, 1, 1], [], []>} : vector<64x96xf32>, vector<96x16xf32>, vector<64x16xf32> -> vector<64x16xf32>
    %222 = vector.extract_strided_slice %206 {offsets = [1, 0, 0], sizes = [1, 64, 96], strides = [1, 1, 1]} : vector<3x64x96xf32> to vector<1x64x96xf32>
    %223 = vector.shape_cast %222 : vector<1x64x96xf32> to vector<64x96xf32>
    %224 = vector.extract_strided_slice %217 {offsets = [0, 1], sizes = [96, 16], strides = [1, 1]} : vector<96x18xf32> to vector<96x16xf32>
    %cst_120 = arith.constant dense<0.000000e+00> : vector<64x16xf32>
    %225 = tpu.matmul %223, %224, %cst_120 {dimension_numbers = #tpu.dot_dimension_numbers<[1], [0], [0], [1], [0, 0, 1, 1], [], []>} : vector<64x96xf32>, vector<96x16xf32>, vector<64x16xf32> -> vector<64x16xf32>
    %226 = arith.addf %221, %225 : vector<64x16xf32>
    %227 = vector.extract_strided_slice %206 {offsets = [2, 0, 0], sizes = [1, 64, 96], strides = [1, 1, 1]} : vector<3x64x96xf32> to vector<1x64x96xf32>
    %228 = vector.shape_cast %227 : vector<1x64x96xf32> to vector<64x96xf32>
    %229 = vector.extract_strided_slice %217 {offsets = [0, 2], sizes = [96, 16], strides = [1, 1]} : vector<96x18xf32> to vector<96x16xf32>
    %cst_121 = arith.constant dense<0.000000e+00> : vector<64x16xf32>
    %230 = tpu.matmul %228, %229, %cst_121 {dimension_numbers = #tpu.dot_dimension_numbers<[1], [0], [0], [1], [0, 0, 1, 1], [], []>} : vector<64x96xf32>, vector<96x16xf32>, vector<64x16xf32> -> vector<64x16xf32>
    %231 = arith.addf %226, %230 : vector<64x16xf32>
    %232 = vector.broadcast %207 : vector<64x1xf32> to vector<64x16xf32>
    %233 = arith.addf %231, %232 : vector<64x16xf32>
    %cst_122 = arith.constant 0.000000e+00 : f32
    %234 = vector.broadcast %cst_122 : f32 to vector<64x16xf32>
    %235 = arith.maximumf %233, %234 : vector<64x16xf32>
    %cst_123 = arith.constant dense<0.000000e+00> : vector<64x73xf32>
    %236 = tpu.matmul %235, %213, %cst_123 {dimension_numbers = #tpu.dot_dimension_numbers<[1], [0], [0], [1], [0, 0, 1, 1], [], []>} : vector<64x16xf32>, vector<16x73xf32>, vector<64x73xf32> -> vector<64x73xf32>
    %237 = vector.extract_strided_slice %236 {offsets = [0, 0], sizes = [64, 11], strides = [1, 1]} : vector<64x73xf32> to vector<64x11xf32>
    %238 = vector.extract_strided_slice %236 {offsets = [0, 3], sizes = [64, 11], strides = [1, 1]} : vector<64x73xf32> to vector<64x11xf32>
    %239 = vector.extract_strided_slice %236 {offsets = [0, 6], sizes = [64, 11], strides = [1, 1]} : vector<64x73xf32> to vector<64x11xf32>
    %240 = tpu.concatenate %237, %238, %239 in 0 : vector<64x11xf32>, vector<64x11xf32>, vector<64x11xf32> -> vector<192x11xf32>
    %241 = vector.extract_strided_slice %208 {offsets = [0, 0, 0], sizes = [1, 64, 192], strides = [1, 1, 1]} : vector<3x64x192xf32> to vector<1x64x192xf32>
    %242 = vector.shape_cast %241 : vector<1x64x192xf32> to vector<64x192xf32>
    %243 = vector.extract_strided_slice %240 {offsets = [0, 0], sizes = [192, 9], strides = [1, 1]} : vector<192x11xf32> to vector<192x9xf32>
    %cst_124 = arith.constant dense<0.000000e+00> : vector<64x9xf32>
    %244 = tpu.matmul %242, %243, %cst_124 {dimension_numbers = #tpu.dot_dimension_numbers<[1], [0], [0], [1], [0, 0, 1, 1], [], []>} : vector<64x192xf32>, vector<192x9xf32>, vector<64x9xf32> -> vector<64x9xf32>
    %245 = vector.extract_strided_slice %208 {offsets = [1, 0, 0], sizes = [1, 64, 192], strides = [1, 1, 1]} : vector<3x64x192xf32> to vector<1x64x192xf32>
    %246 = vector.shape_cast %245 : vector<1x64x192xf32> to vector<64x192xf32>
    %247 = vector.extract_strided_slice %240 {offsets = [0, 1], sizes = [192, 9], strides = [1, 1]} : vector<192x11xf32> to vector<192x9xf32>
    %cst_125 = arith.constant dense<0.000000e+00> : vector<64x9xf32>
    %248 = tpu.matmul %246, %247, %cst_125 {dimension_numbers = #tpu.dot_dimension_numbers<[1], [0], [0], [1], [0, 0, 1, 1], [], []>} : vector<64x192xf32>, vector<192x9xf32>, vector<64x9xf32> -> vector<64x9xf32>
    %249 = arith.addf %244, %248 : vector<64x9xf32>
    %250 = vector.extract_strided_slice %208 {offsets = [2, 0, 0], sizes = [1, 64, 192], strides = [1, 1, 1]} : vector<3x64x192xf32> to vector<1x64x192xf32>
    %251 = vector.shape_cast %250 : vector<1x64x192xf32> to vector<64x192xf32>
    %252 = vector.extract_strided_slice %240 {offsets = [0, 2], sizes = [192, 9], strides = [1, 1]} : vector<192x11xf32> to vector<192x9xf32>
    %cst_126 = arith.constant dense<0.000000e+00> : vector<64x9xf32>
    %253 = tpu.matmul %251, %252, %cst_126 {dimension_numbers = #tpu.dot_dimension_numbers<[1], [0], [0], [1], [0, 0, 1, 1], [], []>} : vector<64x192xf32>, vector<192x9xf32>, vector<64x9xf32> -> vector<64x9xf32>
    %254 = arith.addf %249, %253 : vector<64x9xf32>
    %255 = vector.broadcast %209 : vector<64x1xf32> to vector<64x9xf32>
    %256 = arith.addf %254, %255 : vector<64x9xf32>
    %257 = vector.extract_strided_slice %205 {offsets = [0, 0], sizes = [32, 16], strides = [1, 1]} : vector<32x80xf32> to vector<32x16xf32>
    %cst_127 = arith.constant dense<0.000000e+00> : vector<64x16xf32>
    %258 = tpu.matmul %210, %257, %cst_127 {dimension_numbers = #tpu.dot_dimension_numbers<[1], [0], [0], [1], [0, 0, 1, 1], [], []>} : vector<64x32xf32>, vector<32x16xf32>, vector<64x16xf32> -> vector<64x16xf32>
    %cst_128 = arith.constant dense<0.000000e+00> : vector<64x9xf32>
    %259 = tpu.matmul %258, %212, %cst_128 {dimension_numbers = #tpu.dot_dimension_numbers<[1], [0], [0], [1], [0, 0, 1, 1], [], []>} : vector<64x16xf32>, vector<16x9xf32>, vector<64x9xf32> -> vector<64x9xf32>
    %260 = vector.broadcast %211 : vector<64x1xf32> to vector<64x9xf32>
    %261 = arith.addf %259, %260 : vector<64x9xf32>
    %262 = arith.addf %256, %261 : vector<64x9xf32>
    %cst_129 = arith.constant 0.000000e+00 : f32
    %263 = vector.broadcast %cst_129 : f32 to vector<64x9xf32>
    %264 = arith.maximumf %262, %263 : vector<64x9xf32>
    %c0_130 = arith.constant 0 : index
    %c0_131 = arith.constant 0 : index
    %265 = vector.load %arg38[%c0_130, %c0_131] : memref<1x9xf32, #tpu.memory_space<vmem>>, vector<1x9xf32>
    %266 = vector.broadcast %265 : vector<1x9xf32> to vector<64x9xf32>
    %267 = arith.mulf %264, %266 : vector<64x9xf32>
    %cst_132 = arith.constant dense<0.000000e+00> : vector<64xf32>
    %268 = vector.multi_reduction <add>, %267, %cst_132 [1] : vector<64x9xf32> to vector<64xf32>
    %269 = vector.shape_cast %268 : vector<64xf32> to vector<64x1xf32>
    %c0_133 = arith.constant 0 : index
    %c0_134 = arith.constant 0 : index
    %270 = vector.load %arg39[%c0_133, %c0_134] : memref<64x128xf32, #tpu.memory_space<vmem>>, vector<64x128xf32>
    %c0_135 = arith.constant 0 : index
    %c0_136 = arith.constant 0 : index
    %271 = vector.load %arg40[%c0_135, %c0_136] : memref<1x128xf32, #tpu.memory_space<vmem>>, vector<1x128xf32>
    %272 = vector.broadcast %269 : vector<64x1xf32> to vector<64x128xf32>
    %273 = arith.mulf %272, %270 : vector<64x128xf32>
    %cst_137 = arith.constant dense<0.000000e+00> : vector<128xf32>
    %274 = vector.multi_reduction <add>, %273, %cst_137 [0] : vector<64x128xf32> to vector<128xf32>
    %275 = vector.shape_cast %274 : vector<128xf32> to vector<1x128xf32>
    %276 = arith.addf %275, %271 : vector<1x128xf32>
    %c0_138 = arith.constant 0 : index
    %c0_139 = arith.constant 0 : index
    %c0_140 = arith.constant 0 : index
    %277 = vector.load %arg41[%c0_138, %c0_139, %c0_140] : memref<1x1x128xf32, #tpu.memory_space<vmem>>, vector<1x1x128xf32>
    %278 = vector.shape_cast %277 : vector<1x1x128xf32> to vector<1x128xf32>
    %279 = vector.shape_cast %276 : vector<1x128xf32> to vector<1x1x128xf32>
    tpu.vector_store %arg41[%c0_138, %c0_139, %c0_140], %279 {strides = array<i32>} : memref<1x1x128xf32, #tpu.memory_space<vmem>>, vector<1x1x128xf32>,
    return
  }
  func.func @transform_0(%arg0: i32) -> (i32, i32, i32) {
    %c0_i32 = arith.constant 0 : i32
    %c0_i32_0 = arith.constant 0 : i32
    %c0_i32_1 = arith.constant 0 : i32
    return %arg0, %c0_i32, %c0_i32_0 : i32, i32, i32
  }
  func.func @transform_1(%arg0: i32) -> (i32, i32) {
    %c0_i32 = arith.constant 0 : i32
    %c0_i32_0 = arith.constant 0 : i32
    %c0_i32_1 = arith.constant 0 : i32
    return %c0_i32, %c0_i32_0 : i32, i32
  }
  func.func @transform_2(%arg0: i32) -> (i32, i32) {
    %c0_i32 = arith.constant 0 : i32
    %c0_i32_0 = arith.constant 0 : i32
    %c0_i32_1 = arith.constant 0 : i32
    return %c0_i32, %c0_i32_0 : i32, i32
  }
  func.func @transform_3(%arg0: i32) -> (i32, i32) {
    %c0_i32 = arith.constant 0 : i32
    %c0_i32_0 = arith.constant 0 : i32
    %c0_i32_1 = arith.constant 0 : i32
    return %c0_i32, %c0_i32_0 : i32, i32
  }
  func.func @transform_4(%arg0: i32) -> (i32, i32) {
    %c0_i32 = arith.constant 0 : i32
    %c0_i32_0 = arith.constant 0 : i32
    %c0_i32_1 = arith.constant 0 : i32
    return %c0_i32, %c0_i32_0 : i32, i32
  }
  func.func @transform_5(%arg0: i32) -> (i32, i32, i32) {
    %c0_i32 = arith.constant 0 : i32
    %c0_i32_0 = arith.constant 0 : i32
    %c0_i32_1 = arith.constant 0 : i32
    %c0_i32_2 = arith.constant 0 : i32
    return %c0_i32, %c0_i32_0, %c0_i32_1 : i32, i32, i32
  }
  func.func @transform_6(%arg0: i32) -> (i32, i32) {
    %c0_i32 = arith.constant 0 : i32
    %c0_i32_0 = arith.constant 0 : i32
    %c0_i32_1 = arith.constant 0 : i32
    return %c0_i32, %c0_i32_0 : i32, i32
  }
  func.func @transform_7(%arg0: i32) -> (i32, i32, i32) {
    %c0_i32 = arith.constant 0 : i32
    %c0_i32_0 = arith.constant 0 : i32
    %c0_i32_1 = arith.constant 0 : i32
    %c0_i32_2 = arith.constant 0 : i32
    return %c0_i32, %c0_i32_0, %c0_i32_1 : i32, i32, i32
  }
  func.func @transform_8(%arg0: i32) -> (i32, i32) {
    %c0_i32 = arith.constant 0 : i32
    %c0_i32_0 = arith.constant 0 : i32
    %c0_i32_1 = arith.constant 0 : i32
    return %c0_i32, %c0_i32_0 : i32, i32
  }
  func.func @transform_9(%arg0: i32) -> (i32, i32) {
    %c0_i32 = arith.constant 0 : i32
    %c0_i32_0 = arith.constant 0 : i32
    %c0_i32_1 = arith.constant 0 : i32
    return %c0_i32, %c0_i32_0 : i32, i32
  }
  func.func @transform_10(%arg0: i32) -> (i32, i32) {
    %c0_i32 = arith.constant 0 : i32
    %c0_i32_0 = arith.constant 0 : i32
    %c0_i32_1 = arith.constant 0 : i32
    return %c0_i32, %c0_i32_0 : i32, i32
  }
  func.func @transform_11(%arg0: i32) -> (i32, i32, i32) {
    %c0_i32 = arith.constant 0 : i32
    %c0_i32_0 = arith.constant 0 : i32
    %c0_i32_1 = arith.constant 0 : i32
    %c0_i32_2 = arith.constant 0 : i32
    return %c0_i32, %c0_i32_0, %c0_i32_1 : i32, i32, i32
  }
  func.func @transform_12(%arg0: i32) -> (i32, i32) {
    %c0_i32 = arith.constant 0 : i32
    %c0_i32_0 = arith.constant 0 : i32
    %c0_i32_1 = arith.constant 0 : i32
    return %c0_i32, %c0_i32_0 : i32, i32
  }
  func.func @transform_13(%arg0: i32) -> (i32, i32, i32) {
    %c0_i32 = arith.constant 0 : i32
    %c0_i32_0 = arith.constant 0 : i32
    %c0_i32_1 = arith.constant 0 : i32
    %c0_i32_2 = arith.constant 0 : i32
    return %c0_i32, %c0_i32_0, %c0_i32_1 : i32, i32, i32
  }
  func.func @transform_14(%arg0: i32) -> (i32, i32) {
    %c0_i32 = arith.constant 0 : i32
    %c0_i32_0 = arith.constant 0 : i32
    %c0_i32_1 = arith.constant 0 : i32
    return %c0_i32, %c0_i32_0 : i32, i32
  }
  func.func @transform_15(%arg0: i32) -> (i32, i32) {
    %c0_i32 = arith.constant 0 : i32
    %c0_i32_0 = arith.constant 0 : i32
    %c0_i32_1 = arith.constant 0 : i32
    return %c0_i32, %c0_i32_0 : i32, i32
  }
  func.func @transform_16(%arg0: i32) -> (i32, i32) {
    %c0_i32 = arith.constant 0 : i32
    %c0_i32_0 = arith.constant 0 : i32
    %c0_i32_1 = arith.constant 0 : i32
    return %c0_i32, %c0_i32_0 : i32, i32
  }
  func.func @transform_17(%arg0: i32) -> (i32, i32) {
    %c0_i32 = arith.constant 0 : i32
    %c0_i32_0 = arith.constant 0 : i32
    %c0_i32_1 = arith.constant 0 : i32
    return %c0_i32, %c0_i32_0 : i32, i32
  }
  func.func @transform_18(%arg0: i32) -> (i32, i32) {
    %c0_i32 = arith.constant 0 : i32
    %c0_i32_0 = arith.constant 0 : i32
    %c0_i32_1 = arith.constant 0 : i32
    return %c0_i32, %c0_i32_0 : i32, i32
  }
  func.func @transform_19(%arg0: i32) -> (i32, i32) {
    %c0_i32 = arith.constant 0 : i32
    %c0_i32_0 = arith.constant 0 : i32
    %c0_i32_1 = arith.constant 0 : i32
    return %c0_i32, %c0_i32_0 : i32, i32
  }
  func.func @transform_20(%arg0: i32) -> (i32, i32, i32) {
    %c0_i32 = arith.constant 0 : i32
    %c0_i32_0 = arith.constant 0 : i32
    %c0_i32_1 = arith.constant 0 : i32
    %c0_i32_2 = arith.constant 0 : i32
    return %c0_i32, %c0_i32_0, %c0_i32_1 : i32, i32, i32
  }
  func.func @transform_21(%arg0: i32) -> (i32, i32) {
    %c0_i32 = arith.constant 0 : i32
    %c0_i32_0 = arith.constant 0 : i32
    %c0_i32_1 = arith.constant 0 : i32
    return %c0_i32, %c0_i32_0 : i32, i32
  }
  func.func @transform_22(%arg0: i32) -> (i32, i32, i32) {
    %c0_i32 = arith.constant 0 : i32
    %c0_i32_0 = arith.constant 0 : i32
    %c0_i32_1 = arith.constant 0 : i32
    %c0_i32_2 = arith.constant 0 : i32
    return %c0_i32, %c0_i32_0, %c0_i32_1 : i32, i32, i32
  }
  func.func @transform_23(%arg0: i32) -> (i32, i32) {
    %c0_i32 = arith.constant 0 : i32
    %c0_i32_0 = arith.constant 0 : i32
    %c0_i32_1 = arith.constant 0 : i32
    return %c0_i32, %c0_i32_0 : i32, i32
  }
  func.func @transform_24(%arg0: i32) -> (i32, i32) {
    %c0_i32 = arith.constant 0 : i32
    %c0_i32_0 = arith.constant 0 : i32
    %c0_i32_1 = arith.constant 0 : i32
    return %c0_i32, %c0_i32_0 : i32, i32
  }
  func.func @transform_25(%arg0: i32) -> (i32, i32) {
    %c0_i32 = arith.constant 0 : i32
    %c0_i32_0 = arith.constant 0 : i32
    %c0_i32_1 = arith.constant 0 : i32
    return %c0_i32, %c0_i32_0 : i32, i32
  }
  func.func @transform_26(%arg0: i32) -> (i32, i32) {
    %c0_i32 = arith.constant 0 : i32
    %c0_i32_0 = arith.constant 0 : i32
    %c0_i32_1 = arith.constant 0 : i32
    return %c0_i32, %c0_i32_0 : i32, i32
  }
  func.func @transform_27(%arg0: i32) -> (i32, i32) {
    %c0_i32 = arith.constant 0 : i32
    %c0_i32_0 = arith.constant 0 : i32
    %c0_i32_1 = arith.constant 0 : i32
    return %c0_i32, %c0_i32_0 : i32, i32
  }
  func.func @transform_28(%arg0: i32) -> (i32, i32) {
    %c0_i32 = arith.constant 0 : i32
    %c0_i32_0 = arith.constant 0 : i32
    %c0_i32_1 = arith.constant 0 : i32
    return %c0_i32, %c0_i32_0 : i32, i32
  }
  func.func @transform_29(%arg0: i32) -> (i32, i32, i32) {
    %c0_i32 = arith.constant 0 : i32
    %c0_i32_0 = arith.constant 0 : i32
    %c0_i32_1 = arith.constant 0 : i32
    %c0_i32_2 = arith.constant 0 : i32
    return %c0_i32, %c0_i32_0, %c0_i32_1 : i32, i32, i32
  }
  func.func @transform_30(%arg0: i32) -> (i32, i32) {
    %c0_i32 = arith.constant 0 : i32
    %c0_i32_0 = arith.constant 0 : i32
    %c0_i32_1 = arith.constant 0 : i32
    return %c0_i32, %c0_i32_0 : i32, i32
  }
  func.func @transform_31(%arg0: i32) -> (i32, i32, i32) {
    %c0_i32 = arith.constant 0 : i32
    %c0_i32_0 = arith.constant 0 : i32
    %c0_i32_1 = arith.constant 0 : i32
    %c0_i32_2 = arith.constant 0 : i32
    return %c0_i32, %c0_i32_0, %c0_i32_1 : i32, i32, i32
  }
  func.func @transform_32(%arg0: i32) -> (i32, i32) {
    %c0_i32 = arith.constant 0 : i32
    %c0_i32_0 = arith.constant 0 : i32
    %c0_i32_1 = arith.constant 0 : i32
    return %c0_i32, %c0_i32_0 : i32, i32
  }
  func.func @transform_33(%arg0: i32) -> (i32, i32) {
    %c0_i32 = arith.constant 0 : i32
    %c0_i32_0 = arith.constant 0 : i32
    %c0_i32_1 = arith.constant 0 : i32
    return %c0_i32, %c0_i32_0 : i32, i32
  }
  func.func @transform_34(%arg0: i32) -> (i32, i32) {
    %c0_i32 = arith.constant 0 : i32
    %c0_i32_0 = arith.constant 0 : i32
    %c0_i32_1 = arith.constant 0 : i32
    return %c0_i32, %c0_i32_0 : i32, i32
  }
  func.func @transform_35(%arg0: i32) -> (i32, i32) {
    %c0_i32 = arith.constant 0 : i32
    %c0_i32_0 = arith.constant 0 : i32
    %c0_i32_1 = arith.constant 0 : i32
    return %c0_i32, %c0_i32_0 : i32, i32
  }
  func.func @transform_36(%arg0: i32) -> (i32, i32) {
    %c0_i32 = arith.constant 0 : i32
    %c0_i32_0 = arith.constant 0 : i32
    %c0_i32_1 = arith.constant 0 : i32
    return %c0_i32, %c0_i32_0 : i32, i32
  }
  func.func @transform_37(%arg0: i32) -> (i32, i32) {
    %c0_i32 = arith.constant 0 : i32
    %c0_i32_0 = arith.constant 0 : i32
    %c0_i32_1 = arith.constant 0 : i32
    return %c0_i32, %c0_i32_0 : i32, i32
  }
  func.func @transform_38(%arg0: i32) -> (i32, i32) {
    %c0_i32 = arith.constant 0 : i32
    %c0_i32_0 = arith.constant 0 : i32
    %c0_i32_1 = arith.constant 0 : i32
    return %c0_i32, %c0_i32_0 : i32, i32
  }
  func.func @transform_39(%arg0: i32) -> (i32, i32) {
    %c0_i32 = arith.constant 0 : i32
    %c0_i32_0 = arith.constant 0 : i32
    %c0_i32_1 = arith.constant 0 : i32
    return %c0_i32, %c0_i32_0 : i32, i32
  }
  func.func @transform_40(%arg0: i32) -> (i32, i32, i32) {
    %c0_i32 = arith.constant 0 : i32
    %c0_i32_0 = arith.constant 0 : i32
    %c0_i32_1 = arith.constant 0 : i32
    return %arg0, %c0_i32, %c0_i32_0 : i32, i32, i32
  }
}

</mosaic_0001>

<bundles_post_ra>
// kernel: resnet_forward.1
= control target key start
LH: loop header
LB: loop body
LE: loop exit
PB: predicated region body
PF: predicated region fallthrough
CT: control target
= control target key end

     0   :  { %s9291_s6 = smov 1   ;;  %s9292_s10 = smov 2   ;;  %s10697_s0 = inlined_call_operand.smem [shape: u32[41], index: -1, kind: input, shape index: {}] }
   0x1   :  { %s9359_s5 = sld [smem:[%s10697_s0]]   ;;  %s9293_s14 = smov 3  }
   0x2   :  { %s9364_s9 = sld [smem:[%s10697_s0 + %s9291_s6]]   ;;  %s9294_s18 = smov 4  }
   0x3   :  { %s9369_s13 = sld [smem:[%s10697_s0 + %s9292_s10]]   ;;  %s9295_s22 = smov 5  }
   0x4   :  { %s9374_s17 = sld [smem:[%s10697_s0 + %s9293_s14]]   ;;  %s9296_s26 = smov 6  }
   0x5   :  { %s9379_s21 = sld [smem:[%s10697_s0 + %s9294_s18]]   ;;  %s9297_s30 = smov 7  }
   0x6   :  { %s9384_s25 = sld [smem:[%s10697_s0 + %s9295_s22]]   ;;  %s9298_s4 = smov 8  }
   0x7   :  { %10754 = sst [smem:[#allocation5_spill]] %s9359_s5  ;;  %s9299_s10 = smov 9  }
   0x8   :  { %10755 = sst [smem:[#allocation6_spill]] %s9364_s9  ;;  %s9300_s15 = smov 10  }
   0x9   :  { %10756 = sst [smem:[#allocation7_spill]] %s9369_s13  ;;  %s9301_s20 = smov 11  }
   0xa   :  { %s9389_s29 = sld [smem:[%s10697_s0 + %s9296_s26]]   ;;  %s9302_s26 = smov 12  }
   0xb   :  { %s9394_s3 = sld [smem:[%s10697_s0 + %s9297_s30]]   ;;  %s9303_s1 = smov 13  }
   0xc   :  { %s9399_s8 = sld [smem:[%s10697_s0 + %s9298_s4]]   ;;  %s9304_s7 = smov 14  }
   0xd   :  { %s9404_s14 = sld [smem:[%s10697_s0 + %s9299_s10]]   ;;  %s9306_s22 = smov 16  }
   0xe   :  { %s9409_s19 = sld [smem:[%s10697_s0 + %s9300_s15]]   ;;  %s9305_s15 = smov 15  }
   0xf   :  { %s9414_s24 = sld [smem:[%s10697_s0 + %s9301_s20]]   ;;  %s9307_s28 = smov 17  }
  0x10   :  { %s9419_s30 = sld [smem:[%s10697_s0 + %s9302_s26]]  }
  0x11   :  { %10757 = sst [smem:[#allocation8_spill]] %s9394_s3 }
  0x12   :  { %10758 = sst [smem:[#allocation9_spill]] %s9399_s8 }
  0x13   :  { %s9424_s6 = sld [smem:[%s10697_s0 + %s9303_s1]]  }
  0x14   :  { %s9429_s12 = sld [smem:[%s10697_s0 + %s9304_s7]]   ;;  %s9308_s7 = smov 18  }
  0x15   :  { %s9434_s20 = sld [smem:[%s10697_s0 + %s9305_s15]]   ;;  %s9309_s15 = smov 19  }
  0x16   :  { %s9439_s27 = sld [smem:[%s10697_s0 + %s9306_s22]]   ;;  %s9310_s22 = smov 20  }
  0x17   :  { %s9444_s4 = sld [smem:[%s10697_s0 + %s9307_s28]]   ;;  %s9311_s28 = smov 21  }
  0x19   :  { %10759 = sst [smem:[#allocation10_spill]] %s9424_s6 }
  0x1a   :  { %10760 = sst [smem:[#allocation11_spill]] %s9429_s12 }
  0x1b   :  { %10761 = sst [smem:[#allocation12_spill]] %s9434_s20 }
  0x1c   :  { %10762 = sst [smem:[#allocation13_spill]] %s9439_s27 }
  0x1d   :  { %10763 = sst [smem:[#allocation14_spill]] %s9444_s4 }
  0x1e   :  { %s9449_s12 = sld [smem:[%s10697_s0 + %s9308_s7]]   ;;  %s9312_s7 = smov 22  }
  0x1f   :  { %s9454_s6 = sld [smem:[%s10697_s0 + %s9309_s15]]   ;;  %s9313_s15 = smov 23  }
  0x20   :  { %s9459_s27 = sld [smem:[%s10697_s0 + %s9310_s22]]   ;;  %s9314_s22 = smov 24  }
  0x21   :  { %s9464_s4 = sld [smem:[%s10697_s0 + %s9311_s28]]   ;;  %s9315_s28 = smov 25  }
  0x22   :  { %s9469_s20 = sld [smem:[%s10697_s0 + %s9312_s7]]   ;;  %s9316_s7 = smov 26  }
  0x24   :  { %10764 = sst [smem:[#allocation15_spill]] %s9449_s12 }
  0x25   :  { %10765 = sst [smem:[#allocation16_spill]] %s9454_s6 }
  0x26   :  { %10766 = sst [smem:[#allocation17_spill]] %s9459_s27 }
  0x27   :  { %10767 = sst [smem:[#allocation18_spill]] %s9464_s4 }
  0x28   :  { %10768 = sst [smem:[#allocation19_spill]] %s9469_s20 }
  0x29   :  { %s9474_s6 = sld [smem:[%s10697_s0 + %s9313_s15]]   ;;  %s9317_s15 = smov 27  }
  0x2a   :  { %s9479_s27 = sld [smem:[%s10697_s0 + %s9314_s22]]   ;;  %s9318_s22 = smov 28  }
  0x2b   :  { %s9484_s4 = sld [smem:[%s10697_s0 + %s9315_s28]]   ;;  %s9319_s28 = smov 29  }
  0x2c   :  { %s9489_s20 = sld [smem:[%s10697_s0 + %s9316_s7]]   ;;  %s9320_s7 = smov 30  }
  0x2f   :  { %10769 = sst [smem:[#allocation20_spill]] %s9474_s6 }
  0x30   :  { %10770 = sst [smem:[#allocation21_spill]] %s9479_s27 }
  0x31   :  { %10771 = sst [smem:[#allocation22_spill]] %s9484_s4 }
  0x32   :  { %10772 = sst [smem:[#allocation23_spill]] %s9489_s20 }
  0x33   :  { %s9494_s6 = sld [smem:[%s10697_s0 + %s9317_s15]]   ;;  %s9321_s15 = smov 31  }
  0x34   :  { %s9499_s27 = sld [smem:[%s10697_s0 + %s9318_s22]]   ;;  %s9322_s22 = smov 32  }
  0x35   :  { %s9504_s4 = sld [smem:[%s10697_s0 + %s9319_s28]]   ;;  %s9323_s28 = smov 33  }
  0x36   :  { %s9509_s20 = sld [smem:[%s10697_s0 + %s9320_s7]]   ;;  %s9324_s7 = smov 34  }
  0x39   :  { %10773 = sst [smem:[#allocation24_spill]] %s9494_s6 }
  0x3a   :  { %10774 = sst [smem:[#allocation25_spill]] %s9499_s27 }
  0x3b   :  { %10775 = sst [smem:[#allocation26_spill]] %s9504_s4 }
  0x3c   :  { %10776 = sst [smem:[#allocation27_spill]] %s9509_s20 }
  0x3d   :  { %s9514_s6 = sld [smem:[%s10697_s0 + %s9321_s15]]   ;;  %s9325_s15 = smov 35  }
  0x3e   :  { %s9519_s27 = sld [smem:[%s10697_s0 + %s9322_s22]]   ;;  %s9326_s22 = smov 36  }
  0x3f   :  { %s9524_s4 = sld [smem:[%s10697_s0 + %s9323_s28]]   ;;  %s9327_s28 = smov 37  }
  0x40   :  { %s9529_s20 = sld [smem:[%s10697_s0 + %s9324_s7]]   ;;  %s9328_s7 = smov 38  }
  0x43   :  { %10777 = sst [smem:[#allocation28_spill]] %s9514_s6 }
  0x44   :  { %10778 = sst [smem:[#allocation29_spill]] %s9519_s27 }
  0x45   :  { %10779 = sst [smem:[#allocation30_spill]] %s9524_s4 }
  0x46   :  { %10780 = sst [smem:[#allocation31_spill]] %s9529_s20 }
  0x47   :  { %s9534_s6 = sld [smem:[%s10697_s0 + %s9325_s15]]   ;;  %s9329_s15 = smov 39  }
  0x48   :  { %s9539_s27 = sld [smem:[%s10697_s0 + %s9326_s22]]   ;;  %s9330_s22 = smov 40  }
  0x49   :  { %s9544_s4 = sld [smem:[%s10697_s0 + %s9327_s28]]  }
  0x4a   :  { %s9549_s20 = sld [smem:[%s10697_s0 + %s9328_s7]]  }
  0x4d   :  { %10781 = sst [smem:[#allocation32_spill]] %s9534_s6 }
  0x4e   :  { %10782 = sst [smem:[#allocation33_spill]] %s9539_s27 }
  0x4f   :  { %10783 = sst [smem:[#allocation34_spill]] %s9544_s4 }
  0x50   :  { %s9554_s6 = sld [smem:[%s10697_s0 + %s9329_s15]]  }
  0x51   :  { %s9559_s27 = sld [smem:[%s10697_s0 + %s9330_s22]]  }
  0x56   :  { %10784 = sst [smem:[#allocation35_spill]] %s9554_s6 }
  0x57   :  { %86 = vsyncpa [#allocation3], 0 }
  0x58   :  { %88 = vsyncpa [#allocation3 + $0x1], 0  ;;  %s9561_s28 = smov 0   ;;  %s9563_s1 = smov 0  }
  0x59   :  { %s9565_s2 = smov 0   ;;  %s9567_s7 = smov 0  }
  0x5a LB: > { %s10785_s12 = sld [smem:[#allocation15_spill]]  ;;  %s10786_s3 = sld [smem:[#allocation8_spill]]  ;;  %s9281_s1 = sphi %s9563_s1, %s10825_s1   ;;  %s9277_s28 = sphi %s9561_s28, %s10824_s28   ;;  %s9289_s7 = sphi %s9567_s7, %s10827_s7   ;;  %s9285_s2 = sphi %s9565_s2, %s10826_s2  }
  0x5b   : > { %s9582_s0 = sadd.s32 4294967295, %s9289_s7   ;;  %s6853_s10 = sadd.s32 4294967294, %s9289_s7  }
  0x5c   : > { %s9586_s11 = sadd.s32 1, %s9289_s7   ;;  %s946_s15 = sadd.s32 1, %s9285_s2 }
  0x5d   : > { %s943_s16 = ssub.s32 %s9289_s7, %s9586_s11  ;;  %p956_p0 = scmp.ne.s32.totalorder %s9285_s2, %s9281_s1 }
  0x5e   : > { %p944_p1 = scmp.eq.s32.totalorder %s943_s16, 0  ;;  %p957_p2 = scmp.eq.s32.totalorder %s9582_s0, 1 }
  0x5f   : > { %p962_p3 = scmp.ne.s32.totalorder %s9281_s1, %s9277_s28  ;;  %p963_p4 = scmp.eq.s32.totalorder %s6853_s10, 1 }
  0x60   : > { %s9597_s18 = scalar_select %p944_p1, %s9285_s2, %s946_s15  }
  0x61   : > { %p9599_p5 = por %p957_p2, %p956_p0  ;;  %p9603_p6 = por %p963_p4, %p962_p3 }
  0x62   : > { %p6856_p7 = scmp.ge.s32.totalorder %s9289_s7, 1  ;;  %p1106_p8 = scmp.lt.s32.totalorder %s9289_s7, 3 }
  0x64   : > { %p1107_p9 = pnand %p6856_p7, %p1106_p8 }
  0x65   : > { %s10789_s13 = sld [smem:[#allocation7_spill]] (!%p1107_p9)  ;;  %p1203_p10 = scmp.lt.s32.totalorder (!%p1107_p9), %s9582_s0, 1  ;;  %v9331_v0 = vmov (!%p1107_p9), 0.0   ;;  %v9332_v1 = vmov (!%p1107_p9), 0   ;;  %v1314_v3 = vld [vmem:[%s9374_s17 + $0x8] sm:$0xff] (!%p1107_p9)  ;;  %v1313_v6 = vld [vmem:[%s9374_s17] sm:$0xff] (!%p1107_p9) }
  0x66   : > { %1110 = sbr.rel (%p1107_p9) target bundleno = 6694 (0x1a26), region = 180  ;;  %1304 = vmatprep.mubr.f32.mxu0 (!%p1107_p9), %v9331_v0  ;;  %8755 = vset.pattern.permute.xlu0 (!%p1107_p9), %v9332_v1  ;;  %s10790_s5 = sld [smem:[#allocation5_spill]] (!%p1107_p9)  ;;  %v1318_v4 = vld [vmem:[%s9374_s17 + $0x28] sm:$0xff] (!%p1107_p9)  ;;  %v1317_v7 = vld [vmem:[%s9374_s17 + $0x20] sm:$0xff] (!%p1107_p9)  ;;  %v1316_v41 = vld [vmem:[%s9374_s17 + $0x18] sm:$0xff] (!%p1107_p9)  ;;  %vm1233_vm0 = vcmask (!%p1107_p9), 1040384  }
  0x67   : > { %v7890_v5 = vpack.c.bf16 (!%p1107_p9), %v1318_v4, %v1314_v3  ;;  %8806 = vset.pattern.permute.xlu1 (!%p1107_p9), %v9332_v1  ;;  %v7892_v8 = vpack.c.bf16 (!%p1107_p9), %v1317_v7, %v1313_v6  ;;  %v1322_v9 = vld [vmem:[%s9374_s17 + $0x48] sm:$0xff] (!%p1107_p9)  ;;  %v1321_v12 = vld [vmem:[%s9374_s17 + $0x40] sm:$0xff] (!%p1107_p9)  ;;  %v1320_v45 = vld [vmem:[%s9374_s17 + $0x38] sm:$0xff] (!%p1107_p9)  ;;  %s10791_s9 = sld [smem:[#allocation6_spill]] (!%p1107_p9)  ;;  %vm1229_vm1 = vcmask (!%p1107_p9), 400384   ;;  %s10723_s16 = smov (!%p1107_p9), 126  }
  0x68   : > { %v1326_v10 = vld [vmem:[%s9374_s17 + $0x68] sm:$0xff] (!%p1107_p9)  ;;  %v1325_v13 = vld [vmem:[%s9374_s17 + $0x60] sm:$0xff] (!%p1107_p9)  ;;  %v1315_v46 = vld [vmem:[%s9374_s17 + $0x10] sm:$0xff] (!%p1107_p9)  ;;  %v7954_v60 = vpack.c.bf16 (!%p1107_p9), %v1320_v45, %v1316_v41  ;;  %vm1591_vm2 = vcmask (!%p1107_p9), 1039360   ;;  %vm1606_vm3 = vcmask (!%p1107_p9), 1031168   ;;  %vm1621_vm4 = vcmask (!%p1107_p9), 900096  }
  0x69   : > { %7891 = vmatprep.subr.bf16.mxu1 (!%p1107_p9), %v7890_v5  ;;  %v7894_v11 = vpack.c.bf16 (!%p1107_p9), %v1326_v10, %v1322_v9  ;;  %v7896_v14 = vpack.c.bf16 (!%p1107_p9), %v1325_v13, %v1321_v12  ;;  %v1330_v18 = vld [vmem:[%s9374_s17 + $0x88] sm:$0xff] (!%p1107_p9)  ;;  %v1329_v35 = vld [vmem:[%s9374_s17 + $0x80] sm:$0xff] (!%p1107_p9)  ;;  %v1319_v50 = vld [vmem:[%s9374_s17 + $0x30] sm:$0xff] (!%p1107_p9)  ;;  %vm1636_vm5 = vcmask (!%p1107_p9), 891904   ;;  %vm1651_vm6 = vcmask (!%p1107_p9), 883712   ;;  %s10794_s8 = sld [smem:[#allocation9_spill]] (!%p1107_p9) }
  0x6a   : > { %7893 = vmatpush1.bf16.msra.mxu1 (!%p1107_p9), %v7892_v8  ;;  %v1334_v30 = vld [vmem:[%s9374_s17 + $0xa8] sm:$0xff] (!%p1107_p9)  ;;  %v1333_v36 = vld [vmem:[%s9374_s17 + $0xa0] sm:$0xff] (!%p1107_p9)  ;;  %v1324_v52 = vld [vmem:[%s9374_s17 + $0x58] sm:$0xff] (!%p1107_p9)  ;;  %v7956_v62 = vpack.c.bf16 (!%p1107_p9), %v1319_v50, %v1315_v46  ;;  %vm1666_vm7 = vcmask (!%p1107_p9), 752640   ;;  %vm1681_vm8 = vcmask (!%p1107_p9), 744448   ;;  %vm1696_vm9 = vcmask (!%p1107_p9), 736256  }
  0x6b   : > { %v1223_v2 = vld [vmem:[%s10789_s13] sm:$0xff] (!%p1107_p9)  ;;  %7895 = vmatprep.subr.bf16.mxu1 (!%p1107_p9), %v7894_v11  ;;  %v7898_v34 = vpack.c.bf16 (!%p1107_p9), %v1334_v30, %v1330_v18  ;;  %v7900_v37 = vpack.c.bf16 (!%p1107_p9), %v1333_v36, %v1329_v35  ;;  %v1338_v38 = vld [vmem:[%s9374_s17 + $0xc8] sm:$0xff] (!%p1107_p9)  ;;  %v1328_v56 = vld [vmem:[%s9374_s17 + $0x78] sm:$0xff] (!%p1107_p9)  ;;  %vm1791_vm10 = vcmask (!%p1107_p9), 1043456   ;;  %vm1787_vm11 = vcmask (!%p1107_p9), 556032   ;;  %s10822_s4 = sld [smem:[#allocation34_spill]] (!%p1107_p9) }
  0x6c   : > { %1226 = vperm.xlu0 (!%p1107_p9), %8755, %v1223_v2   ;;  %v1342_v39 = vld [vmem:[%s9374_s17 + $0xe8] sm:$0xff] (!%p1107_p9)  ;;  %v1337_v43 = vld [vmem:[%s9374_s17 + $0xc0] sm:$0xff] (!%p1107_p9)  ;;  %v1323_v63 = vld [vmem:[%s9374_s17 + $0x50] sm:$0xff] (!%p1107_p9)  ;;  %v7958_v3 = vpack.c.bf16 (!%p1107_p9), %v1328_v56, %v1324_v52  ;;  %vm9343_vm12 = vmmov (!%p1107_p9), 0   ;;  %vm1988_vm13 = vcmask (!%p1107_p9), 195584   ;;  %vm2225_vm14 = vcmask (!%p1107_p9), 818176  }
  0x6d   : > { %s1204_s26 = scalar_select %p1203_p10, %s9582_s0, 1  ;;  %v7902_v42 = vpack.c.bf16 %v1342_v39, %v1338_v38  ;;  %v1341_v44 = vld [vmem:[%s9374_s17 + $0xe0] sm:$0xff]  ;;  %v1346_v48 = vld [vmem:[%s9374_s17 + $0x108] sm:$0xff]  ;;  %v1327_v1 = vld [vmem:[%s9374_s17 + $0x70] sm:$0xff]  ;;  %vm3388_vm15 = vcmask 64512  }
  0x6e   : > { %7897 = vmatpush1.bf16.msra.mxu1 %v7896_v14  ;;  %v7904_v47 = vpack.c.bf16 %v1341_v44, %v1337_v43  ;;  %v1350_v51 = vld [vmem:[%s9374_s17 + $0x128] sm:$0xff]  ;;  %v1345_v54 = vld [vmem:[%s9374_s17 + $0x100] sm:$0xff]  ;;  %v1332_v4 = vld [vmem:[%s9374_s17 + $0x98] sm:$0xff]  ;;  %v7960_v11 = vpack.c.bf16 %v1327_v1, %v1323_v63  ;;  %s10823_s6 = sld [smem:[#allocation35_spill]] }
  0x6f   : > { %s8656_s10 = smul.u32 112, %s1204_s26  ;;  %7899 = vmatprep.subr.bf16.mxu1 %v7898_v34  ;;  %v7906_v53 = vpack.c.bf16 %v1350_v51, %v1346_v48  ;;  %v1349_v55 = vld [vmem:[%s9374_s17 + $0x120] sm:$0xff]  ;;  %v1354_v57 = vld [vmem:[%s9374_s17 + $0x148] sm:$0xff]  ;;  %v1336_v8 = vld [vmem:[%s9374_s17 + $0xb8] sm:$0xff]  ;;  %s10721_s26 = smov 127  }
  0x70   : > { %v1358_v58 = vld [vmem:[%s9374_s17 + $0x168] sm:$0xff]  ;;  %v1222_v61 = vld [vmem:[%s10791_s9] sm:$0xff]  ;;  %v7908_v2 = vpack.c.bf16 %v1349_v55, %v1345_v54  ;;  %v1331_v12 = vld [vmem:[%s9374_s17 + $0x90] sm:$0xff]  ;;  %s10804_s9 = sld [smem:[#allocation18_spill]] }
  0x71   : > { %s9622_s15 = scalar_lea.vmem %s10790_s5, %s8656_s10  ;;  %v7910_v5 = vpack.c.bf16 %v1358_v58, %v1354_v57  ;;  %v1353_v6 = vld [vmem:[%s9374_s17 + $0x140] sm:$0xff]  ;;  %v1362_v9 = vld [vmem:[%s9374_s17 + $0x188] sm:$0xff]  ;;  %v1335_v13 = vld [vmem:[%s9374_s17 + $0xb0] sm:$0xff]  ;;  %s9335_s10 = smov 110  }
  0x72   : > { %v1209_v15 = vld [vmem:[%s9622_s15 + $0x8] sm:$0xff]  ;;  %v1211_v16 = vld [vmem:[%s9622_s15 + $0x18] sm:$0xff]  ;;  %v1208_v17 = vld [vmem:[%s9622_s15] sm:$0xff]  ;;  %7901 = vmatpush1.bf16.msra.mxu1 %v7900_v37  ;;  %s9344_s5 = smov 117  }
  0x73   : > { %v7878_v19 = vpack.c.bf16 %v1211_v16, %v1209_v15  ;;  %v1210_v20 = vld [vmem:[%s9622_s15 + $0x10] sm:$0xff]  ;;  %v1213_v21 = vld [vmem:[%s9622_s15 + $0x28] sm:$0xff]  ;;  %v1215_v22 = vld [vmem:[%s9622_s15 + $0x38] sm:$0xff]  ;;  %7903 = vmatprep.subr.bf16.mxu1 %v7902_v42  ;;  %v7962_v15 = vpack.c.bf16 %v1336_v8, %v1332_v4 }
  0x74   : > { %v7880_v23 = vpack.c.bf16 %v1210_v20, %v1208_v17  ;;  %v7882_v24 = vpack.c.bf16 %v1215_v22, %v1213_v21  ;;  %v1212_v25 = vld [vmem:[%s9622_s15 + $0x20] sm:$0xff]  ;;  %v1214_v26 = vld [vmem:[%s9622_s15 + $0x30] sm:$0xff]  ;;  %v1217_v27 = vld [vmem:[%s9622_s15 + $0x48] sm:$0xff] }
  0x75   : > { %7879 = vmatprep.subr.bf16.mxu0 %v7878_v19  ;;  %v1219_v28 = vld [vmem:[%s9622_s15 + $0x58] sm:$0xff]  ;;  %v7884_v29 = vpack.c.bf16 %v1214_v26, %v1212_v25  ;;  %v1216_v32 = vld [vmem:[%s9622_s15 + $0x40] sm:$0xff]  ;;  %v1218_v33 = vld [vmem:[%s9622_s15 + $0x50] sm:$0xff] }
  0x76   : > { %7881 = vmatpush1.bf16.msra.mxu0 %v7880_v23  ;;  %v7886_v31 = vpack.c.bf16 %v1219_v28, %v1217_v27  ;;  %v7888_v40 = vpack.c.bf16 %v1218_v33, %v1216_v32  ;;  %v1221_v49 = vld [vmem:[%s9622_s15 + $0x68] sm:$0x1]  ;;  %v1220_v59 = vld [vmem:[%s9622_s15 + $0x60] sm:$0x1]  ;;  %7905 = vmatpush1.bf16.msra.mxu1 %v7904_v47  ;;  %v1340_v16 = vld [vmem:[%s9374_s17 + $0xd8] sm:$0xff]  ;;  %v7964_v23 = vpack.c.bf16 %v1335_v13, %v1331_v12  ;;  %s9336_s15 = smov 109  }
  0x77   : > { %7883 = vmatprep.subr.bf16.mxu0 %v7882_v24  ;;  %7907 = vmatprep.subr.bf16.mxu1 %v7906_v53  ;;  %v1357_v7 = vld [vmem:[%s9374_s17 + $0x160] sm:$0xff]  ;;  %v1366_v10 = vld [vmem:[%s9374_s17 + $0x1a8] sm:$0xff]  ;;  %v1344_v20 = vld [vmem:[%s9374_s17 + $0xf8] sm:$0xff] }
  0x78   : > { %v7912_v14 = vpack.c.bf16 %v1357_v7, %v1353_v6  ;;  %v7914_v17 = vpack.c.bf16 %v1366_v10, %v1362_v9  ;;  %v1361_v18 = vld [vmem:[%s9374_s17 + $0x180] sm:$0xff]  ;;  %v1370_v21 = vld [vmem:[%s9374_s17 + $0x1c8] sm:$0xff]  ;;  %v1339_v24 = vld [vmem:[%s9374_s17 + $0xd0] sm:$0xff]  ;;  %v7966_v27 = vpack.c.bf16 %v1344_v20, %v1340_v16 }
  0x79   : > { %v1365_v19 = vld [vmem:[%s9374_s17 + $0x1a0] sm:$0xff]  ;;  %v1374_v22 = vld [vmem:[%s9374_s17 + $0x1e8] sm:$0xff]  ;;  %v1343_v25 = vld [vmem:[%s9374_s17 + $0xf0] sm:$0xff] }
  0x7a   : > { %7885 = vmatpush1.bf16.msra.mxu0 %v7884_v29  ;;  %7909 = vmatpush1.bf16.msra.mxu1 %v7908_v2  ;;  %v7916_v26 = vpack.c.bf16 %v1365_v19, %v1361_v18  ;;  %v1348_v28 = vld [vmem:[%s9374_s17 + $0x118] sm:$0xff]  ;;  %v7918_v29 = vpack.c.bf16 %v1374_v22, %v1370_v21  ;;  %v1369_v30 = vld [vmem:[%s9374_s17 + $0x1c0] sm:$0xff]  ;;  %v1378_v33 = vld [vmem:[%s9374_s17 + $0x208] sm:$0xff]  ;;  %v7968_v35 = vpack.c.bf16 %v1343_v25, %v1339_v24 }
  0x7b   : > { %7887 = vmatprep.subr.bf16.mxu0 %v7886_v31  ;;  %7911 = vmatprep.subr.bf16.mxu1 %v7910_v5  ;;  %v1373_v31 = vld [vmem:[%s9374_s17 + $0x1e0] sm:$0xff]  ;;  %v1352_v32 = vld [vmem:[%s9374_s17 + $0x138] sm:$0xff]  ;;  %v1382_v34 = vld [vmem:[%s9374_s17 + $0x228] sm:$0xff] }
  0x7c   : > { %v1347_v36 = vld [vmem:[%s9374_s17 + $0x110] sm:$0xff]  ;;  %v7920_v38 = vpack.c.bf16 %v1373_v31, %v1369_v30  ;;  %v7970_v39 = vpack.c.bf16 %v1352_v32, %v1348_v28  ;;  %v7922_v41 = vpack.c.bf16 %v1382_v34, %v1378_v33  ;;  %v1377_v42 = vld [vmem:[%s9374_s17 + $0x200] sm:$0xff]  ;;  %v1360_v44 = vld [vmem:[%s9374_s17 + $0x178] sm:$0xff] }
  0x7d   : > { %v1351_v37 = vld [vmem:[%s9374_s17 + $0x130] sm:$0xff]  ;;  %v1381_v43 = vld [vmem:[%s9374_s17 + $0x220] sm:$0xff]  ;;  %v1386_v45 = vld [vmem:[%s9374_s17 + $0x248] sm:$0xff] }
  0x7e   : > { %7889 = vmatpush1.bf16.msra.mxu0 %v7888_v40  ;;  %7913 = vmatpush1.bf16.msra.mxu1 %v7912_v14  ;;  %v1356_v40 = vld [vmem:[%s9374_s17 + $0x158] sm:$0xff]  ;;  %v1390_v46 = vld [vmem:[%s9374_s17 + $0x268] sm:$0xff]  ;;  %v7972_v47 = vpack.c.bf16 %v1351_v37, %v1347_v36  ;;  %v1355_v48 = vld [vmem:[%s9374_s17 + $0x150] sm:$0xff]  ;;  %v7924_v50 = vpack.c.bf16 %v1381_v43, %v1377_v42 }
  0x7f   : > { %6858 = vmatprep.subr.msk.mxu0 %vm1233_vm0, %v1221_v49  ;;  %7915 = vmatprep.subr.bf16.mxu1 %v7914_v17  ;;  %v1359_v49 = vld [vmem:[%s9374_s17 + $0x170] sm:$0xff]  ;;  %v7974_v51 = vpack.c.bf16 %v1360_v44, %v1356_v40  ;;  %v1364_v52 = vld [vmem:[%s9374_s17 + $0x198] sm:$0xff]  ;;  %v7926_v53 = vpack.c.bf16 %v1390_v46, %v1386_v45  ;;  %v1385_v54 = vld [vmem:[%s9374_s17 + $0x240] sm:$0xff] }
  0x80   : > { %v1389_v55 = vld [vmem:[%s9374_s17 + $0x260] sm:$0xff]  ;;  %v1368_v56 = vld [vmem:[%s9374_s17 + $0x1b8] sm:$0xff]  ;;  %v1394_v57 = vld [vmem:[%s9374_s17 + $0x288] sm:$0xff] }
  0x81   : > { %v1398_v58 = vld [vmem:[%s9374_s17 + $0x2a8] sm:$0xff]  ;;  %v7978_v63 = vpack.c.bf16 %v1368_v56, %v1364_v52  ;;  %v1372_v1 = vld [vmem:[%s9374_s17 + $0x1d8] sm:$0xff]  ;;  %v1397_v4 = vld [vmem:[%s9374_s17 + $0x2a0] sm:$0xff] }
  0x82   : > { %6859 = vmatpush1.msk.msra.mxu0 %vm1233_vm0, %v1220_v59  ;;  %7917 = vmatpush1.bf16.msra.mxu1 %v7916_v26  ;;  %v7976_v59 = vpack.c.bf16 %v1359_v49, %v1355_v48  ;;  %v7930_v2 = vpack.c.bf16 %v1398_v58, %v1394_v57  ;;  %v1376_v5 = vld [vmem:[%s9374_s17 + $0x1f8] sm:$0xff]  ;;  %v1402_v6 = vld [vmem:[%s9374_s17 + $0x2c8] sm:$0xff]  ;;  %v1371_v9 = vld [vmem:[%s9374_s17 + $0x1d0] sm:$0xff]  ;;  %vm3112_vm0 = vcmask 392192  }
  0x83   : > { %6860 = vmatmul.mubr.msk.f32.vlgmr.msra.gmra.mrb[0].mxu0 %vm1229_vm1, %v1222_v61  ;;  %7955 = vmatprep.subr.bf16.mxu0 %v7954_v60  ;;  %v1363_v60 = vld [vmem:[%s9374_s17 + $0x190] sm:$0xff]  ;;  %v1406_v7 = vld [vmem:[%s9374_s17 + $0x2e8] sm:$0xff]  ;;  %v7982_v12 = vpack.c.bf16 %v1376_v5, %v1372_v1  ;;  %v1380_v13 = vld [vmem:[%s9374_s17 + $0x218] sm:$0xff]  ;;  %vm3573_vm1 = vcmask 293888  }
  0x84   : > { %7957 = vmatpush1.bf16.msra.mxu0 %v7956_v62  ;;  %7919 = vmatprep.subr.bf16.mxu1 %v7918_v29  ;;  %v1367_v61 = vld [vmem:[%s9374_s17 + $0x1b0] sm:$0xff]  ;;  %v7928_v62 = vpack.c.bf16 %v1389_v55, %v1385_v54  ;;  %v7934_v14 = vpack.c.bf16 %v1406_v7, %v1402_v6  ;;  %v1405_v16 = vld [vmem:[%s9374_s17 + $0x2e0] sm:$0xff]  ;;  %v1384_v17 = vld [vmem:[%s9374_s17 + $0x238] sm:$0xff] }
  0x85   : > { %7959 = vmatprep.subr.bf16.mxu0 %v7958_v3  ;;  %v1393_v3 = vld [vmem:[%s9374_s17 + $0x280] sm:$0xff]  ;;  %v7980_v8 = vpack.c.bf16 %v1367_v61, %v1363_v60  ;;  %v1375_v10 = vld [vmem:[%s9374_s17 + $0x1f0] sm:$0xff]  ;;  %v1410_v18 = vld [vmem:[%s9374_s17 + $0x308] sm:$0xff]  ;;  %v7986_v24 = vpack.c.bf16 %v1384_v17, %v1380_v13 }
  0x86   : > { %7921 = vmatpush1.bf16.msra.mxu1 %v7920_v38  ;;  %v1414_v19 = vld [vmem:[%s9374_s17 + $0x328] sm:$0xff]  ;;  %v7984_v20 = vpack.c.bf16 %v1375_v10, %v1371_v9  ;;  %v1379_v21 = vld [vmem:[%s9374_s17 + $0x210] sm:$0xff]  ;;  %v1388_v25 = vld [vmem:[%s9374_s17 + $0x258] sm:$0xff] }
  0x87   : > { %7923 = vmatprep.subr.bf16.mxu1 %v7922_v41  ;;  %v1383_v22 = vld [vmem:[%s9374_s17 + $0x230] sm:$0xff]  ;;  %v7938_v26 = vpack.c.bf16 %v1414_v19, %v1410_v18  ;;  %v1413_v28 = vld [vmem:[%s9374_s17 + $0x320] sm:$0xff]  ;;  %v1392_v29 = vld [vmem:[%s9374_s17 + $0x278] sm:$0xff] }
  0x88   : > { %7961 = vmatpush1.bf16.msra.mxu0 %v7960_v11  ;;  %v7932_v11 = vpack.c.bf16 %v1397_v4, %v1393_v3  ;;  %v1418_v30 = vld [vmem:[%s9374_s17 + $0x348] sm:$0xff]  ;;  %v7988_v32 = vpack.c.bf16 %v1383_v22, %v1379_v21  ;;  %v1387_v33 = vld [vmem:[%s9374_s17 + $0x250] sm:$0xff]  ;;  %v7990_v36 = vpack.c.bf16 %v1392_v29, %v1388_v25  ;;  %v1396_v37 = vld [vmem:[%s9374_s17 + $0x298] sm:$0xff] }
  0x89   : > { %7963 = vmatprep.subr.bf16.mxu0 %v7962_v15  ;;  %v1401_v15 = vld [vmem:[%s9374_s17 + $0x2c0] sm:$0xff]  ;;  %v1422_v31 = vld [vmem:[%s9374_s17 + $0x368] sm:$0xff]  ;;  %v1391_v34 = vld [vmem:[%s9374_s17 + $0x270] sm:$0xff] }
  0x8a   : > { %7925 = vmatpush1.bf16.msra.mxu1 %v7924_v50  ;;  %v7942_v38 = vpack.c.bf16 %v1422_v31, %v1418_v30  ;;  %v1421_v40 = vld [vmem:[%s9374_s17 + $0x360] sm:$0xff]  ;;  %v1400_v41 = vld [vmem:[%s9374_s17 + $0x2b8] sm:$0xff]  ;;  %v1426_v42 = vld [vmem:[%s9374_s17 + $0x388] sm:$0xff]  ;;  %v7992_v44 = vpack.c.bf16 %v1391_v34, %v1387_v33 }
  0x8b   : > { %7927 = vmatprep.subr.bf16.mxu1 %v7926_v53  ;;  %v1430_v43 = vld [vmem:[%s9374_s17 + $0x3a8] sm:$0xff]  ;;  %v1395_v45 = vld [vmem:[%s9374_s17 + $0x290] sm:$0xff]  ;;  %v1425_v50 = vld [vmem:[%s9374_s17 + $0x380] sm:$0xff] }
  0x8c   : > { %7965 = vmatpush1.bf16.msra.mxu0 %v7964_v23  ;;  %v7936_v23 = vpack.c.bf16 %v1405_v16, %v1401_v15  ;;  %v1399_v48 = vld [vmem:[%s9374_s17 + $0x2b0] sm:$0xff]  ;;  %v7946_v49 = vpack.c.bf16 %v1430_v43, %v1426_v42  ;;  %v1404_v52 = vld [vmem:[%s9374_s17 + $0x2d8] sm:$0xff]  ;;  %v1434_v15 = vld [vmem:[%s9374_s17 + $0x3c8] sm:$0xff] }
  0x8d   : > { %7967 = vmatprep.subr.bf16.mxu0 %v7966_v27  ;;  %v1409_v27 = vld [vmem:[%s9374_s17 + $0x300] sm:$0xff]  ;;  %v1408_v53 = vld [vmem:[%s9374_s17 + $0x2f8] sm:$0xff]  ;;  %v7996_v54 = vpack.c.bf16 %v1399_v48, %v1395_v45  ;;  %v1403_v57 = vld [vmem:[%s9374_s17 + $0x2d0] sm:$0xff] }
  0x8e   : > { %7929 = vmatpush1.bf16.msra.mxu1 %v7928_v62  ;;  %v7998_v56 = vpack.c.bf16 %v1408_v53, %v1404_v52  ;;  %v1407_v58 = vld [vmem:[%s9374_s17 + $0x2f0] sm:$0xff]  ;;  %v1416_v60 = vld [vmem:[%s9374_s17 + $0x338] sm:$0xff]  ;;  %v1438_v16 = vld [vmem:[%s9374_s17 + $0x3e8] sm:$0xff] }
  0x8f   : > { %7931 = vmatprep.subr.bf16.mxu1 %v7930_v2  ;;  %v8000_v61 = vpack.c.bf16 %v1407_v58, %v1403_v57  ;;  %v1415_v1 = vld [vmem:[%s9374_s17 + $0x330] sm:$0xff]  ;;  %v1420_v2 = vld [vmem:[%s9374_s17 + $0x358] sm:$0xff]  ;;  %v7950_v18 = vpack.c.bf16 %v1438_v16, %v1434_v15  ;;  %v1437_v21 = vld [vmem:[%s9374_s17 + $0x3e0] sm:$0xff] }
  0x90   : > { %7969 = vmatpush1.bf16.msra.mxu0 %v7968_v35  ;;  %v7940_v35 = vpack.c.bf16 %v1413_v28, %v1409_v27  ;;  %v1424_v3 = vld [vmem:[%s9374_s17 + $0x378] sm:$0xff]  ;;  %v1419_v6 = vld [vmem:[%s9374_s17 + $0x350] sm:$0xff]  ;;  %v1706_v34 = vld [vmem:[%s9379_s21 + $0x8] sm:$0xff] }
  0x91   : > { %7971 = vmatprep.subr.bf16.mxu0 %v7970_v39  ;;  %v1417_v39 = vld [vmem:[%s9374_s17 + $0x340] sm:$0xff]  ;;  %v8006_v5 = vpack.c.bf16 %v1424_v3, %v1420_v2  ;;  %v1423_v7 = vld [vmem:[%s9374_s17 + $0x370] sm:$0xff]  ;;  %v1432_v9 = vld [vmem:[%s9374_s17 + $0x3b8] sm:$0xff] }
  0x92   : > { %7933 = vmatpush1.bf16.msra.mxu1 %v7932_v11  ;;  %v7944_v46 = vpack.c.bf16 %v1421_v40, %v1417_v39  ;;  %v8008_v10 = vpack.c.bf16 %v1423_v7, %v1419_v6  ;;  %v1431_v13 = vld [vmem:[%s9374_s17 + $0x3b0] sm:$0xff]  ;;  %v1436_v17 = vld [vmem:[%s9374_s17 + $0x3d8] sm:$0xff]  ;;  %v1710_v39 = vld [vmem:[%s9379_s21 + $0x28] sm:$0xff] }
  0x93   : > { %7935 = vmatprep.subr.bf16.mxu1 %v7934_v14  ;;  %v1440_v19 = vld [vmem:[%s9374_s17 + $0x3f8] sm:$0xff]  ;;  %v1439_v25 = vld [vmem:[%s9374_s17 + $0x3f0] sm:$0xff]  ;;  %v1709_v43 = vld [vmem:[%s9379_s21 + $0x20] sm:$0xff] }
  0x94   : > { %7973 = vmatpush1.bf16.msra.mxu0 %v7972_v47  ;;  %v7994_v47 = vpack.c.bf16 %v1400_v41, %v1396_v37  ;;  %v8014_v22 = vpack.c.bf16 %v1440_v19, %v1436_v17  ;;  %v1712_v40 = vld [vmem:[%s9379_s21 + $0x38] sm:$0xff]  ;;  %v1714_v45 = vld [vmem:[%s9379_s21 + $0x48] sm:$0xff]  ;;  %v1733_v16 = vld [vmem:[%s9379_s21 + $0xe0] sm:$0xff] }
  0x95   : > { %7975 = vmatprep.subr.bf16.mxu0 %v7974_v51  ;;  %v1429_v51 = vld [vmem:[%s9374_s17 + $0x3a0] sm:$0xff]  ;;  %v8022_v42 = vpack.c.bf16 %v1712_v40, %v1710_v39  ;;  %v1720_v52 = vld [vmem:[%s9379_s21 + $0x78] sm:$0xff]  ;;  %v1722_v57 = vld [vmem:[%s9379_s21 + $0x88] sm:$0xff] }
  0x96   : > { %7937 = vmatpush1.bf16.msra.mxu1 %v7936_v23  ;;  %v7948_v55 = vpack.c.bf16 %v1429_v51, %v1425_v50  ;;  %v1715_v50 = vld [vmem:[%s9379_s21 + $0x50] sm:$0xff]  ;;  %v1718_v51 = vld [vmem:[%s9379_s21 + $0x68] sm:$0xff]  ;;  %v1724_v58 = vld [vmem:[%s9379_s21 + $0x98] sm:$0xff] }
  0x97   : > { %7939 = vmatprep.subr.bf16.mxu1 %v7938_v26  ;;  %v1730_v6 = vld [vmem:[%s9379_s21 + $0xc8] sm:$0xff]  ;;  %v1732_v7 = vld [vmem:[%s9379_s21 + $0xd8] sm:$0xff]  ;;  %v1735_v17 = vld [vmem:[%s9379_s21 + $0xf0] sm:$0xff] }
  0x98   : > { %7977 = vmatpush1.bf16.msra.mxu0 %v7976_v59  ;;  %v1412_v59 = vld [vmem:[%s9374_s17 + $0x318] sm:$0xff]  ;;  %v1738_v19 = vld [vmem:[%s9379_s21 + $0x108] sm:$0xff] }
  0x99   : > { %7979 = vmatprep.subr.bf16.mxu0 %v7978_v63  ;;  %v8002_v62 = vpack.c.bf16 %v1416_v60, %v1412_v59  ;;  %v1411_v63 = vld [vmem:[%s9374_s17 + $0x310] sm:$0xff]  ;;  %v8034_v60 = vpack.c.bf16 %v1724_v58, %v1722_v57  ;;  %v1757_v57 = vld [vmem:[%s9379_s21 + $0x1a0] sm:$0xff] }
  0x9a   : > { %7941 = vmatpush1.bf16.msra.mxu1 %v7940_v35  ;;  %v8004_v4 = vpack.c.bf16 %v1415_v1, %v1411_v63  ;;  %v1708_v35 = vld [vmem:[%s9379_s21 + $0x18] sm:$0xff]  ;;  %v1726_v63 = vld [vmem:[%s9379_s21 + $0xa8] sm:$0xff]  ;;  %v1759_v58 = vld [vmem:[%s9379_s21 + $0x1b0] sm:$0xff] }
  0x9b   : > { %7943 = vmatprep.subr.bf16.mxu1 %v7942_v38  ;;  %v8018_v37 = vpack.c.bf16 %v1708_v35, %v1706_v34  ;;  %v1707_v38 = vld [vmem:[%s9379_s21 + $0x10] sm:$0xff]  ;;  %v1728_v1 = vld [vmem:[%s9379_s21 + $0xb8] sm:$0xff]  ;;  %v1745_v34 = vld [vmem:[%s9379_s21 + $0x140] sm:$0xff] }
  0x9c   : > { %7981 = vmatpush1.bf16.msra.mxu0 %v7980_v8  ;;  %v1428_v8 = vld [vmem:[%s9374_s17 + $0x398] sm:$0xff]  ;;  %v8038_v3 = vpack.c.bf16 %v1728_v1, %v1726_v63  ;;  %v1747_v35 = vld [vmem:[%s9379_s21 + $0x150] sm:$0xff]  ;;  %v1761_v63 = vld [vmem:[%s9379_s21 + $0x1c0] sm:$0xff] }
  0x9d   : > { %7983 = vmatprep.subr.bf16.mxu0 %v7982_v12  ;;  %v8010_v11 = vpack.c.bf16 %v1432_v9, %v1428_v8  ;;  %v1427_v12 = vld [vmem:[%s9374_s17 + $0x390] sm:$0xff]  ;;  %v8042_v9 = vpack.c.bf16 %v1732_v7, %v1730_v6  ;;  %v1765_v6 = vld [vmem:[%s9379_s21 + $0x1e0] sm:$0xff] }
  0x9e   : > { %7945 = vmatpush1.bf16.msra.mxu1 %v7944_v46  ;;  %v8012_v14 = vpack.c.bf16 %v1431_v13, %v1427_v12  ;;  %v1716_v46 = vld [vmem:[%s9379_s21 + $0x58] sm:$0xff]  ;;  %v1734_v12 = vld [vmem:[%s9379_s21 + $0xe8] sm:$0xff]  ;;  %v1763_v1 = vld [vmem:[%s9379_s21 + $0x1d0] sm:$0xff] }
  0x9f   : > { %7947 = vmatprep.subr.bf16.mxu1 %v7946_v49  ;;  %v8026_v48 = vpack.c.bf16 %v1716_v46, %v1714_v45  ;;  %v1713_v49 = vld [vmem:[%s9379_s21 + $0x40] sm:$0xff]  ;;  %v1736_v13 = vld [vmem:[%s9379_s21 + $0xf8] sm:$0xff]  ;;  %v1767_v7 = vld [vmem:[%s9379_s21 + $0x1f0] sm:$0xff] }
  0xa0   : > { %7985 = vmatpush1.bf16.msra.mxu0 %v7984_v20  ;;  %v1433_v20 = vld [vmem:[%s9374_s17 + $0x3c0] sm:$0xff]  ;;  %v8028_v53 = vpack.c.bf16 %v1715_v50, %v1713_v49  ;;  %v8046_v15 = vpack.c.bf16 %v1736_v13, %v1734_v12  ;;  %v1756_v49 = vld [vmem:[%s9379_s21 + $0x198] sm:$0xff] }
  0xa1   : > { %7987 = vmatprep.subr.bf16.mxu0 %v7986_v24  ;;  %v7952_v23 = vpack.c.bf16 %v1437_v21, %v1433_v20  ;;  %v1435_v24 = vld [vmem:[%s9374_s17 + $0x3d0] sm:$0xff]  ;;  %v1740_v20 = vld [vmem:[%s9379_s21 + $0x118] sm:$0xff] }
  0xa2   : > { %7949 = vmatpush1.bf16.msra.mxu1 %v7948_v55  ;;  %v8016_v26 = vpack.c.bf16 %v1439_v25, %v1435_v24  ;;  %v1717_v55 = vld [vmem:[%s9379_s21 + $0x60] sm:$0xff]  ;;  %v8050_v21 = vpack.c.bf16 %v1740_v20, %v1738_v19  ;;  %v1742_v25 = vld [vmem:[%s9379_s21 + $0x128] sm:$0xff] }
  0xa3   : > { %7951 = vmatprep.subr.bf16.mxu1 %v7950_v18  ;;  %v8048_v18 = vpack.c.bf16 %v1735_v17, %v1733_v16 }
  0xa4   : > { %7989 = vmatpush1.bf16.msra.mxu0 %v7988_v32 }
  0xa5   : > { %7991 = vmatprep.subr.bf16.mxu0 %v7990_v36  ;;  %v1705_v36 = vld [vmem:[%s9379_s21] sm:$0xff] }
  0xa6   : > { %7953 = vmatpush1.bf16.msra.mxu1 %v7952_v23  ;;  %v8020_v41 = vpack.c.bf16 %v1707_v38, %v1705_v36  ;;  %v1739_v23 = vld [vmem:[%s9379_s21 + $0x110] sm:$0xff]  ;;  %v8060_v36 = vpack.c.bf16 %v1747_v35, %v1745_v34  ;;  %v1752_v38 = vld [vmem:[%s9379_s21 + $0x178] sm:$0xff] }
  0xa7   : > { %8019 = vmatprep.subr.bf16.mxu1 %v8018_v37  ;;  %v1750_v37 = vld [vmem:[%s9379_s21 + $0x168] sm:$0xff] }
  0xa8   : > { %7993 = vmatpush1.bf16.msra.mxu0 %v7992_v44  ;;  %v1711_v44 = vld [vmem:[%s9379_s21 + $0x30] sm:$0xff] }
  0xa9   : > { %7995 = vmatprep.subr.bf16.mxu0 %v7994_v47  ;;  %v8024_v47 = vpack.c.bf16 %v1711_v44, %v1709_v43  ;;  %v1751_v43 = vld [vmem:[%s9379_s21 + $0x170] sm:$0xff] }
  0xac   : > { %7997 = vmatpush1.bf16.msra.mxu0 %v7996_v54  ;;  %v8030_v54 = vpack.c.bf16 %v1720_v52, %v1718_v51  ;;  %v1753_v51 = vld [vmem:[%s9379_s21 + $0x180] sm:$0xff]  ;;  %v1755_v52 = vld [vmem:[%s9379_s21 + $0x190] sm:$0xff] }
  0xad   : > { %7999 = vmatprep.subr.bf16.mxu0 %v7998_v56  ;;  %v1719_v56 = vld [vmem:[%s9379_s21 + $0x70] sm:$0xff] }
  0xae   : > { %v8032_v59 = vpack.c.bf16 %v1719_v56, %v1717_v55  ;;  %v1760_v55 = vld [vmem:[%s9379_s21 + $0x1b8] sm:$0xff] }
  0xb0   : > { %8001 = vmatpush1.bf16.msra.mxu0 %v8000_v61  ;;  %v1721_v61 = vld [vmem:[%s9379_s21 + $0x80] sm:$0xff] }
  0xb1   : > { %8003 = vmatprep.subr.bf16.mxu0 %v8002_v62  ;;  %v1723_v62 = vld [vmem:[%s9379_s21 + $0x90] sm:$0xff] }
  0xb2   : > { %v8036_v2 = vpack.c.bf16 %v1723_v62, %v1721_v61  ;;  %v1764_v61 = vld [vmem:[%s9379_s21 + $0x1d8] sm:$0xff] }
  0xb4   : > { %8005 = vmatpush1.bf16.msra.mxu0 %v8004_v4  ;;  %v1725_v4 = vld [vmem:[%s9379_s21 + $0xa0] sm:$0xff] }
  0xb5   : > { %8007 = vmatprep.subr.bf16.mxu0 %v8006_v5  ;;  %v1727_v5 = vld [vmem:[%s9379_s21 + $0xb0] sm:$0xff] }
  0xb6   : > { %v8040_v8 = vpack.c.bf16 %v1727_v5, %v1725_v4  ;;  %v1768_v4 = vld [vmem:[%s9379_s21 + $0x1f8] sm:$0xff] }
  0xb8   : > { %8009 = vmatpush1.bf16.msra.mxu0 %v8008_v10  ;;  %v1729_v10 = vld [vmem:[%s9379_s21 + $0xc0] sm:$0xff] }
  0xb9   : > { %8011 = vmatprep.subr.bf16.mxu0 %v8010_v11  ;;  %v1731_v11 = vld [vmem:[%s9379_s21 + $0xd0] sm:$0xff] }
  0xbc   : > { %8013 = vmatpush1.bf16.msra.mxu0 %v8012_v14  ;;  %v8044_v14 = vpack.c.bf16 %v1731_v11, %v1729_v10  ;;  %v1772_v10 = vld [vmem:[%s9379_s21 + $0x218] sm:$0xff] }
  0xbd   : > { %8015 = vmatprep.subr.bf16.mxu0 %v8014_v22  ;;  %v1737_v22 = vld [vmem:[%s9379_s21 + $0x100] sm:$0xff] }
  0xbe   : > { %v8052_v24 = vpack.c.bf16 %v1739_v23, %v1737_v22 }
  0xc0   : > { %8017 = vmatpush1.bf16.msra.mxu0 %v8016_v26  ;;  %v1744_v26 = vld [vmem:[%s9379_s21 + $0x138] sm:$0xff] }
  0xeb   : > { %v1227_v27 = vpop.permute.xlu0 %1226 }
 0x156   : > { %v1306_v28 = vpop.f32.mrb[0].mxu0 }
 0x157   : > { %v1307_v29 = vadd.f32 %v1306_v28, %v1227_v27  ;;  %v1308_v30 = vpop.f32.mrb[1].mxu0  ;;  %v1741_v28 = vld [vmem:[%s9379_s21 + $0x120] sm:$0xff] }
 0x158   : > { %v1309_v31 = vadd.f32 %v1308_v30, %v1227_v27  ;;  %v8054_v27 = vpack.c.bf16 %v1744_v26, %v1742_v25 }
 0x159   : > { %v1311_v33 = vmax.f32 %v1307_v29, 0.0  ;;  %v1743_v29 = vld [vmem:[%s9379_s21 + $0x130] sm:$0xff] }
 0x15a   : > { %v1312_v32 = vmax.f32 %v1309_v31, 0.0  ;;  %v8056_v30 = vpack.c.bf16 %v1743_v29, %v1741_v28  ;;  %v1746_v31 = vld [vmem:[%s9379_s21 + $0x148] sm:$0xff] }
 0x15c   : > { %1505 = vmatprep.mubr.f32.mxu1 %v1312_v32  ;;  %1576 = vmatprep.mubr.f32.mxu0 %v1312_v32  ;;  %v1748_v32 = vld [vmem:[%s9379_s21 + $0x158] sm:$0xff] }
 0x15d   : > { %1506 = vmatmul.mubr.f32.vlgmr.msra.gmra.mrb[0].mxu1 %v1311_v33  ;;  %1577 = vmatmul.mubr.f32.vlgmr.msra.gmra.mrb[2].mxu0 %v1311_v33  ;;  %v8058_v33 = vpack.c.bf16 %v1748_v32, %v1746_v31 }
 0x15e   : > { %8021 = vmatpush1.bf16.msra.mxu1 %v8020_v41  ;;  %v8062_v41 = vpack.c.bf16 %v1752_v38, %v1750_v37  ;;  %7335 = vmatprep.mubr.msk.f32.mxu0 %vm9343_vm12, %v9331_v0 }
 0x15f   : > { %8023 = vmatprep.subr.bf16.mxu1 %v8022_v42  ;;  %v1749_v42 = vld [vmem:[%s9379_s21 + $0x160] sm:$0xff] }
 0x160   : > { %v8064_v46 = vpack.c.bf16 %v1751_v43, %v1749_v42 }
 0x162   : > { %8025 = vmatpush1.bf16.msra.mxu1 %v8024_v47 }
 0x163   : > { %8027 = vmatprep.subr.bf16.mxu1 %v8026_v48  ;;  %v1754_v48 = vld [vmem:[%s9379_s21 + $0x188] sm:$0xff] }
 0x164   : > { %v8066_v50 = vpack.c.bf16 %v1756_v49, %v1754_v48 }
 0x166   : > { %8029 = vmatpush1.bf16.msra.mxu1 %v8028_v53  ;;  %v8068_v53 = vpack.c.bf16 %v1755_v52, %v1753_v51 }
 0x167   : > { %8031 = vmatprep.subr.bf16.mxu1 %v8030_v54  ;;  %v1758_v54 = vld [vmem:[%s9379_s21 + $0x1a8] sm:$0xff] }
 0x168   : > { %v8070_v56 = vpack.c.bf16 %v1760_v55, %v1758_v54 }
 0x16a   : > { %8033 = vmatpush1.bf16.msra.mxu1 %v8032_v59  ;;  %v8072_v59 = vpack.c.bf16 %v1759_v58, %v1757_v57 }
 0x16b   : > { %8035 = vmatprep.subr.bf16.mxu1 %v8034_v60  ;;  %v1762_v60 = vld [vmem:[%s9379_s21 + $0x1c8] sm:$0xff] }
 0x16c   : > { %v8074_v62 = vpack.c.bf16 %v1764_v61, %v1762_v60 }
 0x16e   : > { %8037 = vmatpush1.bf16.msra.mxu1 %v8036_v2  ;;  %v8076_v2 = vpack.c.bf16 %v1763_v1, %v1761_v63 }
 0x16f   : > { %8039 = vmatprep.subr.bf16.mxu1 %v8038_v3  ;;  %v1766_v3 = vld [vmem:[%s9379_s21 + $0x1e8] sm:$0xff] }
 0x170   : > { %v8078_v5 = vpack.c.bf16 %v1768_v4, %v1766_v3 }
 0x172   : > { %8041 = vmatpush1.bf16.msra.mxu1 %v8040_v8  ;;  %v8080_v8 = vpack.c.bf16 %v1767_v7, %v1765_v6  ;;  %v1769_v7 = vld [vmem:[%s9379_s21 + $0x200] sm:$0xff] }
 0x173   : > { %8043 = vmatprep.subr.bf16.mxu1 %v8042_v9  ;;  %v1770_v9 = vld [vmem:[%s9379_s21 + $0x208] sm:$0xff] }
 0x174   : > { %v8082_v11 = vpack.c.bf16 %v1772_v10, %v1770_v9 }
 0x176   : > { %8045 = vmatpush1.bf16.msra.mxu1 %v8044_v14 }
 0x177   : > { %8047 = vmatprep.subr.bf16.mxu1 %v8046_v15 }
 0x17a   : > { %8049 = vmatpush1.bf16.msra.mxu1 %v8048_v18 }
 0x17b   : > { %8051 = vmatprep.subr.bf16.mxu1 %v8050_v21 }
 0x17e   : > { %8053 = vmatpush1.bf16.msra.mxu1 %v8052_v24 }
 0x17f   : > { %8055 = vmatprep.subr.bf16.mxu1 %v8054_v27 }
 0x182   : > { %8057 = vmatpush1.bf16.msra.mxu1 %v8056_v30 }
 0x183   : > { %8059 = vmatprep.subr.bf16.mxu1 %v8058_v33 }
 0x186   : > { %8061 = vmatpush1.bf16.msra.mxu1 %v8060_v36 }
 0x187   : > { %8063 = vmatprep.subr.bf16.mxu1 %v8062_v41 }
 0x18a   : > { %8065 = vmatpush1.bf16.msra.mxu1 %v8064_v46 }
 0x18b   : > { %8067 = vmatprep.subr.bf16.mxu1 %v8066_v50 }
 0x18e   : > { %8069 = vmatpush1.bf16.msra.mxu1 %v8068_v53 }
 0x18f   : > { %8071 = vmatprep.subr.bf16.mxu1 %v8070_v56 }
 0x192   : > { %8073 = vmatpush1.bf16.msra.mxu1 %v8072_v59 }
 0x193   : > { %8075 = vmatprep.subr.bf16.mxu1 %v8074_v62 }
 0x196   : > { %8077 = vmatpush1.bf16.msra.mxu1 %v8076_v2 }
 0x197   : > { %8079 = vmatprep.subr.bf16.mxu1 %v8078_v5 }
 0x19a   : > { %8081 = vmatpush1.bf16.msra.mxu1 %v8080_v8  ;;  %v1771_v8 = vld [vmem:[%s9379_s21 + $0x210] sm:$0xff] }
 0x19b   : > { %8083 = vmatprep.subr.bf16.mxu1 %v8082_v11 }
 0x230   : > { %v9807_v39 = vpop.f32.mrb[0].mxu1  ;;  %v9809_v40 = vpop.f32.mrb[2].mxu0 }
 0x231   : > { %1604 = vrot.lane.b32.xlu0 %v9809_v40, %s10723_s16  ;;  %1589 = vrot.lane.b32.xlu1 %v9809_v40, %s10721_s26  ;;  %v9817_v44 = vpop.f32.mrb[1].mxu1  ;;  %v1580_v45 = vpop.f32.mrb[3].mxu0 }
 0x232   : > { %v8761_v47 = vpack.i.bf16 %v9807_v39, %v9817_v44 }
 0x235   : > { %1619 = vrot.lane.b32.xlu0 %v9809_v40, %s9335_s10  ;;  %8762 = vrot.lane.b32.xlu1 %v8761_v47, %s10723_s16  ;;  %s9340_s16 = smov 90  }
 0x239   : > { %1634 = vrot.lane.b32.xlu0 %v9809_v40, %s9336_s15  ;;  %8767 = vrot.lane.b32.xlu1 %v8761_v47, %s9335_s10  ;;  %s9337_s10 = smov 108  }
 0x23d   : > { %8772 = vrot.lane.b32.xlu1 %v8761_v47, %s9336_s15  ;;  %8757 = vrot.lane.b32.xlu0 %v8761_v47, %s10721_s26  ;;  %s9338_s15 = smov 92   ;;  %s9339_s26 = smov 91  }
 0x241   : > { %8777 = vrot.lane.b32.xlu1 %v8761_v47, %s9337_s10  ;;  %1649 = vrot.lane.b32.xlu0 %v9809_v40, %s9337_s10 }
 0x245   : > { %8782 = vrot.lane.b32.xlu1 %v8761_v47, %s9338_s15  ;;  %1664 = vrot.lane.b32.xlu0 %v9809_v40, %s9338_s15  ;;  %s10793_s15 = smov 127  }
 0x249   : > { %8787 = vrot.lane.b32.xlu1 %v8761_v47, %s9339_s26  ;;  %1679 = vrot.lane.b32.xlu0 %v9809_v40, %s9339_s26  ;;  %s10792_s26 = smov 126  }
 0x24d   : > { %8792 = vrot.lane.b32.xlu1 %v8761_v47, %s9340_s16  ;;  %1694 = vrot.lane.b32.xlu0 %v9809_v40, %s9340_s16  ;;  %s9342_s16 = smov 118  }
 0x2a3   : > { %v9849_v12 = vpop.permute.xlu0 %1604  ;;  %v9851_v13 = vpop.permute.xlu1 %1589 }
 0x2a7   : > { %v9853_v14 = vpop.permute.xlu0 %1619  ;;  %v8763_v15 = vpop.permute.xlu1 %8762 }
 0x2a8   : > { %v8765_v20 = vunpack.i.h.bf16 %v8763_v15  ;;  %v8764_v21 = vunpack.i.l.bf16 %v8763_v15  ;;  %v1774_v15 = vld [vmem:[%s9379_s21 + $0x228] sm:$0xff] }
 0x2aa   : > { %v1607_v32 = vsel %vm1606_vm3, %v8765_v20, %v8764_v21  ;;  %v1608_v33 = vsel %vm1606_vm3, %v8764_v21, %v9849_v12  ;;  %vm4245_vm3 = vcmask 785408  }
 0x2ab   : > { %v9855_v16 = vpop.permute.xlu0 %1634  ;;  %v8768_v17 = vpop.permute.xlu1 %8767 }
 0x2ac   : > { %v8770_v24 = vunpack.i.h.bf16 %v8768_v17  ;;  %v8769_v25 = vunpack.i.l.bf16 %v8768_v17  ;;  %v1776_v17 = vld [vmem:[%s9379_s21 + $0x238] sm:$0xff] }
 0x2ae   : > { %v1622_v38 = vsel %vm1621_vm4, %v8770_v24, %v8769_v25  ;;  %v1623_v41 = vsel %vm1621_vm4, %v8769_v25, %v9853_v14  ;;  %v8086_v24 = vpack.c.bf16 %v1776_v17, %v1774_v15  ;;  %v1773_v25 = vld [vmem:[%s9379_s21 + $0x220] sm:$0xff]  ;;  %v1952_v17 = vld [vmem:[%s9404_s14 + $0x30] sm:$0xff]  ;;  %vm5842_vm4 = vcmask 523264  }
 0x2af   : > { %v8773_v18 = vpop.permute.xlu1 %8772  ;;  %v8758_v19 = vpop.permute.xlu0 %8757  ;;  %v1950_v15 = vld [vmem:[%s9404_s14 + $0x20] sm:$0xff] }
 0x2b0   : > { %v8760_v22 = vunpack.i.h.bf16 %v8758_v19  ;;  %v8759_v23 = vunpack.i.l.bf16 %v8758_v19  ;;  %v8775_v34 = vunpack.i.h.bf16 %v8773_v18  ;;  %v8774_v35 = vunpack.i.l.bf16 %v8773_v18 }
 0x2b2   : > { %v1592_v26 = vsel %vm1591_vm2, %v8760_v22, %v8759_v23  ;;  %v1593_v27 = vsel %vm1591_vm2, %v8759_v23, %v9851_v13  ;;  %v1637_v47 = vsel %vm1636_vm5, %v8775_v34, %v8774_v35  ;;  %v1638_v48 = vsel %vm1636_vm5, %v8774_v35, %v9855_v16  ;;  %v1784_v34 = vld [vmem:[%s9379_s21 + $0x278] sm:$0xff] }
 0x2b3   : > { %v1597_v28 = vmax.f32 %v9807_v39, %v1592_v26  ;;  %v1598_v29 = vmax.f32 %v9817_v44, %v1593_v27  ;;  %v8778_v30 = vpop.permute.xlu1 %8777  ;;  %v9860_v31 = vpop.permute.xlu0 %1649  ;;  %v8084_v22 = vpack.c.bf16 %v1771_v8, %v1769_v7  ;;  %v1599_v23 = vmax.f32 %v9809_v40, %v9851_v13  ;;  %v1775_v26 = vld [vmem:[%s9379_s21 + $0x230] sm:$0xff]  ;;  %v1778_v27 = vld [vmem:[%s9379_s21 + $0x248] sm:$0xff]  ;;  %v1777_v40 = vld [vmem:[%s9379_s21 + $0x240] sm:$0xff] }
 0x2b4   : > { %v8780_v42 = vunpack.i.h.bf16 %v8778_v30  ;;  %v8779_v43 = vunpack.i.l.bf16 %v8778_v30  ;;  %v1779_v13 = vld [vmem:[%s9379_s21 + $0x250] sm:$0xff]  ;;  %v1939_v8 = vld [vmem:[%s9384_s25 + $0x8] sm:$0xff]  ;;  %vm4601_vm2 = vcmask 130048   ;;  %vm6358_vm5 = vcmask 261120  }
 0x2b5   : > { %v1612_v36 = vmax.f32 %v1597_v28, %v1607_v32  ;;  %v1613_v37 = vmax.f32 %v1598_v29, %v1608_v33  ;;  %v1780_v28 = vld [vmem:[%s9379_s21 + $0x258] sm:$0xff]  ;;  %v8088_v29 = vpack.c.bf16 %v1775_v26, %v1773_v25  ;;  %v1614_v30 = vmax.f32 %v1599_v23, %v9849_v12  ;;  %v1782_v33 = vld [vmem:[%s9379_s21 + $0x268] sm:$0xff]  ;;  %v1956_v23 = vld [vmem:[%s9404_s14 + $0x50] sm:$0xff] }
 0x2b6   : > { %v1652_v53 = vsel %vm1651_vm6, %v8780_v42, %v8779_v43  ;;  %v1653_v54 = vsel %vm1651_vm6, %v8779_v43, %v9860_v31  ;;  %v8090_v32 = vpack.c.bf16 %v1780_v28, %v1778_v27  ;;  %v8092_v35 = vpack.c.bf16 %v1779_v13, %v1777_v40  ;;  %v1961_v25 = vld [vmem:[%s9404_s14 + $0x78] sm:$0xff]  ;;  %v1958_v28 = vld [vmem:[%s9404_s14 + $0x60] sm:$0xff] }
 0x2b7   : > { %v1627_v39 = vmax.f32 %v1612_v36, %v1622_v38  ;;  %v1628_v45 = vmax.f32 %v1613_v37, %v1623_v41  ;;  %v8783_v44 = vpop.permute.xlu1 %8782  ;;  %v9864_v46 = vpop.permute.xlu0 %1664  ;;  %v1629_v36 = vmax.f32 %v1614_v30, %v9853_v14  ;;  %v8094_v37 = vpack.c.bf16 %v1784_v34, %v1782_v33  ;;  %v1781_v38 = vld [vmem:[%s9379_s21 + $0x260] sm:$0xff]  ;;  %v1783_v41 = vld [vmem:[%s9379_s21 + $0x270] sm:$0xff]  ;;  %v1963_v30 = vld [vmem:[%s9404_s14 + $0x88] sm:$0xff] }
 0x2b8   : > { %v8785_v49 = vunpack.i.h.bf16 %v8783_v44  ;;  %v8784_v50 = vunpack.i.l.bf16 %v8783_v44  ;;  %v8096_v12 = vpack.c.bf16 %v1783_v41, %v1781_v38  ;;  %v1785_v14 = vld [vmem:[%s9379_s21 + $0x280] sm:$0xf]  ;;  %v1964_v34 = vld [vmem:[%s9404_s14 + $0x90] sm:$0xff]  ;;  %vm6688_vm6 = vcmask 72704  }
 0x2b9   : > { %v1642_v51 = vmax.f32 %v1627_v39, %v1637_v47  ;;  %v1643_v52 = vmax.f32 %v1628_v45, %v1638_v48  ;;  %v1644_v42 = vmax.f32 %v1629_v36, %v9855_v16  ;;  %v1786_v39 = vld [vmem:[%s9379_s21 + $0x288] sm:$0xf]  ;;  %v9341_v16 = vmov 0.0|0.0   ;;  %v1962_v33 = vld [vmem:[%s9404_s14 + $0x80] sm:$0xff] }
 0x2ba   : > { %v1667_v59 = vsel %vm1666_vm7, %v8785_v49, %v8784_v50  ;;  %v1668_v60 = vsel %vm1666_vm7, %v8784_v50, %v9864_v46  ;;  %8101 = vmatprep.subr.bf16.mxu0 %v9341_v16  ;;  %v1967_v36 = vld [vmem:[%s9404_s14 + $0xa8] sm:$0xff]  ;;  %v1966_v41 = vld [vmem:[%s9404_s14 + $0xa0] sm:$0xff] }
 0x2bb   : > { %v1657_v55 = vmax.f32 %v1642_v51, %v1652_v53  ;;  %v1658_v56 = vmax.f32 %v1643_v52, %v1653_v54  ;;  %v8788_v57 = vpop.permute.xlu1 %8787  ;;  %v9868_v58 = vpop.permute.xlu0 %1679  ;;  %v1659_v43 = vmax.f32 %v1644_v42, %v9860_v31  ;;  %v1938_v52 = vld [vmem:[%s9384_s25] sm:$0xff]  ;;  %v1968_v42 = vld [vmem:[%s9404_s14 + $0xb0] sm:$0xff] }
 0x2bc   : > { %v8790_v61 = vunpack.i.h.bf16 %v8788_v57  ;;  %v8789_v62 = vunpack.i.l.bf16 %v8788_v57  ;;  %v1941_v53 = vld [vmem:[%s9389_s29] sm:$0xff] }
 0x2bd   : > { %v1672_v63 = vmax.f32 %v1657_v55, %v1667_v59  ;;  %v1673_v1 = vmax.f32 %v1658_v56, %v1668_v60  ;;  %v1674_v45 = vmax.f32 %v1659_v43, %v9864_v46  ;;  %v1971_v43 = vld [vmem:[%s9404_s14 + $0xc8] sm:$0xf] }
 0x2be   : > { %v1682_v2 = vsel %vm1681_vm8, %v8790_v61, %v8789_v62  ;;  %v1683_v3 = vsel %vm1681_vm8, %v8789_v62, %v9868_v58  ;;  %v1947_v62 = vld [vmem:[%s9404_s14 + $0x8] sm:$0xff] }
 0x2bf   : > { %v8793_v4 = vpop.permute.xlu1 %8792  ;;  %v1687_v9 = vmax.f32 %v1672_v63, %v1682_v2  ;;  %v1688_v10 = vmax.f32 %v1673_v1, %v1683_v3  ;;  %v1695_v11 = vpop.permute.xlu0 %1694  ;;  %v1689_v44 = vmax.f32 %v1674_v45, %v9868_v58  ;;  %v1949_v63 = vld [vmem:[%s9404_s14 + $0x18] sm:$0xff]  ;;  %v1946_v1 = vld [vmem:[%s9404_s14] sm:$0xff]  ;;  %v1948_v2 = vld [vmem:[%s9404_s14 + $0x10] sm:$0xff] }
 0x2c0   : > { %v8795_v5 = vunpack.i.h.bf16 %v8793_v4  ;;  %v8794_v6 = vunpack.i.l.bf16 %v8793_v4  ;;  %v1951_v3 = vld [vmem:[%s9404_s14 + $0x28] sm:$0xff]  ;;  %v1953_v4 = vld [vmem:[%s9404_s14 + $0x38] sm:$0xff] }
 0x2c1   : > { %v1704_v47 = vmax.f32 %v1689_v44, %v1695_v11 }
 0x2c2   : > { %v1697_v18 = vsel %vm1696_vm9, %v8795_v5, %v8794_v6  ;;  %v1698_v19 = vsel %vm1696_vm9, %v8794_v6, %v1695_v11  ;;  %v1940_v5 = vld [vmem:[%s9384_s25 + $0x10] sm:$0xff]  ;;  %v8107_v6 = vpack.c.bf16 %v1949_v63, %v1947_v62  ;;  %v8111_v11 = vpack.c.bf16 %v1953_v4, %v1951_v3 }
 0x2c3   : > { %v1703_v20 = vmax.f32 %v1688_v10, %v1698_v19  ;;  %v1702_v21 = vmax.f32 %v1687_v9, %v1697_v18  ;;  %v8109_v9 = vpack.c.bf16 %v1948_v2, %v1946_v1  ;;  %v1955_v18 = vld [vmem:[%s9404_s14 + $0x48] sm:$0xff]  ;;  %v1957_v19 = vld [vmem:[%s9404_s14 + $0x58] sm:$0xff] }
 0x2c4   : > { %v1943_v1 = vld [vmem:[%s10786_s3 + $0x8] sm:$0xff] }
 0x2c5   : > { %1862 = vmatprep.mubr.f32.mxu1 %v1703_v20  ;;  %v8113_v20 = vpack.c.bf16 %v1952_v17, %v1950_v15  ;;  %v2566_v15 = vld [vmem:[%s9409_s19 + $0x28] sm:$0xff]  ;;  %v2568_v17 = vld [vmem:[%s9409_s19 + $0x38] sm:$0xff] }
 0x2c6   : > { %1863 = vmatmul.mubr.f32.vlgmr.msra.gmra.mrb[2].mxu1 %v1702_v21  ;;  %v8115_v21 = vpack.c.bf16 %v1957_v19, %v1955_v18  ;;  %v1944_v19 = vld [vmem:[%s10786_s3 + $0x10] sm:$0xff] }
 0x2c7   : > { %8085 = vmatpush1.bf16.msra.mxu1 %v8084_v22  ;;  %1932 = vmatprep.mubr.f32.mxu1 %v9331_v0  ;;  %v1954_v22 = vld [vmem:[%s9404_s14 + $0x40] sm:$0xff] }
 0x2c8   : > { %8087 = vmatprep.subr.bf16.mxu1 %v8086_v24  ;;  %v1959_v24 = vld [vmem:[%s9404_s14 + $0x68] sm:$0xff]  ;;  %v8117_v26 = vpack.c.bf16 %v1956_v23, %v1954_v22  ;;  %v8144_v22 = vpack.c.bf16 %v2568_v17, %v2566_v15  ;;  %v2565_v23 = vld [vmem:[%s9409_s19 + $0x20] sm:$0xff]  ;;  %v2669_v15 = vld [vmem:[%s9414_s24 + $0x18] sm:$0xff] }
 0x2c9   : > { %v8119_v27 = vpack.c.bf16 %v1961_v25, %v1959_v24  ;;  %v2567_v24 = vld [vmem:[%s9409_s19 + $0x30] sm:$0xff] }
 0x2ca   : > { %v8146_v25 = vpack.c.bf16 %v2567_v24, %v2565_v23  ;;  %v2670_v23 = vld [vmem:[%s9414_s24 + $0x20] sm:$0xff] }
 0x2cb   : > { %8089 = vmatpush1.bf16.msra.mxu1 %v8088_v29  ;;  %v1960_v29 = vld [vmem:[%s9404_s14 + $0x70] sm:$0xff]  ;;  %v2699_v24 = vld [vmem:[%s10785_s12] sm:$0xff] }
 0x2cc   : > { %8091 = vmatprep.subr.bf16.mxu1 %v8090_v32  ;;  %v1965_v32 = vld [vmem:[%s9404_s14 + $0x98] sm:$0xff]  ;;  %v8121_v40 = vpack.c.bf16 %v1960_v29, %v1958_v28  ;;  %v2569_v29 = vld [vmem:[%s9409_s19 + $0x40] sm:$0xff] }
 0x2cd   : > { %v8123_v13 = vpack.c.bf16 %v1965_v32, %v1963_v30  ;;  %v2571_v30 = vld [vmem:[%s9409_s19 + $0x50] sm:$0xff] }
 0x2ce   : > { %v8150_v32 = vpack.c.bf16 %v2571_v30, %v2569_v29  ;;  %v2702_v29 = vld [vmem:[%s10785_s12 + $0x18] sm:$0xff]  ;;  %v2671_v30 = vld [vmem:[%s9414_s24 + $0x28] sm:$0xff] }
 0x2cf   : > { %8093 = vmatpush1.bf16.msra.mxu1 %v8092_v35  ;;  %v8125_v35 = vpack.c.bf16 %v1964_v34, %v1962_v33  ;;  %v2573_v33 = vld [vmem:[%s9409_s19 + $0x60] sm:$0xff]  ;;  %v2575_v34 = vld [vmem:[%s9409_s19 + $0x70] sm:$0xff] }
 0x2d0   : > { %8095 = vmatprep.subr.bf16.mxu1 %v8094_v37  ;;  %v1969_v37 = vld [vmem:[%s9404_s14 + $0xb8] sm:$0xff] }
 0x2d1   : > { %v8127_v38 = vpack.c.bf16 %v1969_v37, %v1967_v36  ;;  %v2578_v36 = vld [vmem:[%s9409_s19 + $0x88] sm:$0xff]  ;;  %v2580_v37 = vld [vmem:[%s9409_s19 + $0x98] sm:$0xff] }
 0x2d3   : > { %8097 = vmatpush1.bf16.msra.mxu1 %v8096_v12  ;;  %v8129_v12 = vpack.c.bf16 %v1968_v42, %v1966_v41  ;;  %v2577_v41 = vld [vmem:[%s9409_s19 + $0x80] sm:$0xff]  ;;  %v2579_v42 = vld [vmem:[%s9409_s19 + $0x90] sm:$0xff] }
 0x2d4   : > { %6861 = vmatprep.subr.msk.mxu1 %vm1791_vm10, %v1786_v39  ;;  %v1970_v39 = vld [vmem:[%s9404_s14 + $0xc0] sm:$0xf] }
 0x2d7   : > { %6862 = vmatpush1.msk.msra.mxu1 %vm1791_vm10, %v1785_v14 }
 0x2d8   : > { %6863 = vmatmul.mubr.msk.f32.vlgmr.msra.gmra.mrb[2].mxu1 %vm1787_vm11, %v1704_v47  ;;  %8098 = vmatprep.subr.bf16.mxu1 %v9341_v16 }
 0x2d9   : > { %7326 = vmatprep.mubr.msk.f32.mxu1 %vm9343_vm12, %v9331_v0 }
 0x3ab   : > { %v9901_v31 = vpop.f32.mrb[2].mxu1 }
 0x3ac   : > { %1976 = vrot.lane.b32.xlu0 %v9901_v31, %s9337_s10  ;;  %1973 = vrot.lane.b32.xlu1 %v9901_v31, %s9342_s16  ;;  %v1936_v46 = vpop.f32.mrb[3].mxu1 }
 0x41e   : > { %v1974_v48 = vpop.permute.xlu1 %1973  ;;  %v1977_v51 = vpop.permute.xlu0 %1976 }
 0x41f   : > { %v8102_v49 = vpack.c.bf16 %v1974_v48, %v9901_v31  ;;  %v8801_v50 = vpack.i.bf16 %v1974_v48, %v9901_v31 }
 0x421   : > { %8103 = vmatpush3.bf16.msra.mxu0 %v8102_v49  ;;  %8802 = vrot.lane.b32.xlu0 %v8801_v50, %s10792_s26 }
 0x422   : > { %8797 = vrot.lane.b32.xlu1 %v8801_v50, %s10793_s15  ;;  %7333 = vmatprep.subr.mxu0 %v9331_v0 }
 0x425   : > { %7334 = vmatpush3.msra.mxu0 %v1977_v51  ;;  %2139 = vrot.lane.b32.xlu0 %v1977_v51, %s10792_s26 }
 0x426   : > { %1983 = vrot.lane.b32.xlu1 %v1977_v51, %s10793_s15  ;;  %8104 = vmatprep.subr.bf16.mxu0 %v9341_v16 }
 0x427   : > { %7336 = vmatmul.mubr.msk.f32.vlgmr.msra.gmra.mrb[4].mxu0 %vm1988_vm13, %v1938_v52 }
 0x428   : > { %7344 = vmatprep.mubr.msk.f32.mxu0 %vm9343_vm12, %v9331_v0 }
 0x42a   : > { %2220 = vperm.xlu1 %8806, %v1941_v53  }
 0x493   : > { %v8803_v54 = vpop.permute.xlu0 %8802 }
 0x494   : > { %v8805_v55 = vunpack.i.h.bf16 %v8803_v54  ;;  %v8804_v56 = vunpack.i.l.bf16 %v8803_v54  ;;  %v8798_v57 = vpop.permute.xlu1 %8797 }
 0x495   : > { %v8800_v58 = vunpack.i.h.bf16 %v8798_v57  ;;  %v8799_v59 = vunpack.i.l.bf16 %v8798_v57 }
 0x496   : > { %v8105_v60 = vpack.c.bf16 %v8805_v55, %v8804_v56 }
 0x497   : > { %v8099_v61 = vpack.c.bf16 %v8800_v58, %v8799_v59  ;;  %v2140_v7 = vpop.permute.xlu0 %2139  ;;  %v1945_v59 = vld [vmem:[%s10794_s8] sm:$0xff]  ;;  %s10798_s8 = sld [smem:[#allocation13_spill]] }
 0x498   : > { %8106 = vmatpush3.bf16.msra.mxu0 %v8105_v60  ;;  %v1984_v10 = vpop.permute.xlu1 %1983 }
 0x499   : > { %8100 = vmatpush3.bf16.msra.mxu1 %v8099_v61  ;;  %7342 = vmatprep.subr.mxu0 %v9331_v0 }
 0x49a   : > { %7324 = vmatprep.subr.mxu1 %v9331_v0 }
 0x49c   : > { %7343 = vmatpush3.msra.mxu0 %v2140_v7 }
 0x49d   : > { %7325 = vmatpush3.msra.mxu1 %v1984_v10  ;;  %7345 = vmatmul.mubr.msk.f32.vlgmr.msra.gmra.mrb[6].mxu0 %vm1988_vm13, %v1940_v5  ;;  %v2561_v10 = vld [vmem:[%s9409_s19] sm:$0xff] }
 0x49e   : > { %7327 = vmatmul.mubr.msk.f32.vlgmr.msra.gmra.mrb[4].mxu1 %vm1988_vm13, %v1939_v8  ;;  %8108 = vmatprep.subr.bf16.mxu0 %v8107_v6  ;;  %v1942_v6 = vld [vmem:[%s10786_s3] sm:$0xff]  ;;  %v2562_v8 = vld [vmem:[%s9409_s19 + $0x8] sm:$0xff]  ;;  %s10727_s3 = smov 122  }
 0x49f   : > { %8110 = vmatpush1.bf16.msra.mxu0 %v8109_v9  ;;  %2299 = vmatprep.mubr.f32.mxu0 %v9331_v0  ;;  %v2564_v9 = vld [vmem:[%s9409_s19 + $0x18] sm:$0xff] }
 0x4a0   : > { %8112 = vmatprep.subr.bf16.mxu0 %v8111_v11  ;;  %v2563_v11 = vld [vmem:[%s9409_s19 + $0x10] sm:$0xff]  ;;  %v8140_v18 = vpack.c.bf16 %v2564_v9, %v2562_v8 }
 0x4a3   : > { %8114 = vmatpush1.bf16.msra.mxu0 %v8113_v20  ;;  %v8142_v20 = vpack.c.bf16 %v2563_v11, %v2561_v10 }
 0x4a4   : > { %8116 = vmatprep.subr.bf16.mxu0 %v8115_v21 }
 0x4a7   : > { %8118 = vmatpush1.bf16.msra.mxu0 %v8117_v26  ;;  %v2570_v26 = vld [vmem:[%s9409_s19 + $0x48] sm:$0xff] }
 0x4a8   : > { %8120 = vmatprep.subr.bf16.mxu0 %v8119_v27  ;;  %v2572_v27 = vld [vmem:[%s9409_s19 + $0x58] sm:$0xff] }
 0x4a9   : > { %v2221_v50 = vpop.permute.xlu1 %2220  ;;  %v8148_v28 = vpack.c.bf16 %v2572_v27, %v2570_v26 }
 0x4ab   : > { %8122 = vmatpush1.bf16.msra.mxu0 %v8121_v40  ;;  %v2576_v40 = vld [vmem:[%s9409_s19 + $0x78] sm:$0xff] }
 0x4ac   : > { %8124 = vmatprep.subr.bf16.mxu0 %v8123_v13 }
 0x4af   : > { %8126 = vmatpush1.bf16.msra.mxu0 %v8125_v35  ;;  %v8154_v35 = vpack.c.bf16 %v2575_v34, %v2573_v33  ;;  %v2705_v33 = vld [vmem:[%s10785_s12 + $0x30] sm:$0xff]  ;;  %v2706_v34 = vld [vmem:[%s10785_s12 + $0x38] sm:$0xff] }
 0x4b0   : > { %8128 = vmatprep.subr.bf16.mxu0 %v8127_v38  ;;  %v8156_v38 = vpack.c.bf16 %v2580_v37, %v2578_v36  ;;  %v2707_v36 = vld [vmem:[%s10785_s12 + $0x40] sm:$0xff]  ;;  %v2708_v37 = vld [vmem:[%s10785_s12 + $0x48] sm:$0xff] }
 0x4b3   : > { %8130 = vmatpush1.bf16.msra.mxu0 %v8129_v12  ;;  %v8158_v12 = vpack.c.bf16 %v2579_v42, %v2577_v41  ;;  %v2709_v41 = vld [vmem:[%s10785_s12 + $0x50] sm:$0xff]  ;;  %v2710_v42 = vld [vmem:[%s10785_s12 + $0x58] sm:$0xff] }
 0x4b4   : > { %6867 = vmatprep.subr.msk.mxu0 %vm1791_vm10, %v1971_v43  ;;  %v2582_v43 = vld [vmem:[%s9409_s19 + $0xa8] sm:$0xff] }
 0x4b7   : > { %6868 = vmatpush1.msk.msra.mxu0 %vm1791_vm10, %v1970_v39  ;;  %v2584_v39 = vld [vmem:[%s9409_s19 + $0xb8] sm:$0xff] }
 0x4b8   : > { %8131 = vmatprep.subr.bf16.mxu0 %v9341_v16 }
 0x4fa   : > { %v2131_v45 = vpop.f32.mrb[4].mxu0 }
 0x4fb   : > { %v7337_v44 = vpop.f32.mrb[5].mxu0 }
 0x4fc   : > { %v2581_v44 = vld [vmem:[%s9409_s19 + $0xa0] sm:$0xff] }
 0x570   : > { %v2213_v14 = vpop.f32.mrb[6].mxu0 }
 0x571   : > { %v2058_v47 = vpop.f32.mrb[4].mxu1  ;;  %v7346_v46 = vpop.f32.mrb[7].mxu0 }
 0x572   : > { %v2132_v48 = vadd.f32 %v2131_v45, %v2058_v47  ;;  %v7328_v49 = vpop.f32.mrb[5].mxu1  ;;  %v8160_v45 = vpack.c.bf16 %v2584_v39, %v2582_v43  ;;  %v2586_v46 = vld [vmem:[%s9409_s19 + $0xc8] sm:$0xf]  ;;  %v2711_v43 = vld [vmem:[%s10785_s12 + $0x60] sm:$0xf] }
 0x574   : > { %v2217_v51 = vadd.f32 %v2213_v14, %v2132_v48  ;;  %v2583_v14 = vld [vmem:[%s9409_s19 + $0xb0] sm:$0xff]  ;;  %v2585_v48 = vld [vmem:[%s9409_s19 + $0xc0] sm:$0xf] }
 0x575   : > { %v8162_v47 = vpack.c.bf16 %v2583_v14, %v2581_v44 }
 0x576   : > { %v2223_v52 = vadd.f32 %v2221_v50, %v2217_v51 }
 0x578   : > { %v2224_v53 = vmax.f32 %v2223_v52, 0.0 }
 0x57a   : > { %6869 = vmatmul.mubr.msk.f32.vlgmr.msra.gmra.mrb[8].mxu0 %vm2225_vm14, %v2224_v53 }
 0x57b   : > { %7353 = vmatprep.mubr.msk.f32.mxu0 %vm9343_vm12, %v9331_v0 }
 0x64d   : > { %v2301_v54 = vpop.f32.mrb[8].mxu0 }
 0x64e   : > { %2309 = vrot.lane.b32.xlu1 %v2301_v54, %s9337_s10  ;;  %2306 = vrot.lane.b32.xlu0 %v2301_v54, %s9342_s16  ;;  %v2303_v55 = vpop.f32.mrb[9].mxu0 }
 0x6c0   : > { %v2310_v56 = vpop.permute.xlu1 %2309  ;;  %v2307_v57 = vpop.permute.xlu0 %2306 }
 0x6c1   : > { %2316 = vrot.lane.b32.xlu1 %v2310_v56, %s10793_s15  ;;  %v8807_v58 = vpack.i.bf16 %v2307_v57, %v2301_v54  ;;  %v8135_v4 = vpack.c.bf16 %v2307_v57, %v2301_v54 }
 0x6c3   : > { %8808 = vrot.lane.b32.xlu0 %v8807_v58, %s10793_s15 }
 0x6c5   : > { %2471 = vrot.lane.b32.xlu1 %v2310_v56, %s10792_s26 }
 0x6c7   : > { %8813 = vrot.lane.b32.xlu0 %v8807_v58, %s10792_s26 }
 0x6c9   : > { %2556 = vrot.lane.b32.xlu1 %v9901_v31, %s9344_s5  ;;  %s10795_s5 = sld [smem:[#allocation12_spill]] }
 0x6cb   : > { %2552 = vperm.xlu0 %8755, %v1945_v59  }
 0x733   : > { %v2317_v2 = vpop.permute.xlu1 %2316 }
 0x735   : > { %v8809_v60 = vpop.permute.xlu0 %8808 }
 0x736   : > { %v8811_v61 = vunpack.i.h.bf16 %v8809_v60  ;;  %v8810_v62 = vunpack.i.l.bf16 %v8809_v60 }
 0x737   : > { %v2472_v21 = vpop.permute.xlu1 %2471 }
 0x738   : > { %v8132_v63 = vpack.c.bf16 %v8811_v61, %v8810_v62 }
 0x739   : > { %v8814_v3 = vpop.permute.xlu0 %8813 }
 0x73a   : > { %8133 = vmatpush3.bf16.msra.mxu0 %v8132_v63  ;;  %v8816_v31 = vunpack.i.h.bf16 %v8814_v3  ;;  %v8815_v5 = vunpack.i.l.bf16 %v8814_v3 }
 0x73b   : > { %7351 = vmatprep.subr.mxu0 %v9331_v0  ;;  %v2557_v59 = vpop.permute.xlu1 %2556 }
 0x73c   : > { %v8138_v7 = vpack.c.bf16 %v8816_v31, %v8815_v5  ;;  %v2673_v31 = vld [vmem:[%s9419_s30 + $0x8] sm:$0xff]  ;;  %v2672_v5 = vld [vmem:[%s9419_s30] sm:$0xff] }
 0x73e   : > { %7352 = vmatpush3.msra.mxu0 %v2317_v2 }
 0x73f   : > { %7354 = vmatmul.mubr.msk.f32.vlgmr.msra.gmra.mrb[10].mxu0 %vm1988_vm13, %v1943_v1  ;;  %8134 = vmatprep.subr.bf16.mxu0 %v9341_v16  ;;  %v2668_v1 = vld [vmem:[%s9414_s24 + $0x10] sm:$0xff] }
 0x740   : > { %8136 = vmatpush3.bf16.msra.mxu0 %v8135_v4  ;;  %7362 = vmatprep.mubr.msk.f32.mxu0 %vm9343_vm12, %v9331_v0 }
 0x741   : > { %7360 = vmatprep.subr.mxu0 %v9331_v0  ;;  %7380 = vmatprep.mubr.msk.f32.mxu1 %vm1988_vm13, %v2668_v1 }
 0x744   : > { %7361 = vmatpush3.msra.mxu0 %v2310_v56 }
 0x745   : > { %7363 = vmatmul.mubr.msk.f32.vlgmr.msra.gmra.mrb[12].mxu0 %vm1988_vm13, %v1942_v6  ;;  %8137 = vmatprep.subr.bf16.mxu0 %v9341_v16 }
 0x746   : > { %8139 = vmatpush3.bf16.msra.mxu0 %v8138_v7  ;;  %7371 = vmatprep.mubr.msk.f32.mxu0 %vm9343_vm12, %v9331_v0 }
 0x747   : > { %7369 = vmatprep.subr.mxu0 %v9331_v0 }
 0x74a   : > { %7370 = vmatpush3.msra.mxu0 %v2472_v21  ;;  %v2553_v57 = vpop.permute.xlu0 %2552 }
 0x74b   : > { %7372 = vmatmul.mubr.msk.f32.vlgmr.msra.gmra.mrb[14].mxu0 %vm1988_vm13, %v1944_v19  ;;  %8141 = vmatprep.subr.bf16.mxu0 %v8140_v18  ;;  %v2666_v18 = vld [vmem:[%s9414_s24] sm:$0xff] }
 0x74c   : > { %8143 = vmatpush1.bf16.msra.mxu0 %v8142_v20  ;;  %2660 = vmatprep.mubr.f32.mxu0 %v9331_v0  ;;  %v2574_v0 = vld [vmem:[%s9409_s19 + $0x68] sm:$0xff] }
 0x74d   : > { %8145 = vmatprep.subr.bf16.mxu0 %v8144_v22  ;;  %v8152_v13 = vpack.c.bf16 %v2576_v40, %v2574_v0  ;;  %v2667_v22 = vld [vmem:[%s9414_s24 + $0x8] sm:$0xff]  ;;  %v2703_v0 = vld [vmem:[%s10785_s12 + $0x20] sm:$0xff] }
 0x74e   : > { %v2704_v40 = vld [vmem:[%s10785_s12 + $0x28] sm:$0xff] }
 0x750   : > { %8147 = vmatpush1.bf16.msra.mxu0 %v8146_v25  ;;  %v2700_v25 = vld [vmem:[%s10785_s12 + $0x8] sm:$0xff] }
 0x751   : > { %8149 = vmatprep.subr.bf16.mxu0 %v8148_v28  ;;  %v8176_v27 = vpack.c.bf16 %v2700_v25, %v2699_v24  ;;  %v2701_v28 = vld [vmem:[%s10785_s12 + $0x10] sm:$0xff] }
 0x754   : > { %8151 = vmatpush1.bf16.msra.mxu0 %v8150_v32  ;;  %v8180_v32 = vpack.c.bf16 %v2702_v29, %v2701_v28 }
 0x755   : > { %8153 = vmatprep.subr.bf16.mxu0 %v8152_v13  ;;  %v8184_v13 = vpack.c.bf16 %v2704_v40, %v2703_v0 }
 0x758   : > { %8155 = vmatpush1.bf16.msra.mxu0 %v8154_v35  ;;  %v8188_v35 = vpack.c.bf16 %v2706_v34, %v2705_v33 }
 0x759   : > { %8157 = vmatprep.subr.bf16.mxu0 %v8156_v38  ;;  %v8192_v38 = vpack.c.bf16 %v2708_v37, %v2707_v36 }
 0x75c   : > { %8159 = vmatpush1.bf16.msra.mxu0 %v8158_v12  ;;  %v8196_v12 = vpack.c.bf16 %v2710_v42, %v2709_v41 }
 0x75d   : > { %8161 = vmatprep.subr.bf16.mxu0 %v8160_v45 }
 0x760   : > { %8163 = vmatpush1.bf16.msra.mxu0 %v8162_v47 }
 0x761   : > { %6873 = vmatprep.subr.msk.mxu0 %vm1791_vm10, %v2586_v46 }
 0x764   : > { %6874 = vmatpush1.msk.msra.mxu0 %vm1791_vm10, %v2585_v48 }
 0x812   : > { %v2390_v49 = vpop.f32.mrb[10].mxu0 }
 0x813   : > { %v7355_v50 = vpop.f32.mrb[11].mxu0 }
 0x814   : > { %v2682_v50 = vld [vmem:[%s10795_s5] sm:$0xff] }
 0x818   : > { %v2463_v51 = vpop.f32.mrb[12].mxu0 }
 0x819   : > { %v2464_v52 = vadd.f32 %v2463_v51, %v2390_v49  ;;  %v7364_v53 = vpop.f32.mrb[13].mxu0  ;;  %v2683_v51 = vld [vmem:[%s10795_s5 + $0x8] sm:$0xff]  ;;  %s10797_s5 = sld [smem:[#allocation11_spill]] }
 0x81e   : > { %v2545_v54 = vpop.f32.mrb[14].mxu0 }
 0x81f   : > { %v2549_v55 = vadd.f32 %v2545_v54, %v2464_v52  ;;  %v7373_v56 = vpop.f32.mrb[15].mxu0 }
 0x821   : > { %v2555_v58 = vadd.f32 %v2553_v57, %v2549_v55 }
 0x823   : > { %v2559_v60 = vadd.f32 %v2557_v59, %v2555_v58 }
 0x825   : > { %v2560_v61 = vmax.f32 %v2559_v60, 0.0 }
 0x827   : > { %6875 = vmatmul.mubr.msk.f32.vlgmr.msra.gmra.mrb[16].mxu0 %vm2225_vm14, %v2560_v61 }
 0x8fa   : > { %v10016_v62 = vpop.f32.mrb[16].mxu0 }
 0x8fb   : > { %2716 = vrot.lane.b32.xlu1 %v10016_v62, %s9337_s10  ;;  %2713 = vrot.lane.b32.xlu0 %v10016_v62, %s9342_s16  ;;  %v2664_v63 = vpop.f32.mrb[17].mxu0  ;;  %s10796_s10 = sld [smem:[#allocation10_spill]]  ;;  %s10729_s16 = smov 116  }
 0x901   : > { %v2675_v34 = vld [vmem:[%s10796_s10 + $0x8] sm:$0xff] }
 0x96d   : > { %v2717_v2 = vpop.permute.xlu1 %2716  ;;  %v2714_v3 = vpop.permute.xlu0 %2713 }
 0x96e   : > { %2723 = vrot.lane.b32.xlu1 %v2717_v2, %s10793_s15  ;;  %v8817_v4 = vpack.i.bf16 %v2714_v3, %v10016_v62  ;;  %v8168_v17 = vpack.c.bf16 %v2714_v3, %v10016_v62 }
 0x970   : > { %8818 = vrot.lane.b32.xlu0 %v8817_v4, %s10793_s15 }
 0x972   : > { %2894 = vrot.lane.b32.xlu1 %v2717_v2, %s10792_s26 }
 0x974   : > { %8823 = vrot.lane.b32.xlu0 %v8817_v4, %s10792_s26 }
 0x976   : > { %2989 = vperm.xlu1 %8806, %v2673_v31  }
 0x978   : > { %2984 = vperm.xlu0 %8755, %v2672_v5   ;;  %v2680_v5 = vld [vmem:[%s10797_s5] sm:$0xff] }
 0x9e0   : > { %v2724_v10 = vpop.permute.xlu1 %2723 }
 0x9e2   : > { %v8819_v6 = vpop.permute.xlu0 %8818 }
 0x9e3   : > { %v8821_v7 = vunpack.i.h.bf16 %v8819_v6  ;;  %v8820_v8 = vunpack.i.l.bf16 %v8819_v6  ;;  %v2681_v6 = vld [vmem:[%s10797_s5 + $0x8] sm:$0xff]  ;;  %s10801_s5 = sld [smem:[#allocation17_spill]] }
 0x9e4   : > { %v2895_v26 = vpop.permute.xlu1 %2894 }
 0x9e5   : > { %v8164_v9 = vpack.c.bf16 %v8821_v7, %v8820_v8  ;;  %v2684_v7 = vld [vmem:[%s10798_s8] sm:$0xff]  ;;  %v2685_v8 = vld [vmem:[%s10798_s8 + $0x8] sm:$0xff]  ;;  %s10803_s8 = smov 122  }
 0x9e6   : > { %v8824_v11 = vpop.permute.xlu0 %8823 }
 0x9e7   : > { %8165 = vmatprep.subr.bf16.mxu1 %v8164_v9  ;;  %v8826_v19 = vunpack.i.h.bf16 %v8824_v11  ;;  %v8825_v20 = vunpack.i.l.bf16 %v8824_v11 }
 0x9e8   : > { %8167 = vmatpush3.bf16.msra.mxu1 %v8164_v9 }
 0x9e9   : > { %7378 = vmatprep.subr.mxu1 %v2724_v10  ;;  %v8172_v21 = vpack.c.bf16 %v8826_v19, %v8825_v20 }
 0x9ec   : > { %7379 = vmatpush3.msra.mxu1 %v2724_v10 }
 0x9ed   : > { %7381 = vmatmul.mubr.msk.f32.vlgmr.msra.gmra.mrb[6].mxu1 %vm1988_vm13, %v2669_v15  ;;  %8169 = vmatprep.subr.bf16.mxu1 %v8168_v17 }
 0x9ee   : > { %8171 = vmatpush3.bf16.msra.mxu1 %v8168_v17  ;;  %7389 = vmatprep.mubr.msk.f32.mxu1 %vm1988_vm13, %v2666_v18 }
 0x9ef   : > { %7387 = vmatprep.subr.mxu1 %v2717_v2 }
 0x9f2   : > { %7388 = vmatpush3.msra.mxu1 %v2717_v2 }
 0x9f3   : > { %8173 = vmatprep.subr.bf16.mxu1 %v8172_v21 }
 0x9f5   : > { %7390 = vmatmul.mubr.msk.f32.vlgmr.msra.gmra.mrb[6].mxu1 %vm1988_vm13, %v2667_v22  ;;  %v2990_v39 = vpop.permute.xlu1 %2989 }
 0x9f6   : > { %8175 = vmatpush3.bf16.msra.mxu1 %v8172_v21  ;;  %7398 = vmatprep.mubr.msk.f32.mxu1 %vm1988_vm13, %v2670_v23 }
 0x9f7   : > { %7396 = vmatprep.subr.mxu1 %v2895_v26  ;;  %v2985_v44 = vpop.permute.xlu0 %2984 }
 0x9fa   : > { %7397 = vmatpush3.msra.mxu1 %v2895_v26  ;;  %v2677_v26 = vld [vmem:[%s10796_s10 + $0x18] sm:$0xff] }
 0x9fb   : > { %8177 = vmatprep.subr.bf16.mxu1 %v8176_v27 }
 0x9fd   : > { %7399 = vmatmul.mubr.msk.f32.vlgmr.msra.gmra.mrb[6].mxu1 %vm1988_vm13, %v2671_v30 }
 0x9fe   : > { %8179 = vmatpush3.bf16.msra.mxu1 %v8176_v27  ;;  %v2674_v27 = vld [vmem:[%s10796_s10] sm:$0xff] }
 0x9ff   : > { %8181 = vmatprep.subr.bf16.mxu1 %v8180_v32 }
 0xa02   : > { %8183 = vmatpush3.bf16.msra.mxu1 %v8180_v32 }
 0xa03   : > { %8185 = vmatprep.subr.bf16.mxu1 %v8184_v13 }
 0xa06   : > { %8187 = vmatpush3.bf16.msra.mxu1 %v8184_v13 }
 0xa07   : > { %8189 = vmatprep.subr.bf16.mxu1 %v8188_v35 }
 0xa0a   : > { %8191 = vmatpush3.bf16.msra.mxu1 %v8188_v35  ;;  %v2678_v35 = vld [vmem:[%s10796_s10 + $0x20] sm:$0xff] }
 0xa0b   : > { %8193 = vmatprep.subr.bf16.mxu1 %v8192_v38 }
 0xa0e   : > { %8195 = vmatpush3.bf16.msra.mxu1 %v8192_v38 }
 0xa0f   : > { %8197 = vmatprep.subr.bf16.mxu1 %v8196_v12 }
 0xa12   : > { %8199 = vmatpush3.bf16.msra.mxu1 %v8196_v12 }
 0xa13   : > { %7425 = vmatprep.subr.msk.mxu1 %vm1791_vm10, %v2711_v43 }
 0xa16   : > { %7426 = vmatpush3.msk.msra.mxu1 %vm1791_vm10, %v2711_v43 }
 0xa17   : > { %7475 = vmatprep.subr.mxu1 %v10016_v62 }
 0xad0   : > { %v7400_v45 = vpop.f32.mrb[6].mxu1 }
 0xad1   : > { %v2993_v14 = vadd.f32 %v7400_v45, %v2990_v39  ;;  %v2971_v47 = vpop.f32.mrb[7].mxu1 }
 0xad2   : > { %v2992_v46 = vadd.f32 %v2985_v44, %v2971_v47  ;;  %v2679_v44 = vld [vmem:[%s10796_s10 + $0x28] sm:$0xff] }
 0xad3   : > { %v2995_v49 = vmax.f32 %v2993_v14, 0.0 }
 0xad4   : > { %v2994_v48 = vmax.f32 %v2992_v46, 0.0 }
 0xad6   : > { %7427 = vmatprep.mubr.msk.f32.mxu1 %vm2225_vm14, %v2994_v48 }
 0xad7   : > { %7428 = vmatmul.mubr.msk.f32.vlgmr.msra.gmra.mrb[8].mxu1 %vm2225_vm14, %v2995_v49 }
 0xad8   : > { %7476 = vmatpush3.msra.mxu1 %v10016_v62  ;;  %7477 = vmatprep.mubr.msk.f32.mxu1 %vm3388_vm15, %v2682_v50  ;;  %v2676_v62 = vld [vmem:[%s10796_s10 + $0x10] sm:$0xff]  ;;  %s10810_s10 = sld [smem:[#allocation25_spill]] }
 0xad9   : > { %7442 = vmatprep.mubr.msk.f32.mxu0 %vm3112_vm0, %v2676_v62 }
 0xadb   : > { %7478 = vmatmul.mubr.msk.f32.vlgmr.msra.gmra.mrb[10].mxu1 %vm3388_vm15, %v2683_v51 }
 0xbaa   : > { %v7429_v52 = vpop.f32.mrb[8].mxu1 }
 0xbab   : > { %v3071_v53 = vpop.f32.mrb[9].mxu1 }
 0xbac   : > { %v8832_v54 = vpack.i.bf16 %v7429_v52, %v3071_v53  ;;  %v8212_v55 = vpack.c.bf16 %v7429_v52, %v3071_v53 }
 0xbae   : > { %8833 = vrot.lane.b32.xlu1 %v8832_v54, %s10729_s16  ;;  %8828 = vrot.lane.b32.xlu0 %v8832_v54, %s10727_s3  ;;  %s10799_s3 = sld [smem:[#allocation16_spill]]  ;;  %v10077_v9 = vpop.f32.mrb[10].mxu1  ;;  %s10800_s16 = sld [smem:[#allocation14_spill]] }
 0xbaf   : > { %v3461_v10 = vpop.f32.mrb[11].mxu1 }
 0xbb2   : > { %8838 = vrot.lane.b32.xlu0 %v8832_v54, %s10793_s15 }
 0xbb4   : > { %v3568_v11 = vld [vmem:[%s10799_s3] sm:$0xff]  ;;  %v3569_v15 = vld [vmem:[%s10799_s3 + $0x8] sm:$0xff]  ;;  %v2688_v39 = vld [vmem:[%s10800_s16 + $0x10] sm:$0xff] }
 0xbb5   : > { %v8260_v17 = vpack.c.bf16 %v3569_v15, %v3568_v11  ;;  %v2686_v41 = vld [vmem:[%s10800_s16] sm:$0xff]  ;;  %v2687_v42 = vld [vmem:[%s10800_s16 + $0x8] sm:$0xff]  ;;  %v2689_v45 = vld [vmem:[%s10800_s16 + $0x18] sm:$0xff] }
 0xbb6   : > { %v8236_v43 = vpack.c.bf16 %v2687_v42, %v2686_v41  ;;  %v8240_v14 = vpack.c.bf16 %v2689_v45, %v2688_v39  ;;  %v2690_v47 = vld [vmem:[%s10800_s16 + $0x20] sm:$0xff]  ;;  %v2691_v46 = vld [vmem:[%s10800_s16 + $0x28] sm:$0xff]  ;;  %v2692_v49 = vld [vmem:[%s10800_s16 + $0x30] sm:$0xff] }
 0xbb7   : > { %8261 = vmatprep.subr.bf16.mxu1 %v8260_v17  ;;  %v8244_v48 = vpack.c.bf16 %v2691_v46, %v2690_v47  ;;  %v2693_v50 = vld [vmem:[%s10800_s16 + $0x38] sm:$0xff]  ;;  %v2694_v52 = vld [vmem:[%s10800_s16 + $0x40] sm:$0xff]  ;;  %v2695_v53 = vld [vmem:[%s10800_s16 + $0x48] sm:$0xff] }
 0xbb8   : > { %8263 = vmatpush3.bf16.msra.mxu1 %v8260_v17  ;;  %v8248_v51 = vpack.c.bf16 %v2693_v50, %v2692_v49  ;;  %v3572_v62 = vld [vmem:[%s10799_s3 + $0x20] sm:$0xf]  ;;  %v3665_v46 = vld [vmem:[%s10801_s5 + $0x38] sm:$0xff] }
 0xc20   : > { %v8834_v56 = vpop.permute.xlu1 %8833  ;;  %v8829_v57 = vpop.permute.xlu0 %8828 }
 0xc21   : > { %v8836_v58 = vunpack.i.h.bf16 %v8834_v56  ;;  %v8835_v59 = vunpack.i.l.bf16 %v8834_v56  ;;  %v8831_v60 = vunpack.i.h.bf16 %v8829_v57  ;;  %v8830_v61 = vunpack.i.l.bf16 %v8829_v57  ;;  %8848 = vrot.lane.b32.xlu0 %v8834_v56, %s10793_s15  ;;  %8843 = vrot.lane.b32.xlu1 %v8829_v57, %s10793_s15 }
 0xc23   : > { %v8216_v1 = vpack.c.bf16 %v8831_v60, %v8830_v61  ;;  %v8220_v2 = vpack.c.bf16 %v8836_v58, %v8835_v59  ;;  %v2698_v58 = vld [vmem:[%s10800_s16 + $0x60] sm:$0xf]  ;;  %v3570_v59 = vld [vmem:[%s10799_s3 + $0x10] sm:$0xff]  ;;  %v3571_v60 = vld [vmem:[%s10799_s3 + $0x18] sm:$0xff]  ;;  %s10802_s3 = smov 116  }
 0xc24   : > { %v8839_v63 = vpop.permute.xlu0 %8838  ;;  %v8264_v61 = vpack.c.bf16 %v3571_v60, %v3570_v59 }
 0xc25   : > { %v8841_v3 = vunpack.i.h.bf16 %v8839_v63  ;;  %v8840_v4 = vunpack.i.l.bf16 %v8839_v63  ;;  %8858 = vrot.lane.b32.xlu0 %v8829_v57, %s10792_s26  ;;  %8853 = vrot.lane.b32.xlu1 %v8832_v54, %s10792_s26  ;;  %v8252_v54 = vpack.c.bf16 %v2695_v53, %v2694_v52 }
 0xc26   : > { %8265 = vmatprep.subr.bf16.mxu1 %v8264_v61 }
 0xc27   : > { %v8200_v31 = vpack.c.bf16 %v8841_v3, %v8840_v4  ;;  %8267 = vmatpush3.bf16.msra.mxu1 %v8264_v61  ;;  %v3661_v61 = vld [vmem:[%s10801_s5 + $0x18] sm:$0xff] }
 0xc28   : > { %7517 = vmatprep.subr.msk.mxu1 %vm1791_vm10, %v3572_v62 }
 0xc29   : > { %8201 = vmatprep.subr.bf16.mxu0 %v8200_v31  ;;  %3378 = vperm.xlu0 %8755, %v2680_v5  }
 0xc2a   : > { %8203 = vmatpush3.bf16.msra.mxu0 %v8200_v31  ;;  %8863 = vrot.lane.b32.xlu1 %v8834_v56, %s10792_s26  ;;  %v2697_v56 = vld [vmem:[%s10800_s16 + $0x58] sm:$0xff] }
 0xc2b   : > { %7518 = vmatpush3.msk.msra.mxu1 %vm1791_vm10, %v3572_v62  ;;  %v3666_v62 = vld [vmem:[%s10801_s5 + $0x40] sm:$0xff] }
 0xc2d   : > { %3383 = vperm.xlu0 %8755, %v2681_v6  }
 0xc2e   : > { %3472 = vperm.xlu1 %8806, %v2684_v7  }
 0xc32   : > { %3477 = vperm.xlu1 %8806, %v2685_v8  }
 0xc93   : > { %v8849_v18 = vpop.permute.xlu0 %8848  ;;  %v8844_v19 = vpop.permute.xlu1 %8843 }
 0xc94   : > { %v8851_v20 = vunpack.i.h.bf16 %v8849_v18  ;;  %v8850_v21 = vunpack.i.l.bf16 %v8849_v18  ;;  %v8846_v22 = vunpack.i.h.bf16 %v8844_v19  ;;  %v8845_v23 = vunpack.i.l.bf16 %v8844_v19 }
 0xc96   : > { %v8204_v24 = vpack.c.bf16 %v8846_v22, %v8845_v23  ;;  %v8208_v25 = vpack.c.bf16 %v8851_v20, %v8850_v21 }
 0xc97   : > { %v8854_v28 = vpop.permute.xlu1 %8853  ;;  %v8859_v32 = vpop.permute.xlu0 %8858 }
 0xc98   : > { %8205 = vmatprep.subr.bf16.mxu0 %v8204_v24  ;;  %v8856_v29 = vunpack.i.h.bf16 %v8854_v28  ;;  %v8855_v30 = vunpack.i.l.bf16 %v8854_v28  ;;  %v8861_v0 = vunpack.i.h.bf16 %v8859_v32  ;;  %v8860_v40 = vunpack.i.l.bf16 %v8859_v32 }
 0xc99   : > { %8207 = vmatpush3.bf16.msra.mxu0 %v8204_v24 }
 0xc9a   : > { %8209 = vmatprep.subr.bf16.mxu0 %v8208_v25  ;;  %v8224_v13 = vpack.c.bf16 %v8856_v29, %v8855_v30  ;;  %v8228_v38 = vpack.c.bf16 %v8861_v0, %v8860_v40  ;;  %v3670_v0 = vld [vmem:[%s10804_s9] sm:$0xff]  ;;  %v3672_v40 = vld [vmem:[%s10804_s9 + $0x10] sm:$0xff] }
 0xc9c   : > { %v8864_v33 = vpop.permute.xlu1 %8863 }
 0xc9d   : > { %8211 = vmatpush3.bf16.msra.mxu0 %v8208_v25  ;;  %v8866_v36 = vunpack.i.h.bf16 %v8864_v33  ;;  %v8865_v37 = vunpack.i.l.bf16 %v8864_v33  ;;  %v3662_v25 = vld [vmem:[%s10801_s5 + $0x20] sm:$0xff]  ;;  %v3673_v33 = vld [vmem:[%s10804_s9 + $0x18] sm:$0xff] }
 0xc9e   : > { %8213 = vmatprep.subr.bf16.mxu0 %v8212_v55 }
 0xc9f   : > { %v8232_v12 = vpack.c.bf16 %v8866_v36, %v8865_v37 }
 0xca0   : > { %7443 = vmatmul.mubr.msk.f32.vlgmr.msra.gmra.mrb[18].mxu0 %vm3112_vm0, %v2677_v26 }
 0xca1   : > { %8215 = vmatpush3.bf16.msra.mxu0 %v8212_v55  ;;  %7457 = vmatprep.mubr.msk.f32.mxu0 %vm3112_vm0, %v2674_v27  ;;  %v2696_v55 = vld [vmem:[%s10800_s16 + $0x50] sm:$0xff] }
 0xca2   : > { %8217 = vmatprep.subr.bf16.mxu0 %v8216_v1  ;;  %v8256_v57 = vpack.c.bf16 %v2697_v56, %v2696_v55  ;;  %v3659_v56 = vld [vmem:[%s10801_s5 + $0x8] sm:$0xff] }
 0xca5   : > { %8219 = vmatpush3.bf16.msra.mxu0 %v8216_v1 }
 0xca6   : > { %8221 = vmatprep.subr.bf16.mxu0 %v8220_v2 }
 0xca8   : > { %v3379_v1 = vpop.permute.xlu0 %3378 }
 0xca9   : > { %8223 = vmatpush3.bf16.msra.mxu0 %v8220_v2 }
 0xcaa   : > { %8225 = vmatprep.subr.bf16.mxu0 %v8224_v13 }
 0xcac   : > { %7458 = vmatmul.mubr.msk.f32.vlgmr.msra.gmra.mrb[18].mxu0 %vm3112_vm0, %v2675_v34  ;;  %v3384_v3 = vpop.permute.xlu0 %3383 }
 0xcad   : > { %8227 = vmatpush3.bf16.msra.mxu0 %v8224_v13  ;;  %7472 = vmatprep.mubr.msk.f32.mxu0 %vm3112_vm0, %v2678_v35  ;;  %v3473_v63 = vpop.permute.xlu1 %3472  ;;  %v3671_v13 = vld [vmem:[%s10804_s9 + $0x8] sm:$0xff]  ;;  %s10806_s9 = sld [smem:[#allocation21_spill]] }
 0xcae   : > { %8229 = vmatprep.subr.bf16.mxu0 %v8228_v38  ;;  %v8598_v31 = vadd.f32 %v3473_v63, %v3379_v1  ;;  %v3667_v1 = vld [vmem:[%s10801_s5 + $0x48] sm:$0xff] }
 0xcb1   : > { %8231 = vmatpush3.bf16.msra.mxu0 %v8228_v38  ;;  %v3478_v2 = vpop.permute.xlu1 %3477 }
 0xcb2   : > { %8233 = vmatprep.subr.bf16.mxu0 %v8232_v12  ;;  %v8596_v4 = vadd.f32 %v3478_v2, %v3384_v3  ;;  %v3668_v2 = vld [vmem:[%s10801_s5 + $0x50] sm:$0xff]  ;;  %v3669_v3 = vld [vmem:[%s10801_s5 + $0x58] sm:$0xff] }
 0xcb5   : > { %8235 = vmatpush3.bf16.msra.mxu0 %v8232_v12 }
 0xcb6   : > { %8237 = vmatprep.subr.bf16.mxu0 %v8236_v43 }
 0xcb8   : > { %7473 = vmatmul.mubr.msk.f32.vlgmr.msra.gmra.mrb[18].mxu0 %vm3112_vm0, %v2679_v44  ;;  %v3663_v44 = vld [vmem:[%s10801_s5 + $0x28] sm:$0xff] }
 0xcb9   : > { %8239 = vmatpush3.bf16.msra.mxu0 %v8236_v43  ;;  %7506 = vmatprep.mubr.msk.f32.mxu0 %vm2225_vm14, %v3461_v10 }
 0xcba   : > { %8241 = vmatprep.subr.bf16.mxu0 %v8240_v14 }
 0xcbd   : > { %8243 = vmatpush3.bf16.msra.mxu0 %v8240_v14  ;;  %v3664_v14 = vld [vmem:[%s10801_s5 + $0x30] sm:$0xff] }
 0xcbe   : > { %8245 = vmatprep.subr.bf16.mxu0 %v8244_v48 }
 0xcc1   : > { %8247 = vmatpush3.bf16.msra.mxu0 %v8244_v48  ;;  %v3658_v48 = vld [vmem:[%s10801_s5] sm:$0xff] }
 0xcc2   : > { %8249 = vmatprep.subr.bf16.mxu0 %v8248_v51 }
 0xcc5   : > { %8251 = vmatpush3.bf16.msra.mxu0 %v8248_v51 }
 0xcc6   : > { %8253 = vmatprep.subr.bf16.mxu0 %v8252_v54 }
 0xcc9   : > { %8255 = vmatpush3.bf16.msra.mxu0 %v8252_v54 }
 0xcca   : > { %8257 = vmatprep.subr.bf16.mxu0 %v8256_v57 }
 0xccd   : > { %8259 = vmatpush3.bf16.msra.mxu0 %v8256_v57  ;;  %v3660_v57 = vld [vmem:[%s10801_s5 + $0x10] sm:$0xff]  ;;  %s10737_s5 = smov 120  }
 0xcce   : > { %7504 = vmatprep.subr.msk.mxu0 %vm1791_vm10, %v2698_v58 }
 0xcd1   : > { %7505 = vmatpush3.msk.msra.mxu0 %vm1791_vm10, %v2698_v58 }
 0xcd2   : > { %7507 = vmatmul.mubr.msk.f32.vlgmr.msra.gmra.mrb[18].mxu0 %vm2225_vm14, %v10077_v9 }
 0xda5   : > { %v7508_v5 = vpop.f32.mrb[18].mxu0 }
 0xda6   : > { %v8597_v6 = vadd.f32 %v8596_v4, %v7508_v5  ;;  %v3555_v7 = vpop.f32.mrb[19].mxu0 }
 0xda7   : > { %v8599_v8 = vadd.f32 %v8598_v31, %v3555_v7 }
 0xda8   : > { %v3567_v10 = vmax.f32 %v8597_v6, 0.0 }
 0xda9   : > { %v3566_v9 = vmax.f32 %v8599_v8, 0.0 }
 0xdab   : > { %7519 = vmatprep.mubr.msk.f32.mxu1 %vm3573_vm1, %v3566_v9 }
 0xdac   : > { %7520 = vmatmul.mubr.msk.f32.vlgmr.msra.gmra.mrb[12].mxu1 %vm3573_vm1, %v3567_v10 }
 0xdad   : > { %7534 = vmatprep.mubr.msk.f32.mxu1 %vm3112_vm0, %v3662_v25 }
 0xe7f   : > { %v7521_v11 = vpop.f32.mrb[12].mxu1 }
 0xe80   : > { %v3649_v15 = vpop.f32.mrb[13].mxu1 }
 0xe81   : > { %v8872_v17 = vpack.i.bf16 %v7521_v11, %v3649_v15  ;;  %v10116_v18 = vpack.c.bf16 %v7521_v11, %v3649_v15 }
 0xe83   : > { %8873 = vrot.lane.b32.xlu1 %v8872_v17, %s10802_s3  ;;  %8868 = vrot.lane.b32.xlu0 %v8872_v17, %s10803_s8  ;;  %s10805_s3 = sld [smem:[#allocation24_spill]] }
 0xe87   : > { %8878 = vrot.lane.b32.xlu0 %v8872_v17, %s10793_s15 }
 0xe89   : > { %v3703_v34 = vld [vmem:[%s10805_s3] sm:$0xff]  ;;  %v3704_v35 = vld [vmem:[%s10805_s3 + $0x8] sm:$0xff]  ;;  %v3705_v4 = vld [vmem:[%s10805_s3 + $0x10] sm:$0xff] }
 0xe8a   : > { %v8304_v36 = vpack.c.bf16 %v3704_v35, %v3703_v34  ;;  %v3706_v31 = vld [vmem:[%s10805_s3 + $0x18] sm:$0xff]  ;;  %v3707_v6 = vld [vmem:[%s10805_s3 + $0x20] sm:$0xf]  ;;  %s10739_s3 = smov 124  }
 0xe8b   : > { %v8308_v5 = vpack.c.bf16 %v3706_v31, %v3705_v4 }
 0xe8c   : > { %8305 = vmatprep.subr.bf16.mxu0 %v8304_v36 }
 0xe8d   : > { %8307 = vmatpush3.bf16.msra.mxu0 %v8304_v36 }
 0xe8e   : > { %8309 = vmatprep.subr.bf16.mxu0 %v8308_v5 }
 0xe91   : > { %8311 = vmatpush3.bf16.msra.mxu0 %v8308_v5 }
 0xe92   : > { %7584 = vmatprep.subr.msk.mxu0 %vm1791_vm10, %v3707_v6 }
 0xe95   : > { %7585 = vmatpush3.msk.msra.mxu0 %vm1791_vm10, %v3707_v6 }
 0xef5   : > { %v8874_v19 = vpop.permute.xlu1 %8873  ;;  %v8869_v20 = vpop.permute.xlu0 %8868 }
 0xef6   : > { %v8876_v21 = vunpack.i.h.bf16 %v8874_v19  ;;  %v8875_v22 = vunpack.i.l.bf16 %v8874_v19  ;;  %v8871_v23 = vunpack.i.h.bf16 %v8869_v20  ;;  %v8870_v24 = vunpack.i.l.bf16 %v8869_v20  ;;  %8888 = vrot.lane.b32.xlu0 %v8874_v19, %s10793_s15  ;;  %8883 = vrot.lane.b32.xlu1 %v8869_v20, %s10793_s15 }
 0xef8   : > { %v8284_v27 = vpack.c.bf16 %v8871_v23, %v8870_v24  ;;  %v8288_v28 = vpack.c.bf16 %v8876_v21, %v8875_v22 }
 0xef9   : > { %v8879_v26 = vpop.permute.xlu0 %8878 }
 0xefa   : > { %v8881_v29 = vunpack.i.h.bf16 %v8879_v26  ;;  %v8880_v30 = vunpack.i.l.bf16 %v8879_v26  ;;  %8898 = vrot.lane.b32.xlu0 %v8869_v20, %s10792_s26  ;;  %8893 = vrot.lane.b32.xlu1 %v8872_v17, %s10792_s26 }
 0xefc   : > { %v8268_v32 = vpack.c.bf16 %v8881_v29, %v8880_v30  ;;  %v3692_v29 = vld [vmem:[%s10806_s9 + $0x10] sm:$0xff]  ;;  %v3693_v30 = vld [vmem:[%s10806_s9 + $0x18] sm:$0xff] }
 0xefe   : > { %8269 = vmatprep.subr.bf16.mxu1 %v8268_v32  ;;  %4055 = vperm.xlu0 %8755, %v3670_v0  }
 0xeff   : > { %8271 = vmatpush3.bf16.msra.mxu1 %v8268_v32  ;;  %8903 = vrot.lane.b32.xlu1 %v8874_v19, %s10792_s26 }
 0xf02   : > { %4065 = vperm.xlu0 %8755, %v3672_v40  }
 0xf03   : > { %4060 = vperm.xlu1 %8806, %v3671_v13  }
 0xf07   : > { %4070 = vperm.xlu1 %8806, %v3673_v33  }
 0xf68   : > { %v8889_v37 = vpop.permute.xlu0 %8888  ;;  %v8884_v38 = vpop.permute.xlu1 %8883 }
 0xf69   : > { %v8891_v41 = vunpack.i.h.bf16 %v8889_v37  ;;  %v8890_v42 = vunpack.i.l.bf16 %v8889_v37  ;;  %v8886_v12 = vunpack.i.h.bf16 %v8884_v38  ;;  %v8885_v43 = vunpack.i.l.bf16 %v8884_v38 }
 0xf6b   : > { %v8272_v39 = vpack.c.bf16 %v8886_v12, %v8885_v43  ;;  %v8276_v45 = vpack.c.bf16 %v8891_v41, %v8890_v42 }
 0xf6c   : > { %v8894_v47 = vpop.permute.xlu1 %8893  ;;  %v8899_v51 = vpop.permute.xlu0 %8898 }
 0xf6d   : > { %8273 = vmatprep.subr.bf16.mxu1 %v8272_v39  ;;  %v8896_v49 = vunpack.i.h.bf16 %v8894_v47  ;;  %v8895_v50 = vunpack.i.l.bf16 %v8894_v47  ;;  %v8901_v52 = vunpack.i.h.bf16 %v8899_v51  ;;  %v8900_v53 = vunpack.i.l.bf16 %v8899_v51 }
 0xf6e   : > { %8275 = vmatpush3.bf16.msra.mxu1 %v8272_v39 }
 0xf6f   : > { %8277 = vmatprep.subr.bf16.mxu1 %v8276_v45  ;;  %v8292_v54 = vpack.c.bf16 %v8896_v49, %v8895_v50  ;;  %v8296_v60 = vpack.c.bf16 %v8901_v52, %v8900_v53 }
 0xf71   : > { %v8904_v55 = vpop.permute.xlu1 %8903 }
 0xf72   : > { %8279 = vmatpush3.bf16.msra.mxu1 %v8276_v45  ;;  %v8906_v58 = vunpack.i.h.bf16 %v8904_v55  ;;  %v8905_v59 = vunpack.i.l.bf16 %v8904_v55 }
 0xf73   : > { %8281 = vmatprep.subr.bf16.mxu1 %v10116_v18 }
 0xf74   : > { %v8300_v63 = vpack.c.bf16 %v8906_v58, %v8905_v59 }
 0xf75   : > { %7535 = vmatmul.mubr.msk.f32.vlgmr.msra.gmra.mrb[14].mxu1 %vm3112_vm0, %v3663_v44 }
 0xf76   : > { %8283 = vmatpush3.bf16.msra.mxu1 %v10116_v18  ;;  %7537 = vmatprep.mubr.msk.f32.mxu1 %vm3112_vm0, %v3664_v14 }
 0xf77   : > { %8285 = vmatprep.subr.bf16.mxu1 %v8284_v27 }
 0xf79   : > { %7538 = vmatmul.mubr.msk.f32.gmra.mrb[16].mxu1 %vm3112_vm0, %v3665_v46 }
 0xf7a   : > { %8287 = vmatpush3.bf16.msra.mxu1 %v8284_v27  ;;  %7552 = vmatprep.mubr.msk.f32.mxu1 %vm3112_vm0, %v3658_v48  ;;  %v3690_v27 = vld [vmem:[%s10806_s9] sm:$0xff] }
 0xf7b   : > { %8289 = vmatprep.subr.bf16.mxu1 %v8288_v28 }
 0xf7d   : > { %v4056_v8 = vpop.permute.xlu0 %4055 }
 0xf7e   : > { %8291 = vmatpush3.bf16.msra.mxu1 %v8288_v28  ;;  %v3691_v28 = vld [vmem:[%s10806_s9 + $0x8] sm:$0xff]  ;;  %s10807_s9 = sld [smem:[#allocation19_spill]] }
 0xf7f   : > { %8293 = vmatprep.subr.bf16.mxu1 %v8292_v54 }
 0xf81   : > { %7553 = vmatmul.mubr.msk.f32.vlgmr.msra.gmra.mrb[14].mxu1 %vm3112_vm0, %v3659_v56  ;;  %v4066_v20 = vpop.permute.xlu0 %4065 }
 0xf82   : > { %8295 = vmatpush3.bf16.msra.mxu1 %v8292_v54  ;;  %7555 = vmatprep.mubr.msk.f32.mxu1 %vm3112_vm0, %v3660_v57  ;;  %v4061_v7 = vpop.permute.xlu1 %4060 }
 0xf83   : > { %8297 = vmatprep.subr.bf16.mxu1 %v8296_v60 }
 0xf84   : > { %v3678_v57 = vld [vmem:[%s10807_s9 + $0x20] sm:$0xff] }
 0xf85   : > { %7556 = vmatmul.mubr.msk.f32.gmra.mrb[16].mxu1 %vm3112_vm0, %v3661_v61 }
 0xf86   : > { %8299 = vmatpush3.bf16.msra.mxu1 %v8296_v60  ;;  %7570 = vmatprep.mubr.msk.f32.mxu1 %vm3112_vm0, %v3666_v62  ;;  %v4071_v17 = vpop.permute.xlu1 %4070 }
 0xf87   : > { %8301 = vmatprep.subr.bf16.mxu1 %v8300_v63 }
 0xf8a   : > { %8303 = vmatpush3.bf16.msra.mxu1 %v8300_v63 }
 0xf8b   : > { %8385 = vmatprep.subr.bf16.mxu1 %v10116_v18 }
 0xf8d   : > { %7571 = vmatmul.mubr.msk.f32.vlgmr.msra.gmra.mrb[14].mxu1 %vm3112_vm0, %v3667_v1 }
 0xf8e   : > { %8387 = vmatpush3.bf16.msra.mxu1 %v10116_v18  ;;  %7573 = vmatprep.mubr.msk.f32.mxu1 %vm3112_vm0, %v3668_v2 }
 0xf91   : > { %7574 = vmatmul.mubr.msk.f32.gmra.mrb[16].mxu1 %vm3112_vm0, %v3669_v3 }
 0xf92   : > { %7686 = vmatprep.mubr.msk.f32.mxu1 %vm4601_vm2, %v3690_v27 }
 0xf95   : > { %7687 = vmatmul.mubr.msk.f32.vlgmr.msra.gmra.mrb[18].mxu1 %vm4601_vm2, %v3691_v28 }
 0xf96   : > { %7689 = vmatprep.mubr.msk.f32.mxu1 %vm4601_vm2, %v3692_v29 }
 0xf99   : > { %7690 = vmatmul.mubr.msk.f32.gmra.mrb[20].mxu1 %vm4601_vm2, %v3693_v30 }
0x1060   : > { %v7572_v9 = vpop.f32.mrb[14].mxu1 }
0x1061   : > { %v4074_v10 = vadd.f32 %v7572_v9, %v4061_v7  ;;  %v4030_v11 = vpop.f32.mrb[15].mxu1  ;;  %v4827_v9 = vld [vmem:[%s10810_s10] sm:$0xff] }
0x1062   : > { %v4073_v15 = vadd.f32 %v4056_v8, %v4030_v11 }
0x1063   : > { %v4078_v21 = vmax.f32 %v4074_v10, 0.0  ;;  %v4828_v10 = vld [vmem:[%s10810_s10 + $0x8] sm:$0xff] }
0x1064   : > { %v4077_v18 = vmax.f32 %v4073_v15, 0.0  ;;  %v7575_v19 = vpop.f32.mrb[16].mxu1  ;;  %v8396_v11 = vpack.c.bf16 %v4828_v10, %v4827_v9  ;;  %v3685_v9 = vld [vmem:[%s10807_s9 + $0x58] sm:$0xff] }
0x1065   : > { %v4076_v22 = vadd.f32 %v7575_v19, %v4071_v17  ;;  %v4040_v23 = vpop.f32.mrb[17].mxu1 }
0x1066   : > { %v4075_v24 = vadd.f32 %v4066_v20, %v4040_v23  ;;  %7586 = vmatprep.mubr.msk.f32.mxu0 %vm3573_vm1, %v4077_v18  ;;  %8397 = vmatprep.subr.bf16.mxu1 %v8396_v11 }
0x1067   : > { %7587 = vmatmul.mubr.msk.f32.vlgmr.msra.gmra.mrb[20].mxu0 %vm3573_vm1, %v4078_v21  ;;  %v4080_v26 = vmax.f32 %v4076_v22, 0.0  ;;  %8399 = vmatpush3.bf16.msra.mxu1 %v8396_v11 }
0x1068   : > { %v4079_v25 = vmax.f32 %v4075_v24, 0.0  ;;  %v10215_v5 = vpop.f32.mrb[18].mxu1 }
0x1069   : > { %v10217_v6 = vpop.f32.mrb[19].mxu1 }
0x106a   : > { %7589 = vmatprep.mubr.msk.f32.mxu0 %vm3573_vm1, %v4079_v25 }
0x106b   : > { %7590 = vmatmul.mubr.msk.f32.gmra.mrb[22].mxu0 %vm3573_vm1, %v4080_v26 }
0x106c   : > { %7616 = vmatprep.mubr.msk.f32.mxu0 %vm4245_vm3, %v3678_v57  ;;  %v10219_v7 = vpop.f32.mrb[20].mxu1 }
0x106d   : > { %v10221_v8 = vpop.f32.mrb[21].mxu1 }
0x113a   : > { %v7588_v32 = vpop.f32.mrb[20].mxu0 }
0x113b   : > { %v4162_v0 = vpop.f32.mrb[21].mxu0 }
0x113c   : > { %v8907_v40 = vpack.i.bf16 %v7588_v32, %v4162_v0  ;;  %v10177_v13 = vpack.c.bf16 %v7588_v32, %v4162_v0  ;;  %v3679_v0 = vld [vmem:[%s10807_s9 + $0x28] sm:$0xff] }
0x113e   : > { %8908 = vrot.lane.b32.xlu0 %v8907_v40, %s10739_s3  ;;  %v7591_v33 = vpop.f32.mrb[22].mxu0 }
0x113f   : > { %v4172_v34 = vpop.f32.mrb[23].mxu0 }
0x1140   : > { %v8912_v35 = vpack.i.bf16 %v7591_v33, %v4172_v34  ;;  %v10180_v36 = vpack.c.bf16 %v7591_v33, %v4172_v34  ;;  %v3681_v33 = vld [vmem:[%s10807_s9 + $0x38] sm:$0xff]  ;;  %v3674_v34 = vld [vmem:[%s10807_s9] sm:$0xff] }
0x1142   : > { %8918 = vrot.lane.b32.xlu0 %v8907_v40, %s10737_s5  ;;  %8913 = vrot.lane.b32.xlu1 %v8912_v35, %s10739_s3  ;;  %s10809_s3 = sld [smem:[#allocation22_spill]] }
0x1146   : > { %8928 = vrot.lane.b32.xlu0 %v8907_v40, %s10793_s15  ;;  %8923 = vrot.lane.b32.xlu1 %v8912_v35, %s10737_s5  ;;  %s10808_s5 = sld [smem:[#allocation20_spill]] }
0x1148   : > { %v3694_v63 = vld [vmem:[%s10809_s3] sm:$0xff]  ;;  %v3695_v2 = vld [vmem:[%s10809_s3 + $0x8] sm:$0xff]  ;;  %v3696_v4 = vld [vmem:[%s10809_s3 + $0x10] sm:$0xff] }
0x1149   : > { %v3697_v31 = vld [vmem:[%s10809_s3 + $0x18] sm:$0xff]  ;;  %s10811_s3 = sld [smem:[#allocation23_spill]] }
0x114a   : > { %8933 = vrot.lane.b32.xlu1 %v8912_v35, %s10793_s15 }
0x114c   : > { %v3686_v61 = vld [vmem:[%s10808_s5] sm:$0xff]  ;;  %v3687_v62 = vld [vmem:[%s10808_s5 + $0x8] sm:$0xff]  ;;  %v3688_v1 = vld [vmem:[%s10808_s5 + $0x10] sm:$0xff] }
0x114d   : > { %v3689_v3 = vld [vmem:[%s10808_s5 + $0x18] sm:$0xff]  ;;  %s10813_s5 = smov 120  }
0x114f   : > { %v3702_v10 = vld [vmem:[%s10811_s3 + $0x20] sm:$0xf] }
0x11b0   : > { %v8909_v37 = vpop.permute.xlu0 %8908 }
0x11b1   : > { %v8911_v38 = vunpack.i.h.bf16 %v8909_v37  ;;  %v8910_v41 = vunpack.i.l.bf16 %v8909_v37  ;;  %8938 = vrot.lane.b32.xlu0 %v8909_v37, %s10793_s15 }
0x11b3   : > { %v10187_v42 = vpack.c.bf16 %v8911_v38, %v8910_v41 }
0x11b4   : > { %v8919_v12 = vpop.permute.xlu0 %8918  ;;  %v8914_v43 = vpop.permute.xlu1 %8913 }
0x11b5   : > { %v8921_v39 = vunpack.i.h.bf16 %v8919_v12  ;;  %v8920_v45 = vunpack.i.l.bf16 %v8919_v12  ;;  %v8916_v44 = vunpack.i.h.bf16 %v8914_v43  ;;  %v8915_v14 = vunpack.i.l.bf16 %v8914_v43  ;;  %8948 = vrot.lane.b32.xlu0 %v8919_v12, %s10793_s15  ;;  %8943 = vrot.lane.b32.xlu1 %v8914_v43, %s10793_s15 }
0x11b7   : > { %v10190_v48 = vpack.c.bf16 %v8916_v44, %v8915_v14  ;;  %v10192_v49 = vpack.c.bf16 %v8921_v39, %v8920_v45  ;;  %v3676_v39 = vld [vmem:[%s10807_s9 + $0x10] sm:$0xff] }
0x11b8   : > { %v8929_v47 = vpop.permute.xlu0 %8928  ;;  %v8924_v46 = vpop.permute.xlu1 %8923 }
0x11b9   : > { %v8931_v50 = vunpack.i.h.bf16 %v8929_v47  ;;  %v8930_v51 = vunpack.i.l.bf16 %v8929_v47  ;;  %v8926_v52 = vunpack.i.h.bf16 %v8924_v46  ;;  %v8925_v53 = vunpack.i.l.bf16 %v8924_v46  ;;  %8958 = vrot.lane.b32.xlu0 %v8907_v40, %s10792_s26  ;;  %8953 = vrot.lane.b32.xlu1 %v8924_v46, %s10793_s15  ;;  %v3680_v40 = vld [vmem:[%s10807_s9 + $0x30] sm:$0xff] }
0x11bb   : > { %v8312_v54 = vpack.c.bf16 %v8931_v50, %v8930_v51  ;;  %v10196_v55 = vpack.c.bf16 %v8926_v52, %v8925_v53 }
0x11bc   : > { %v8934_v56 = vpop.permute.xlu1 %8933 }
0x11bd   : > { %v8936_v58 = vunpack.i.h.bf16 %v8934_v56  ;;  %v8935_v59 = vunpack.i.l.bf16 %v8934_v56  ;;  %8313 = vmatprep.subr.bf16.mxu0 %v8312_v54  ;;  %8968 = vrot.lane.b32.xlu0 %v8909_v37, %s10792_s26 }
0x11be   : > { %8315 = vmatpush3.bf16.msra.mxu0 %v8312_v54  ;;  %8963 = vrot.lane.b32.xlu1 %v8912_v35, %s10792_s26 }
0x11bf   : > { %v8316_v60 = vpack.c.bf16 %v8936_v58, %v8935_v59 }
0x11c1   : > { %8317 = vmatprep.subr.bf16.mxu0 %v8316_v60  ;;  %8978 = vrot.lane.b32.xlu0 %v8919_v12, %s10792_s26 }
0x11c2   : > { %8319 = vmatpush3.bf16.msra.mxu0 %v8316_v60  ;;  %8973 = vrot.lane.b32.xlu1 %v8914_v43, %s10792_s26  ;;  %v3675_v43 = vld [vmem:[%s10807_s9 + $0x8] sm:$0xff]  ;;  %v3698_v60 = vld [vmem:[%s10811_s3] sm:$0xff] }
0x11c5   : > { %4579 = vperm.xlu0 %8755, %v3686_v61   ;;  %v3699_v61 = vld [vmem:[%s10811_s3 + $0x8] sm:$0xff] }
0x11c6   : > { %8983 = vrot.lane.b32.xlu1 %v8924_v46, %s10792_s26  ;;  %v3677_v46 = vld [vmem:[%s10807_s9 + $0x18] sm:$0xff] }
0x11c9   : > { %4584 = vperm.xlu0 %8755, %v3687_v62  }
0x11ca   : > { %4701 = vperm.xlu1 %8806, %v3694_v63   ;;  %v8388_v63 = vpack.c.bf16 %v3699_v61, %v3698_v60 }
0x11cd   : > { %4589 = vperm.xlu0 %8755, %v3688_v1   ;;  %v3700_v1 = vld [vmem:[%s10811_s3 + $0x10] sm:$0xff] }
0x11ce   : > { %4706 = vperm.xlu1 %8806, %v3695_v2   ;;  %v3701_v2 = vld [vmem:[%s10811_s3 + $0x18] sm:$0xff]  ;;  %s10812_s3 = smov 124  }
0x11d1   : > { %4594 = vperm.xlu0 %8755, %v3689_v3   ;;  %v3683_v3 = vld [vmem:[%s10807_s9 + $0x48] sm:$0xff] }
0x11d2   : > { %4711 = vperm.xlu1 %8806, %v3696_v4   ;;  %v8392_v4 = vpack.c.bf16 %v3701_v2, %v3700_v1 }
0x11d6   : > { %4716 = vperm.xlu1 %8806, %v3697_v31   ;;  %v3684_v31 = vld [vmem:[%s10807_s9 + $0x50] sm:$0xff] }
0x1223   : > { %v8939_v15 = vpop.permute.xlu0 %8938 }
0x1224   : > { %v8941_v17 = vunpack.i.h.bf16 %v8939_v15  ;;  %v8940_v18 = vunpack.i.l.bf16 %v8939_v15 }
0x1226   : > { %v8320_v19 = vpack.c.bf16 %v8941_v17, %v8940_v18 }
0x1227   : > { %v8949_v20 = vpop.permute.xlu0 %8948  ;;  %v8944_v21 = vpop.permute.xlu1 %8943 }
0x1228   : > { %v8951_v22 = vunpack.i.h.bf16 %v8949_v20  ;;  %v8950_v23 = vunpack.i.l.bf16 %v8949_v20  ;;  %v8946_v24 = vunpack.i.h.bf16 %v8944_v21  ;;  %v8945_v25 = vunpack.i.l.bf16 %v8944_v21  ;;  %8321 = vmatprep.subr.bf16.mxu0 %v8320_v19 }
0x1229   : > { %8323 = vmatpush3.bf16.msra.mxu0 %v8320_v19 }
0x122a   : > { %v8324_v26 = vpack.c.bf16 %v8946_v24, %v8945_v25  ;;  %v8328_v27 = vpack.c.bf16 %v8951_v22, %v8950_v23 }
0x122b   : > { %v8954_v28 = vpop.permute.xlu1 %8953 }
0x122c   : > { %8325 = vmatprep.subr.bf16.mxu0 %v8324_v26  ;;  %v8956_v29 = vunpack.i.h.bf16 %v8954_v28  ;;  %v8955_v30 = vunpack.i.l.bf16 %v8954_v28 }
0x122d   : > { %8327 = vmatpush3.bf16.msra.mxu0 %v8324_v26 }
0x122e   : > { %8329 = vmatprep.subr.bf16.mxu0 %v8328_v27  ;;  %v8332_v32 = vpack.c.bf16 %v8956_v29, %v8955_v30 }
0x1230   : > { %v8964_v38 = vpop.permute.xlu1 %8963 }
0x1231   : > { %8331 = vmatpush3.bf16.msra.mxu0 %v8328_v27  ;;  %v8966_v41 = vunpack.i.h.bf16 %v8964_v38 }
0x1232   : > { %8333 = vmatprep.subr.bf16.mxu0 %v8332_v32 }
0x1234   : > { %v8974_v47 = vpop.permute.xlu1 %8973 }
0x1235   : > { %8335 = vmatpush3.bf16.msra.mxu0 %v8332_v32  ;;  %v8976_v50 = vunpack.i.h.bf16 %v8974_v47  ;;  %v8975_v51 = vunpack.i.l.bf16 %v8974_v47 }
0x1236   : > { %8337 = vmatprep.subr.bf16.mxu0 %v10177_v13 }
0x1238   : > { %7617 = vmatmul.mubr.msk.f32.vlgmr.msra.gmra.mrb[24].mxu0 %vm4245_vm3, %v3679_v0  ;;  %v8984_v56 = vpop.permute.xlu1 %8983 }
0x1239   : > { %8339 = vmatpush3.bf16.msra.mxu0 %v10177_v13  ;;  %7619 = vmatprep.mubr.msk.f32.mxu0 %vm4245_vm3, %v3680_v40  ;;  %v8959_v13 = vpop.permute.xlu0 %8958  ;;  %v8986_v58 = vunpack.i.h.bf16 %v8984_v56  ;;  %v8985_v59 = vunpack.i.l.bf16 %v8984_v56 }
0x123a   : > { %8341 = vmatprep.subr.bf16.mxu0 %v10180_v36  ;;  %v8961_v35 = vunpack.i.h.bf16 %v8959_v13  ;;  %v8960_v37 = vunpack.i.l.bf16 %v8959_v13 }
0x123b   : > { %v8380_v62 = vpack.c.bf16 %v8986_v58, %v8985_v59 }
0x123c   : > { %7620 = vmatmul.mubr.msk.f32.gmra.mrb[26].mxu0 %vm4245_vm3, %v3681_v33 }
0x123d   : > { %8343 = vmatpush3.bf16.msra.mxu0 %v10180_v36  ;;  %7646 = vmatprep.mubr.msk.f32.mxu0 %vm4245_vm3, %v3674_v34  ;;  %v8360_v36 = vpack.c.bf16 %v8961_v35, %v8960_v37  ;;  %v8969_v12 = vpop.permute.xlu0 %8968 }
0x123e   : > { %8345 = vmatprep.subr.bf16.mxu0 %v10187_v42  ;;  %v8971_v45 = vunpack.i.h.bf16 %v8969_v12  ;;  %v8970_v44 = vunpack.i.l.bf16 %v8969_v12 }
0x1241   : > { %8347 = vmatpush3.bf16.msra.mxu0 %v10187_v42  ;;  %v8965_v42 = vunpack.i.l.bf16 %v8964_v38  ;;  %v8979_v52 = vpop.permute.xlu0 %8978 }
0x1242   : > { %8349 = vmatprep.subr.bf16.mxu0 %v10190_v48  ;;  %v8981_v53 = vunpack.i.h.bf16 %v8979_v52  ;;  %v8980_v54 = vunpack.i.l.bf16 %v8979_v52 }
0x1243   : > { %v8364_v14 = vpack.c.bf16 %v8966_v41, %v8965_v42 }
0x1244   : > { %v8376_v57 = vpack.c.bf16 %v8981_v53, %v8980_v54 }
0x1245   : > { %8351 = vmatpush3.bf16.msra.mxu0 %v10190_v48  ;;  %v3682_v48 = vld [vmem:[%s10807_s9 + $0x40] sm:$0xff]  ;;  %v4580_v15 = vpop.permute.xlu0 %4579  ;;  %s10814_s9 = sld [smem:[#allocation26_spill]] }
0x1246   : > { %8353 = vmatprep.subr.bf16.mxu0 %v10192_v49 }
0x1249   : > { %8355 = vmatpush3.bf16.msra.mxu0 %v10192_v49  ;;  %v8368_v49 = vpack.c.bf16 %v8971_v45, %v8970_v44  ;;  %v4702_v11 = vpop.permute.xlu1 %4701  ;;  %v4585_v18 = vpop.permute.xlu0 %4584 }
0x124a   : > { %8357 = vmatprep.subr.bf16.mxu0 %v10196_v55  ;;  %v8602_v21 = vadd.f32 %v4702_v11, %v4580_v15 }
0x124b   : > { %v4934_v61 = vld [vmem:[%s10814_s9 + $0x40] sm:$0xff] }
0x124d   : > { %8359 = vmatpush3.bf16.msra.mxu0 %v10196_v55  ;;  %v8372_v55 = vpack.c.bf16 %v8976_v50, %v8975_v51  ;;  %v4707_v17 = vpop.permute.xlu1 %4706  ;;  %v4590_v20 = vpop.permute.xlu0 %4589 }
0x124e   : > { %8361 = vmatprep.subr.bf16.mxu0 %v8360_v36 }
0x1250   : > { %7647 = vmatmul.mubr.msk.f32.vlgmr.msra.gmra.mrb[24].mxu0 %vm4245_vm3, %v3675_v43 }
0x1251   : > { %8363 = vmatpush3.bf16.msra.mxu0 %v8360_v36  ;;  %7649 = vmatprep.mubr.msk.f32.mxu0 %vm4245_vm3, %v3676_v39  ;;  %v4712_v19 = vpop.permute.xlu1 %4711  ;;  %v4595_v26 = vpop.permute.xlu0 %4594 }
0x1252   : > { %8365 = vmatprep.subr.bf16.mxu0 %v8364_v14  ;;  %v8606_v28 = vadd.f32 %v4712_v19, %v4590_v20 }
0x1254   : > { %7650 = vmatmul.mubr.msk.f32.gmra.mrb[26].mxu0 %vm4245_vm3, %v3677_v46 }
0x1255   : > { %8367 = vmatpush3.bf16.msra.mxu0 %v8364_v14  ;;  %7676 = vmatprep.mubr.msk.f32.mxu0 %vm4245_vm3, %v3682_v48  ;;  %v4717_v22 = vpop.permute.xlu1 %4716 }
0x1256   : > { %8369 = vmatprep.subr.bf16.mxu0 %v8368_v49  ;;  %v8604_v27 = vadd.f32 %v4717_v22, %v4595_v26 }
0x1259   : > { %8371 = vmatpush3.bf16.msra.mxu0 %v8368_v49 }
0x125a   : > { %8373 = vmatprep.subr.bf16.mxu0 %v8372_v55 }
0x125d   : > { %8375 = vmatpush3.bf16.msra.mxu0 %v8372_v55 }
0x125e   : > { %8377 = vmatprep.subr.bf16.mxu0 %v8376_v57 }
0x1261   : > { %8379 = vmatpush3.bf16.msra.mxu0 %v8376_v57 }
0x1262   : > { %8381 = vmatprep.subr.bf16.mxu0 %v8380_v62 }
0x1265   : > { %8383 = vmatpush3.bf16.msra.mxu0 %v8380_v62 }
0x1266   : > { %8389 = vmatprep.subr.bf16.mxu0 %v8388_v63 }
0x1268   : > { %7677 = vmatmul.mubr.msk.f32.vlgmr.msra.gmra.mrb[24].mxu0 %vm4245_vm3, %v3683_v3 }
0x1269   : > { %8391 = vmatpush3.bf16.msra.mxu0 %v8388_v63  ;;  %7679 = vmatprep.mubr.msk.f32.mxu0 %vm4245_vm3, %v3684_v31 }
0x126a   : > { %8393 = vmatprep.subr.bf16.mxu0 %v8392_v4 }
0x126c   : > { %7680 = vmatmul.mubr.msk.f32.gmra.mrb[26].mxu0 %vm4245_vm3, %v3685_v9 }
0x126d   : > { %8395 = vmatpush3.bf16.msra.mxu0 %v8392_v4  ;;  %7702 = vmatprep.mubr.msk.f32.mxu0 %vm3573_vm1, %v10217_v6  ;;  %v8600_v6 = vadd.f32 %v4707_v17, %v4585_v18 }
0x126e   : > { %7700 = vmatprep.subr.msk.mxu0 %vm1791_vm10, %v3702_v10 }
0x1271   : > { %7701 = vmatpush3.msk.msra.mxu0 %vm1791_vm10, %v3702_v10 }
0x1272   : > { %7703 = vmatmul.mubr.msk.f32.vlgmr.msra.gmra.mrb[24].mxu0 %vm3573_vm1, %v10215_v5 }
0x1273   : > { %7705 = vmatprep.mubr.msk.f32.mxu0 %vm3573_vm1, %v10221_v8 }
0x1276   : > { %7706 = vmatmul.mubr.msk.f32.gmra.mrb[26].mxu0 %vm3573_vm1, %v10219_v7 }
0x1345   : > { %v7704_v23 = vpop.f32.mrb[24].mxu0 }
0x1346   : > { %v8601_v24 = vadd.f32 %v8600_v6, %v7704_v23  ;;  %v4800_v25 = vpop.f32.mrb[25].mxu0 }
0x1347   : > { %v8603_v5 = vadd.f32 %v8602_v21, %v4800_v25 }
0x1348   : > { %v4824_v30 = vmax.f32 %v8601_v24, 0.0 }
0x1349   : > { %v4823_v8 = vmax.f32 %v8603_v5, 0.0  ;;  %v7707_v29 = vpop.f32.mrb[26].mxu0 }
0x134a   : > { %v8605_v7 = vadd.f32 %v8604_v27, %v7707_v29  ;;  %v4810_v32 = vpop.f32.mrb[27].mxu0 }
0x134b   : > { %v8607_v0 = vadd.f32 %v8606_v28, %v4810_v32  ;;  %7712 = vmatprep.mubr.msk.f32.mxu1 %vm4601_vm2, %v4823_v8 }
0x134c   : > { %7713 = vmatmul.mubr.msk.f32.vlgmr.msra.gmra.mrb[22].mxu1 %vm4601_vm2, %v4824_v30  ;;  %v4826_v33 = vmax.f32 %v8605_v7, 0.0 }
0x134d   : > { %v4825_v40 = vmax.f32 %v8607_v0, 0.0  ;;  %v4935_v0 = vld [vmem:[%s10814_s9 + $0x48] sm:$0xff] }
0x134f   : > { %7715 = vmatprep.mubr.msk.f32.mxu1 %vm4601_vm2, %v4825_v40  ;;  %v4936_v40 = vld [vmem:[%s10814_s9 + $0x50] sm:$0xff] }
0x1350   : > { %7716 = vmatmul.mubr.msk.f32.gmra.mrb[24].mxu1 %vm4601_vm2, %v4826_v33  ;;  %v4937_v33 = vld [vmem:[%s10814_s9 + $0x58] sm:$0xff] }
0x1351   : > { %7742 = vmatprep.mubr.msk.f32.mxu1 %vm4245_vm3, %v4934_v61 }
0x141f   : > { %v7714_v34 = vpop.f32.mrb[22].mxu1 }
0x1420   : > { %v4907_v13 = vpop.f32.mrb[23].mxu1 }
0x1421   : > { %v8987_v35 = vpack.i.bf16 %v7714_v34, %v4907_v13  ;;  %v10278_v37 = vpack.c.bf16 %v7714_v34, %v4907_v13  ;;  %v4938_v34 = vld [vmem:[%s10814_s9 + $0x60] sm:$0xff]  ;;  %v4939_v13 = vld [vmem:[%s10814_s9 + $0x68] sm:$0xff] }
0x1423   : > { %8988 = vrot.lane.b32.xlu0 %v8987_v35, %s10812_s3  ;;  %v7717_v38 = vpop.f32.mrb[24].mxu1 }
0x1424   : > { %v4917_v36 = vpop.f32.mrb[25].mxu1 }
0x1425   : > { %v8992_v41 = vpack.i.bf16 %v7717_v38, %v4917_v36  ;;  %v10281_v42 = vpack.c.bf16 %v7717_v38, %v4917_v36  ;;  %v4941_v38 = vld [vmem:[%s10814_s9 + $0x78] sm:$0xff]  ;;  %v4926_v36 = vld [vmem:[%s10814_s9] sm:$0xff] }
0x1427   : > { %8998 = vrot.lane.b32.xlu0 %v8987_v35, %s10813_s5  ;;  %8993 = vrot.lane.b32.xlu1 %v8992_v41, %s10812_s3  ;;  %s10816_s3 = sld [smem:[#allocation33_spill]] }
0x142b   : > { %9008 = vrot.lane.b32.xlu0 %v8987_v35, %s10793_s15  ;;  %9003 = vrot.lane.b32.xlu1 %v8992_v41, %s10813_s5  ;;  %s10815_s5 = sld [smem:[#allocation27_spill]] }
0x142d   : > { %v5032_v17 = vld [vmem:[%s10816_s3] sm:$0xff]  ;;  %v5033_v18 = vld [vmem:[%s10816_s3 + $0x8] sm:$0xff]  ;;  %s9349_s3 = smov 125  }
0x142e   : > { %v8472_v19 = vpack.c.bf16 %v5033_v18, %v5032_v17  ;;  %v4945_v17 = vld [vmem:[%s10814_s9 + $0x98] sm:$0xff]  ;;  %v4946_v18 = vld [vmem:[%s10814_s9 + $0xa0] sm:$0xff] }
0x142f   : > { %9013 = vrot.lane.b32.xlu1 %v8992_v41, %s10793_s15 }
0x1430   : > { %8473 = vmatprep.subr.bf16.mxu0 %v8472_v19 }
0x1431   : > { %v4950_v2 = vld [vmem:[%s10815_s5] sm:$0xff]  ;;  %v4952_v3 = vld [vmem:[%s10815_s5 + $0x10] sm:$0xff]  ;;  %v4951_v4 = vld [vmem:[%s10815_s5 + $0x8] sm:$0xff]  ;;  %8475 = vmatpush3.bf16.msra.mxu0 %v8472_v19 }
0x1432   : > { %v4954_v31 = vld [vmem:[%s10815_s5 + $0x20] sm:$0xff]  ;;  %v4953_v9 = vld [vmem:[%s10815_s5 + $0x18] sm:$0xff]  ;;  %v4956_v10 = vld [vmem:[%s10815_s5 + $0x30] sm:$0xff]  ;;  %8476 = vmatprep.subr.bf16.mxu0 %v9341_v16 }
0x1433   : > { %v4955_v11 = vld [vmem:[%s10815_s5 + $0x28] sm:$0xff]  ;;  %v4957_v15 = vld [vmem:[%s10815_s5 + $0x38] sm:$0xff]  ;;  %s10817_s5 = sld [smem:[#allocation28_spill]] }
0x1434   : > { %v4947_v19 = vld [vmem:[%s10814_s9 + $0xa8] sm:$0xff] }
0x1495   : > { %v8989_v12 = vpop.permute.xlu0 %8988 }
0x1496   : > { %v8991_v43 = vunpack.i.h.bf16 %v8989_v12  ;;  %v8990_v39 = vunpack.i.l.bf16 %v8989_v12  ;;  %9018 = vrot.lane.b32.xlu0 %v8989_v12, %s10793_s15 }
0x1498   : > { %v10288_v45 = vpack.c.bf16 %v8991_v43, %v8990_v39 }
0x1499   : > { %v8999_v44 = vpop.permute.xlu0 %8998  ;;  %v8994_v14 = vpop.permute.xlu1 %8993 }
0x149a   : > { %v9001_v47 = vunpack.i.h.bf16 %v8999_v44  ;;  %v9000_v46 = vunpack.i.l.bf16 %v8999_v44  ;;  %v8996_v48 = vunpack.i.h.bf16 %v8994_v14  ;;  %v8995_v49 = vunpack.i.l.bf16 %v8994_v14  ;;  %9028 = vrot.lane.b32.xlu0 %v8999_v44, %s10793_s15  ;;  %9023 = vrot.lane.b32.xlu1 %v8994_v14, %s10793_s15 }
0x149c   : > { %v10291_v52 = vpack.c.bf16 %v8996_v48, %v8995_v49  ;;  %v10293_v53 = vpack.c.bf16 %v9001_v47, %v9000_v46  ;;  %v4927_v46 = vld [vmem:[%s10814_s9 + $0x8] sm:$0xff]  ;;  %v4928_v48 = vld [vmem:[%s10814_s9 + $0x10] sm:$0xff] }
0x149d   : > { %v9009_v50 = vpop.permute.xlu0 %9008  ;;  %v9004_v51 = vpop.permute.xlu1 %9003 }
0x149e   : > { %v9011_v54 = vunpack.i.h.bf16 %v9009_v50  ;;  %v9010_v55 = vunpack.i.l.bf16 %v9009_v50  ;;  %v9006_v56 = vunpack.i.h.bf16 %v9004_v51  ;;  %v9005_v57 = vunpack.i.l.bf16 %v9004_v51  ;;  %9038 = vrot.lane.b32.xlu0 %v8987_v35, %s10792_s26  ;;  %9033 = vrot.lane.b32.xlu1 %v9004_v51, %s10793_s15  ;;  %v4940_v35 = vld [vmem:[%s10814_s9 + $0x70] sm:$0xff] }
0x14a0   : > { %v8400_v58 = vpack.c.bf16 %v9011_v54, %v9010_v55  ;;  %v10297_v59 = vpack.c.bf16 %v9006_v56, %v9005_v57  ;;  %v4930_v54 = vld [vmem:[%s10814_s9 + $0x20] sm:$0xff] }
0x14a1   : > { %v9014_v60 = vpop.permute.xlu1 %9013 }
0x14a2   : > { %v9016_v62 = vunpack.i.h.bf16 %v9014_v60  ;;  %v9015_v63 = vunpack.i.l.bf16 %v9014_v60  ;;  %8401 = vmatprep.subr.bf16.mxu1 %v8400_v58  ;;  %9048 = vrot.lane.b32.xlu0 %v8989_v12, %s10792_s26  ;;  %v4932_v60 = vld [vmem:[%s10814_s9 + $0x30] sm:$0xff] }
0x14a3   : > { %8403 = vmatpush3.bf16.msra.mxu1 %v8400_v58  ;;  %9043 = vrot.lane.b32.xlu1 %v8992_v41, %s10792_s26 }
0x14a4   : > { %v8404_v1 = vpack.c.bf16 %v9016_v62, %v9015_v63 }
0x14a6   : > { %8405 = vmatprep.subr.bf16.mxu1 %v8404_v1  ;;  %9058 = vrot.lane.b32.xlu0 %v8999_v44, %s10792_s26 }
0x14a7   : > { %8407 = vmatpush3.bf16.msra.mxu1 %v8404_v1  ;;  %9053 = vrot.lane.b32.xlu1 %v8994_v14, %s10792_s26 }
0x14aa   : > { %5531 = vperm.xlu0 %8755, %v4950_v2   ;;  %v4933_v2 = vld [vmem:[%s10814_s9 + $0x38] sm:$0xff] }
0x14ab   : > { %9063 = vrot.lane.b32.xlu1 %v9004_v51, %s10792_s26 }
0x14ae   : > { %5541 = vperm.xlu0 %8755, %v4952_v3   ;;  %v4942_v3 = vld [vmem:[%s10814_s9 + $0x80] sm:$0xff] }
0x14af   : > { %5536 = vperm.xlu1 %8806, %v4951_v4  }
0x14b2   : > { %5551 = vperm.xlu0 %8755, %v4954_v31  }
0x14b3   : > { %5546 = vperm.xlu1 %8806, %v4953_v9  }
0x14b6   : > { %5561 = vperm.xlu0 %8755, %v4956_v10  }
0x14b7   : > { %5556 = vperm.xlu1 %8806, %v4955_v11   ;;  %v4943_v11 = vld [vmem:[%s10814_s9 + $0x88] sm:$0xff] }
0x14bb   : > { %5566 = vperm.xlu1 %8806, %v4957_v15   ;;  %v4944_v15 = vld [vmem:[%s10814_s9 + $0x90] sm:$0xff] }
0x1508   : > { %v9019_v20 = vpop.permute.xlu0 %9018 }
0x1509   : > { %v9021_v6 = vunpack.i.h.bf16 %v9019_v20  ;;  %v9020_v21 = vunpack.i.l.bf16 %v9019_v20  ;;  %v4948_v20 = vld [vmem:[%s10814_s9 + $0xb0] sm:$0xff] }
0x150b   : > { %v8408_v22 = vpack.c.bf16 %v9021_v6, %v9020_v21  ;;  %v4949_v6 = vld [vmem:[%s10814_s9 + $0xb8] sm:$0xff] }
0x150c   : > { %v9029_v23 = vpop.permute.xlu0 %9028  ;;  %v9024_v24 = vpop.permute.xlu1 %9023 }
0x150d   : > { %v9031_v25 = vunpack.i.h.bf16 %v9029_v23  ;;  %v9030_v26 = vunpack.i.l.bf16 %v9029_v23  ;;  %v9026_v5 = vunpack.i.h.bf16 %v9024_v24  ;;  %v9025_v27 = vunpack.i.l.bf16 %v9024_v24  ;;  %8409 = vmatprep.subr.bf16.mxu1 %v8408_v22 }
0x150e   : > { %8411 = vmatpush3.bf16.msra.mxu1 %v8408_v22 }
0x150f   : > { %v8412_v28 = vpack.c.bf16 %v9026_v5, %v9025_v27  ;;  %v8416_v8 = vpack.c.bf16 %v9031_v25, %v9030_v26 }
0x1510   : > { %v9034_v29 = vpop.permute.xlu1 %9033  ;;  %v9039_v41 = vpop.permute.xlu0 %9038 }
0x1511   : > { %8413 = vmatprep.subr.bf16.mxu1 %v8412_v28  ;;  %v9036_v30 = vunpack.i.h.bf16 %v9034_v29  ;;  %v9035_v7 = vunpack.i.l.bf16 %v9034_v29  ;;  %v9041_v12 = vunpack.i.h.bf16 %v9039_v41  ;;  %v9040_v43 = vunpack.i.l.bf16 %v9039_v41 }
0x1512   : > { %8415 = vmatpush3.bf16.msra.mxu1 %v8412_v28 }
0x1513   : > { %8417 = vmatprep.subr.bf16.mxu1 %v8416_v8  ;;  %v8420_v32 = vpack.c.bf16 %v9036_v30, %v9035_v7 }
0x1514   : > { %v9049_v47 = vpop.permute.xlu0 %9048 }
0x1515   : > { %v9044_v39 = vpop.permute.xlu1 %9043  ;;  %v9051_v49 = vunpack.i.h.bf16 %v9049_v47  ;;  %v9050_v50 = vunpack.i.l.bf16 %v9049_v47 }
0x1516   : > { %8419 = vmatpush3.bf16.msra.mxu1 %v8416_v8  ;;  %v9046_v44 = vunpack.i.h.bf16 %v9044_v39  ;;  %v9045_v14 = vunpack.i.l.bf16 %v9044_v39 }
0x1517   : > { %8421 = vmatprep.subr.bf16.mxu1 %v8420_v32  ;;  %v8456_v55 = vpack.c.bf16 %v9051_v49, %v9050_v50 }
0x1518   : > { %v8452_v51 = vpack.c.bf16 %v9046_v44, %v9045_v14  ;;  %v9059_v58 = vpop.permute.xlu0 %9058 }
0x1519   : > { %v9061_v61 = vunpack.i.h.bf16 %v9059_v58  ;;  %v9060_v62 = vunpack.i.l.bf16 %v9059_v58 }
0x151a   : > { %8423 = vmatpush3.bf16.msra.mxu1 %v8420_v32 }
0x151b   : > { %8425 = vmatprep.subr.bf16.mxu1 %v10278_v37  ;;  %v8464_v4 = vpack.c.bf16 %v9061_v61, %v9060_v62 }
0x151d   : > { %7743 = vmatmul.mubr.msk.f32.vlgmr.msra.gmra.mrb[26].mxu1 %vm4245_vm3, %v4935_v0 }
0x151e   : > { %8427 = vmatpush3.bf16.msra.mxu1 %v10278_v37  ;;  %7745 = vmatprep.mubr.msk.f32.mxu1 %vm4245_vm3, %v4936_v40 }
0x151f   : > { %8429 = vmatprep.subr.bf16.mxu1 %v10281_v42 }
0x1521   : > { %7746 = vmatmul.mubr.msk.f32.gmra.mrb[28].mxu1 %vm4245_vm3, %v4937_v33 }
0x1522   : > { %8431 = vmatpush3.bf16.msra.mxu1 %v10281_v42  ;;  %7748 = vmatprep.mubr.msk.f32.mxu1 %vm4245_vm3, %v4938_v34 }
0x1523   : > { %8433 = vmatprep.subr.bf16.mxu1 %v10288_v45 }
0x1525   : > { %7749 = vmatmul.mubr.msk.f32.gmra.mrb[30].mxu1 %vm4245_vm3, %v4939_v13 }
0x1526   : > { %8435 = vmatpush3.bf16.msra.mxu1 %v10288_v45  ;;  %7751 = vmatprep.mubr.msk.f32.mxu1 %vm4245_vm3, %v4940_v35  ;;  %v8448_v45 = vpack.c.bf16 %v9041_v12, %v9040_v43 }
0x1527   : > { %8437 = vmatprep.subr.bf16.mxu1 %v10291_v52 }
0x1529   : > { %7752 = vmatmul.mubr.msk.f32.gmra.mrb[32].mxu1 %vm4245_vm3, %v4941_v38  ;;  %v5532_v22 = vpop.permute.xlu0 %5531 }
0x152a   : > { %8439 = vmatpush3.bf16.msra.mxu1 %v10291_v52  ;;  %7778 = vmatprep.mubr.msk.f32.mxu1 %vm4245_vm3, %v4926_v36  ;;  %v9054_v52 = vpop.permute.xlu1 %9053 }
0x152b   : > { %8441 = vmatprep.subr.bf16.mxu1 %v10293_v53  ;;  %v9056_v56 = vunpack.i.h.bf16 %v9054_v52  ;;  %v9055_v57 = vunpack.i.l.bf16 %v9054_v52 }
0x152d   : > { %v8460_v63 = vpack.c.bf16 %v9056_v56, %v9055_v57  ;;  %v5542_v25 = vpop.permute.xlu0 %5541 }
0x152e   : > { %8443 = vmatpush3.bf16.msra.mxu1 %v10293_v53  ;;  %v4929_v53 = vld [vmem:[%s10814_s9 + $0x18] sm:$0xff]  ;;  %v9064_v1 = vpop.permute.xlu1 %9063 }
0x152f   : > { %8445 = vmatprep.subr.bf16.mxu1 %v10297_v59  ;;  %v9066_v31 = vunpack.i.h.bf16 %v9064_v1  ;;  %v9065_v9 = vunpack.i.l.bf16 %v9064_v1 }
0x1531   : > { %v8468_v10 = vpack.c.bf16 %v9066_v31, %v9065_v9  ;;  %v5552_v40 = vpop.permute.xlu0 %5551 }
0x1532   : > { %8447 = vmatpush3.bf16.msra.mxu1 %v10297_v59  ;;  %v4931_v59 = vld [vmem:[%s10814_s9 + $0x28] sm:$0xff]  ;;  %v5537_v21 = vpop.permute.xlu1 %5536 }
0x1533   : > { %8449 = vmatprep.subr.bf16.mxu1 %v8448_v45 }
0x1535   : > { %7779 = vmatmul.mubr.msk.f32.vlgmr.msra.gmra.mrb[26].mxu1 %vm4245_vm3, %v4927_v46  ;;  %v5562_v39 = vpop.permute.xlu0 %5561 }
0x1536   : > { %8451 = vmatpush3.bf16.msra.mxu1 %v8448_v45  ;;  %7781 = vmatprep.mubr.msk.f32.mxu1 %vm4245_vm3, %v4928_v48  ;;  %v5547_v23 = vpop.permute.xlu1 %5546 }
0x1537   : > { %8453 = vmatprep.subr.bf16.mxu1 %v8452_v51 }
0x1539   : > { %7782 = vmatmul.mubr.msk.f32.gmra.mrb[28].mxu1 %vm4245_vm3, %v4929_v53 }
0x153a   : > { %8455 = vmatpush3.bf16.msra.mxu1 %v8452_v51  ;;  %7784 = vmatprep.mubr.msk.f32.mxu1 %vm4245_vm3, %v4930_v54  ;;  %v5557_v32 = vpop.permute.xlu1 %5556 }
0x153b   : > { %8457 = vmatprep.subr.bf16.mxu1 %v8456_v55 }
0x153d   : > { %7785 = vmatmul.mubr.msk.f32.gmra.mrb[30].mxu1 %vm4245_vm3, %v4931_v59 }
0x153e   : > { %8459 = vmatpush3.bf16.msra.mxu1 %v8456_v55  ;;  %7787 = vmatprep.mubr.msk.f32.mxu1 %vm4245_vm3, %v4932_v60  ;;  %v5567_v41 = vpop.permute.xlu1 %5566 }
0x153f   : > { %8461 = vmatprep.subr.bf16.mxu1 %v8460_v63 }
0x1541   : > { %7788 = vmatmul.mubr.msk.f32.gmra.mrb[32].mxu1 %vm4245_vm3, %v4933_v2  ;;  %v4959_v2 = vld [vmem:[%s10817_s5 + $0x8] sm:$0xff] }
0x1542   : > { %8463 = vmatpush3.bf16.msra.mxu1 %v8460_v63  ;;  %7814 = vmatprep.mubr.msk.f32.mxu1 %vm4245_vm3, %v4942_v3 }
0x1543   : > { %8465 = vmatprep.subr.bf16.mxu1 %v8464_v4 }
0x1546   : > { %8467 = vmatpush3.bf16.msra.mxu1 %v8464_v4 }
0x1547   : > { %8469 = vmatprep.subr.bf16.mxu1 %v8468_v10 }
0x154a   : > { %8471 = vmatpush3.bf16.msra.mxu1 %v8468_v10 }
0x154b   : > { %8512 = vmatprep.subr.bf16.mxu1 %v9341_v16 }
0x154d   : > { %7815 = vmatmul.mubr.msk.f32.vlgmr.msra.gmra.mrb[26].mxu1 %vm4245_vm3, %v4943_v11 }
0x154e   : > { %7817 = vmatprep.mubr.msk.f32.mxu1 %vm4245_vm3, %v4944_v15 }
0x1551   : > { %7818 = vmatmul.mubr.msk.f32.gmra.mrb[28].mxu1 %vm4245_vm3, %v4945_v17 }
0x1552   : > { %7820 = vmatprep.mubr.msk.f32.mxu1 %vm4245_vm3, %v4946_v18 }
0x1555   : > { %7821 = vmatmul.mubr.msk.f32.gmra.mrb[30].mxu1 %vm4245_vm3, %v4947_v19 }
0x1556   : > { %7823 = vmatprep.mubr.msk.f32.mxu1 %vm4245_vm3, %v4948_v20 }
0x1559   : > { %7824 = vmatmul.mubr.msk.f32.gmra.mrb[32].mxu1 %vm4245_vm3, %v4949_v6 }
0x155a   : > { %6981 = vmatprep.mubr.msk.f32.mxu1 %vm5842_vm4, %v4959_v2  ;;  %v4968_v2 = vld [vmem:[%s10817_s5 + $0x50] sm:$0xff] }
0x1620   : > { %v7816_v24 = vpop.f32.mrb[26].mxu1 }
0x1621   : > { %v5570_v26 = vadd.f32 %v7816_v24, %v5537_v21  ;;  %v5482_v5 = vpop.f32.mrb[27].mxu1 }
0x1622   : > { %v5569_v27 = vadd.f32 %v5532_v22, %v5482_v5 }
0x1623   : > { %v5578_v29 = vmax.f32 %v5570_v26, 0.0 }
0x1624   : > { %v5577_v28 = vmax.f32 %v5569_v27, 0.0  ;;  %v7819_v8 = vpop.f32.mrb[28].mxu1 }
0x1625   : > { %v5572_v30 = vadd.f32 %v7819_v8, %v5547_v23  ;;  %v5492_v7 = vpop.f32.mrb[29].mxu1 }
0x1626   : > { %v5571_v0 = vadd.f32 %v5542_v25, %v5492_v7  ;;  %7830 = vmatprep.mubr.msk.f32.mxu0 %vm4601_vm2, %v5577_v28 }
0x1627   : > { %7831 = vmatmul.mubr.msk.f32.vlgmr.msra.gmra.mrb[28].mxu0 %vm4601_vm2, %v5578_v29  ;;  %v5580_v13 = vmax.f32 %v5572_v30, 0.0 }
0x1628   : > { %v5579_v33 = vmax.f32 %v5571_v0, 0.0  ;;  %v7822_v34 = vpop.f32.mrb[30].mxu1 }
0x1629   : > { %v5574_v35 = vadd.f32 %v7822_v34, %v5557_v32  ;;  %v5502_v38 = vpop.f32.mrb[31].mxu1 }
0x162a   : > { %v5573_v36 = vadd.f32 %v5552_v40, %v5502_v38  ;;  %7833 = vmatprep.mubr.msk.f32.mxu0 %vm4601_vm2, %v5579_v33 }
0x162b   : > { %7834 = vmatmul.mubr.msk.f32.gmra.mrb[30].mxu0 %vm4601_vm2, %v5580_v13  ;;  %v5582_v45 = vmax.f32 %v5574_v35, 0.0 }
0x162c   : > { %v5581_v12 = vmax.f32 %v5573_v36, 0.0  ;;  %v7825_v43 = vpop.f32.mrb[32].mxu1 }
0x162d   : > { %v5576_v44 = vadd.f32 %v7825_v43, %v5567_v41  ;;  %v5512_v14 = vpop.f32.mrb[33].mxu1 }
0x162e   : > { %v5575_v47 = vadd.f32 %v5562_v39, %v5512_v14  ;;  %7836 = vmatprep.mubr.msk.f32.mxu0 %vm4601_vm2, %v5581_v12 }
0x162f   : > { %7837 = vmatmul.mubr.msk.f32.gmra.mrb[32].mxu0 %vm4601_vm2, %v5582_v45  ;;  %v5584_v48 = vmax.f32 %v5576_v44, 0.0 }
0x1630   : > { %v5583_v46 = vmax.f32 %v5575_v47, 0.0  ;;  %v4975_v47 = vld [vmem:[%s10817_s5 + $0x88] sm:$0xff] }
0x1632   : > { %7839 = vmatprep.mubr.msk.f32.mxu0 %vm4601_vm2, %v5583_v46 }
0x1633   : > { %7840 = vmatmul.mubr.msk.f32.gmra.mrb[34].mxu0 %vm4601_vm2, %v5584_v48 }
0x1634   : > { %6973 = vmatprep.mubr.msk.f32.mxu0 %vm5842_vm4, %v4975_v47 }
0x16fa   : > { %v7832_v49 = vpop.f32.mrb[28].mxu0 }
0x16fb   : > { %v5675_v50 = vpop.f32.mrb[29].mxu0 }
0x16fc   : > { %v10386_v51 = vpack.i.bf16 %v7832_v49, %v5675_v50  ;;  %v8513_v52 = vpack.c.bf16 %v7832_v49, %v5675_v50 }
0x16fe   : > { %9068 = vrot.lane.b32.xlu0 %v10386_v51, %s9349_s3  ;;  %v7835_v53 = vpop.f32.mrb[30].mxu0  ;;  %8514 = vmatpush1.bf16.msra.mxu1 %v8513_v52 }
0x16ff   : > { %v5685_v54 = vpop.f32.mrb[31].mxu0  ;;  %8515 = vmatprep.subr.bf16.mxu1 %v9341_v16 }
0x1700   : > { %v10390_v55 = vpack.i.bf16 %v7835_v53, %v5685_v54  ;;  %v8516_v56 = vpack.c.bf16 %v7835_v53, %v5685_v54  ;;  %v4958_v53 = vld [vmem:[%s10817_s5] sm:$0xff] }
0x1702   : > { %9073 = vrot.lane.b32.xlu1 %v10390_v55, %s9349_s3  ;;  %v7838_v57 = vpop.f32.mrb[32].mxu0  ;;  %8517 = vmatpush1.bf16.msra.mxu1 %v8516_v56  ;;  %v4960_v56 = vld [vmem:[%s10817_s5 + $0x10] sm:$0xff] }
0x1703   : > { %v5695_v58 = vpop.f32.mrb[33].mxu0  ;;  %8518 = vmatprep.subr.bf16.mxu1 %v9341_v16 }
0x1704   : > { %v10394_v59 = vpack.i.bf16 %v7838_v57, %v5695_v58  ;;  %v8519_v60 = vpack.c.bf16 %v7838_v57, %v5695_v58  ;;  %v4963_v57 = vld [vmem:[%s10817_s5 + $0x28] sm:$0xff]  ;;  %v4965_v58 = vld [vmem:[%s10817_s5 + $0x38] sm:$0xff] }
0x1706   : > { %9078 = vrot.lane.b32.xlu0 %v10394_v59, %s9349_s3  ;;  %v7841_v61 = vpop.f32.mrb[34].mxu0  ;;  %8520 = vmatpush1.bf16.msra.mxu1 %v8519_v60 }
0x1707   : > { %v5705_v62 = vpop.f32.mrb[35].mxu0  ;;  %8521 = vmatprep.subr.bf16.mxu1 %v9341_v16 }
0x1708   : > { %v10398_v63 = vpack.i.bf16 %v7841_v61, %v5705_v62  ;;  %v8522_v1 = vpack.c.bf16 %v7841_v61, %v5705_v62  ;;  %v4967_v61 = vld [vmem:[%s10817_s5 + $0x48] sm:$0xff] }
0x170a   : > { %9088 = vrot.lane.b32.xlu0 %v10386_v51, %s10803_s8  ;;  %9083 = vrot.lane.b32.xlu1 %v10398_v63, %s9349_s3  ;;  %s10821_s3 = sld [smem:[#allocation32_spill]] }
0x170b   : > { %8523 = vmatpush1.bf16.msra.mxu1 %v8522_v1  ;;  %v4969_v1 = vld [vmem:[%s10817_s5 + $0x58] sm:$0xff] }
0x170c   : > { %8524 = vmatprep.subr.bf16.mxu1 %v9341_v16 }
0x170e   : > { %9098 = vrot.lane.b32.xlu0 %v10394_v59, %s10803_s8  ;;  %9093 = vrot.lane.b32.xlu1 %v10390_v55, %s10803_s8 }
0x1712   : > { %9108 = vrot.lane.b32.xlu0 %v10386_v51, %s10793_s15  ;;  %9103 = vrot.lane.b32.xlu1 %v10398_v63, %s10803_s8  ;;  %s10818_s8 = sld [smem:[#allocation29_spill]] }
0x1716   : > { %9118 = vrot.lane.b32.xlu0 %v10394_v59, %s10793_s15  ;;  %9113 = vrot.lane.b32.xlu1 %v10390_v55, %s10793_s15 }
0x1718   : > { %v5006_v60 = vld [vmem:[%s10818_s8] sm:$0xff] }
0x171a   : > { %9123 = vrot.lane.b32.xlu1 %v10398_v63, %s10793_s15 }
0x1770   : > { %v10420_v3 = vpop.permute.xlu0 %9068 }
0x1771   : > { %v9071_v4 = vunpack.i.h.bf16 %v10420_v3  ;;  %v9070_v31 = vunpack.i.l.bf16 %v10420_v3  ;;  %9128 = vrot.lane.b32.xlu0 %v10420_v3, %s10793_s15 }
0x1773   : > { %v8525_v9 = vpack.c.bf16 %v9071_v4, %v9070_v31  ;;  %v4971_v31 = vld [vmem:[%s10817_s5 + $0x68] sm:$0xff] }
0x1774   : > { %v10424_v10 = vpop.permute.xlu1 %9073 }
0x1775   : > { %v9076_v11 = vunpack.i.h.bf16 %v10424_v10  ;;  %v9075_v15 = vunpack.i.l.bf16 %v10424_v10  ;;  %8526 = vmatpush1.bf16.msra.mxu1 %v8525_v9  ;;  %9133 = vrot.lane.b32.xlu1 %v10424_v10, %s10793_s15  ;;  %v4970_v9 = vld [vmem:[%s10817_s5 + $0x60] sm:$0xff] }
0x1776   : > { %8527 = vmatprep.subr.bf16.mxu1 %v9341_v16 }
0x1777   : > { %v8528_v17 = vpack.c.bf16 %v9076_v11, %v9075_v15  ;;  %v4973_v15 = vld [vmem:[%s10817_s5 + $0x78] sm:$0xff] }
0x1778   : > { %v10431_v18 = vpop.permute.xlu0 %9078 }
0x1779   : > { %v9081_v19 = vunpack.i.h.bf16 %v10431_v18  ;;  %v9080_v20 = vunpack.i.l.bf16 %v10431_v18  ;;  %8529 = vmatpush1.bf16.msra.mxu1 %v8528_v17  ;;  %9138 = vrot.lane.b32.xlu0 %v10431_v18, %s10793_s15  ;;  %v4972_v17 = vld [vmem:[%s10817_s5 + $0x70] sm:$0xff] }
0x177a   : > { %8530 = vmatprep.subr.bf16.mxu1 %v9341_v16 }
0x177b   : > { %v8531_v6 = vpack.c.bf16 %v9081_v19, %v9080_v20 }
0x177c   : > { %v10438_v21 = vpop.permute.xlu0 %9088  ;;  %v10440_v22 = vpop.permute.xlu1 %9083 }
0x177d   : > { %v9091_v23 = vunpack.i.h.bf16 %v10438_v21  ;;  %v9090_v24 = vunpack.i.l.bf16 %v10438_v21  ;;  %v9086_v25 = vunpack.i.h.bf16 %v10440_v22  ;;  %v9085_v26 = vunpack.i.l.bf16 %v10440_v22  ;;  %8532 = vmatpush1.bf16.msra.mxu1 %v8531_v6  ;;  %9148 = vrot.lane.b32.xlu0 %v10438_v21, %s10793_s15 }
0x177e   : > { %8533 = vmatprep.subr.bf16.mxu1 %v9341_v16  ;;  %9143 = vrot.lane.b32.xlu1 %v10440_v22, %s10793_s15 }
0x177f   : > { %v8534_v5 = vpack.c.bf16 %v9086_v25, %v9085_v26  ;;  %v8537_v32 = vpack.c.bf16 %v9091_v23, %v9090_v24  ;;  %v5012_v25 = vld [vmem:[%s10818_s8 + $0x30] sm:$0xff] }
0x1780   : > { %v10449_v27 = vpop.permute.xlu0 %9098  ;;  %v10451_v28 = vpop.permute.xlu1 %9093 }
0x1781   : > { %v9101_v8 = vunpack.i.h.bf16 %v10449_v27  ;;  %v9100_v29 = vunpack.i.l.bf16 %v10449_v27  ;;  %v9096_v30 = vunpack.i.h.bf16 %v10451_v28  ;;  %v9095_v7 = vunpack.i.l.bf16 %v10451_v28  ;;  %8535 = vmatpush1.bf16.msra.mxu1 %v8534_v5  ;;  %9158 = vrot.lane.b32.xlu0 %v10449_v27, %s10793_s15 }
0x1782   : > { %8536 = vmatprep.subr.bf16.mxu1 %v9341_v16  ;;  %9153 = vrot.lane.b32.xlu1 %v10451_v28, %s10793_s15 }
0x1783   : > { %v8540_v36 = vpack.c.bf16 %v9096_v30, %v9095_v7  ;;  %v8543_v46 = vpack.c.bf16 %v9101_v8, %v9100_v29 }
0x1784   : > { %v9109_v0 = vpop.permute.xlu0 %9108  ;;  %v10462_v40 = vpop.permute.xlu1 %9103 }
0x1785   : > { %v9111_v33 = vunpack.i.h.bf16 %v9109_v0  ;;  %v9110_v34 = vunpack.i.l.bf16 %v9109_v0  ;;  %v9106_v13 = vunpack.i.h.bf16 %v10462_v40  ;;  %v9105_v35 = vunpack.i.l.bf16 %v10462_v40  ;;  %8538 = vmatpush1.bf16.msra.mxu1 %v8537_v32  ;;  %9168 = vrot.lane.b32.xlu0 %v10386_v51, %s10792_s26 }
0x1786   : > { %8539 = vmatprep.subr.bf16.mxu1 %v9341_v16  ;;  %9163 = vrot.lane.b32.xlu1 %v10462_v40, %s10793_s15  ;;  %s10819_s15 = sld [smem:[#allocation31_spill]] }
0x1787   : > { %v8477_v38 = vpack.c.bf16 %v9111_v33, %v9110_v34  ;;  %v8546_v50 = vpack.c.bf16 %v9106_v13, %v9105_v35 }
0x1788   : > { %v9119_v41 = vpop.permute.xlu0 %9118  ;;  %v9114_v12 = vpop.permute.xlu1 %9113 }
0x1789   : > { %v9116_v43 = vunpack.i.h.bf16 %v9114_v12  ;;  %v9115_v39 = vunpack.i.l.bf16 %v9114_v12  ;;  %8478 = vmatpush1.bf16.msra.mxu0 %v8477_v38  ;;  %8541 = vmatpush1.bf16.msra.mxu1 %v8540_v36  ;;  %v9121_v45 = vunpack.i.h.bf16 %v9119_v41  ;;  %v9120_v44 = vunpack.i.l.bf16 %v9119_v41 }
0x178a   : > { %8479 = vmatprep.subr.bf16.mxu0 %v9341_v16  ;;  %8542 = vmatprep.subr.bf16.mxu1 %v9341_v16 }
0x178b   : > { %v8480_v14 = vpack.c.bf16 %v9116_v43, %v9115_v39  ;;  %9178 = vrot.lane.b32.xlu0 %v10394_v59, %s10792_s26  ;;  %9173 = vrot.lane.b32.xlu1 %v10390_v55, %s10792_s26  ;;  %v8483_v49 = vpack.c.bf16 %v9121_v45, %v9120_v44  ;;  %v4961_v55 = vld [vmem:[%s10817_s5 + $0x18] sm:$0xff]  ;;  %v4964_v59 = vld [vmem:[%s10817_s5 + $0x30] sm:$0xff] }
0x178c   : > { %v9124_v48 = vpop.permute.xlu1 %9123  ;;  %v5022_v62 = vld [vmem:[%s10819_s15] sm:$0xff]  ;;  %v5023_v4 = vld [vmem:[%s10819_s15 + $0x8] sm:$0xff]  ;;  %v5024_v11 = vld [vmem:[%s10819_s15 + $0x10] sm:$0xff] }
0x178d   : > { %8481 = vmatpush1.bf16.msra.mxu0 %v8480_v14  ;;  %8544 = vmatpush1.bf16.msra.mxu1 %v8543_v46  ;;  %v9126_v51 = vunpack.i.h.bf16 %v9124_v48  ;;  %v9125_v52 = vunpack.i.l.bf16 %v9124_v48  ;;  %v5025_v19 = vld [vmem:[%s10819_s15 + $0x18] sm:$0xff]  ;;  %v5027_v26 = vld [vmem:[%s10819_s15 + $0x28] sm:$0xff]  ;;  %v5028_v8 = vld [vmem:[%s10819_s15 + $0x30] sm:$0xff] }
0x178e   : > { %8482 = vmatprep.subr.bf16.mxu0 %v9341_v16  ;;  %8545 = vmatprep.subr.bf16.mxu1 %v9341_v16  ;;  %v5029_v7 = vld [vmem:[%s10819_s15 + $0x38] sm:$0xff] }
0x178f   : > { %9188 = vrot.lane.b32.xlu0 %v10420_v3, %s10792_s26  ;;  %9183 = vrot.lane.b32.xlu1 %v10398_v63, %s10792_s26  ;;  %v8486_v54 = vpack.c.bf16 %v9126_v51, %v9125_v52  ;;  %v5007_v63 = vld [vmem:[%s10818_s8 + $0x8] sm:$0xff]  ;;  %v5008_v3 = vld [vmem:[%s10818_s8 + $0x10] sm:$0xff] }
0x1790   : > { %v5031_v51 = vld [vmem:[%s10821_s3 + $0x8] sm:$0xff] }
0x1791   : > { %8484 = vmatpush1.bf16.msra.mxu0 %v8483_v49  ;;  %8547 = vmatpush1.bf16.msra.mxu1 %v8546_v50  ;;  %v5030_v50 = vld [vmem:[%s10821_s3] sm:$0xff]  ;;  %s1201_s3 = sand.u32 1, %s9281_s1  }
0x1792   : > { %8585 = vmatprep.subr.bf16.mxu1 %v10278_v37  ;;  %8485 = vmatprep.subr.bf16.mxu0 %v9341_v16  ;;  %v8592_v52 = vpack.c.bf16 %v5031_v51, %v5030_v50  ;;  %s6746_s10 = scalar_lea.sflag [#allocation3], %s1201_s3 }
0x1793   : > { %9198 = vrot.lane.b32.xlu0 %v10431_v18, %s10792_s26  ;;  %9193 = vrot.lane.b32.xlu1 %v10424_v10, %s10792_s26  ;;  %v5009_v10 = vld [vmem:[%s10818_s8 + $0x18] sm:$0xff]  ;;  %v5010_v18 = vld [vmem:[%s10818_s8 + $0x20] sm:$0xff] }
0x1794   : > { %6061 = vmatmul.mubr.f32.vlgmr.msra.gmra.mrb[34].mxu1 %v4958_v53 }
0x1795   : > { %8487 = vmatpush1.bf16.msra.mxu0 %v8486_v54  ;;  %8587 = vmatpush3.bf16.msra.mxu1 %v10278_v37  ;;  %v4962_v37 = vld [vmem:[%s10817_s5 + $0x20] sm:$0xff] }
0x1796   : > { %6982 = vmatprep.mubr.msk.f32.mxu1 %vm5842_vm4, %v4961_v55  ;;  %8589 = vmatprep.subr.bf16.mxu1 %v10281_v42 }
0x1797   : > { %8488 = vmatprep.subr.bf16.mxu0 %v9341_v16  ;;  %9208 = vrot.lane.b32.xlu0 %v10438_v21, %s10792_s26  ;;  %v5011_v21 = vld [vmem:[%s10818_s8 + $0x28] sm:$0xff] }
0x1798   : > { %6066 = vmatmul.mubr.f32.gmra.mrb[36].mxu1 %v4960_v56  ;;  %9203 = vrot.lane.b32.xlu1 %v10440_v22, %s10792_s26  ;;  %v5026_v22 = vld [vmem:[%s10819_s15 + $0x20] sm:$0xff] }
0x1799   : > { %6983 = vmatprep.mubr.msk.f32.mxu1 %vm5842_vm4, %v4963_v57  ;;  %8591 = vmatpush3.bf16.msra.mxu1 %v10281_v42  ;;  %v4966_v42 = vld [vmem:[%s10817_s5 + $0x40] sm:$0xff] }
0x179a   : > { %8593 = vmatprep.subr.bf16.mxu1 %v8592_v52 }
0x179b   : > { %9218 = vrot.lane.b32.xlu0 %v10449_v27, %s10792_s26 }
0x179c   : > { %6071 = vmatmul.mubr.f32.gmra.mrb[38].mxu1 %v4962_v37  ;;  %9213 = vrot.lane.b32.xlu1 %v10451_v28, %s10792_s26  ;;  %v5013_v28 = vld [vmem:[%s10818_s8 + $0x38] sm:$0xff] }
0x179d   : > { %6984 = vmatprep.mubr.msk.f32.mxu1 %vm5842_vm4, %v4965_v58 }
0x179f   : > { %6312 = vperm.xlu0 %8755, %v5006_v60  }
0x17a0   : > { %6076 = vmatmul.mubr.f32.gmra.mrb[40].mxu1 %v4964_v59  ;;  %9223 = vrot.lane.b32.xlu1 %v10462_v40, %s10792_s26  ;;  %s10820_s26 = sld [smem:[#allocation30_spill]] }
0x17a1   : > { %6985 = vmatprep.mubr.msk.f32.mxu1 %vm5842_vm4, %v4967_v61 }
0x17a3   : > { %6490 = vperm.xlu0 %8755, %v5022_v62  }
0x17a4   : > { %6081 = vmatmul.mubr.f32.gmra.mrb[42].mxu1 %v4966_v42  ;;  %6317 = vperm.xlu1 %8806, %v5007_v63  }
0x17a5   : > { %6986 = vmatprep.mubr.msk.f32.mxu1 %vm5842_vm4, %v4969_v1 }
0x17a6   : > { %v5014_v20 = vld [vmem:[%s10820_s26] sm:$0xff]  ;;  %v5015_v6 = vld [vmem:[%s10820_s26 + $0x8] sm:$0xff]  ;;  %v5016_v23 = vld [vmem:[%s10820_s26 + $0x10] sm:$0xff] }
0x17a7   : > { %6322 = vperm.xlu0 %8755, %v5008_v3   ;;  %v5017_v24 = vld [vmem:[%s10820_s26 + $0x18] sm:$0xff]  ;;  %v5018_v5 = vld [vmem:[%s10820_s26 + $0x20] sm:$0xff]  ;;  %v5019_v27 = vld [vmem:[%s10820_s26 + $0x28] sm:$0xff] }
0x17a8   : > { %6086 = vmatmul.mubr.f32.gmra.mrb[44].mxu1 %v4968_v2  ;;  %6495 = vperm.xlu1 %8806, %v5023_v4   ;;  %v5020_v29 = vld [vmem:[%s10820_s26 + $0x30] sm:$0xff]  ;;  %v5021_v30 = vld [vmem:[%s10820_s26 + $0x38] sm:$0xff]  ;;  %v4974_v4 = vld [vmem:[%s10817_s5 + $0x80] sm:$0xff] }
0x17a9   : > { %6987 = vmatprep.mubr.msk.f32.mxu1 %vm5842_vm4, %v4971_v31  ;;  %v4977_v31 = vld [vmem:[%s10817_s5 + $0x98] sm:$0xff] }
0x17ab   : > { %6327 = vperm.xlu0 %8755, %v5009_v10  }
0x17ac   : > { %6091 = vmatmul.mubr.f32.gmra.mrb[46].mxu1 %v4970_v9  ;;  %6500 = vperm.xlu1 %8806, %v5024_v11  }
0x17ad   : > { %6988 = vmatprep.mubr.msk.f32.mxu1 %vm5842_vm4, %v4973_v15 }
0x17af   : > { %6332 = vperm.xlu0 %8755, %v5010_v18   ;;  %v4979_v18 = vld [vmem:[%s10817_s5 + $0xa8] sm:$0xff] }
0x17b0   : > { %6096 = vmatmul.mubr.f32.gmra.mrb[48].mxu1 %v4972_v17  ;;  %6505 = vperm.xlu1 %8806, %v5025_v19   ;;  %v4976_v17 = vld [vmem:[%s10817_s5 + $0x90] sm:$0xff] }
0x17b1   : > { %7850 = vmatprep.mubr.msk.f32.mxu1 %vm6358_vm5, %v5014_v20 }
0x17b3   : > { %6337 = vperm.xlu0 %8755, %v5011_v21  }
0x17b4   : > { %7851 = vmatmul.mubr.msk.f32.vlgmr.msra.gmra.mrb[50].mxu1 %vm6358_vm5, %v5015_v6  ;;  %6510 = vperm.xlu1 %8806, %v5026_v22   ;;  %v4978_v22 = vld [vmem:[%s10817_s5 + $0xa0] sm:$0xff] }
0x17b5   : > { %7853 = vmatprep.mubr.msk.f32.mxu1 %vm6358_vm5, %v5016_v23  ;;  %8595 = vmatpush3.bf16.msra.mxu1 %v8592_v52  ;;  %v4981_v23 = vld [vmem:[%s10817_s5 + $0xb8] sm:$0xff] }
0x17b7   : > { %6342 = vperm.xlu0 %8755, %v5012_v25  }
0x17b8   : > { %7854 = vmatmul.mubr.msk.f32.gmra.mrb[52].mxu1 %vm6358_vm5, %v5017_v24  ;;  %6515 = vperm.xlu1 %8806, %v5027_v26  }
0x17b9   : > { %7856 = vmatprep.mubr.msk.f32.mxu1 %vm6358_vm5, %v5018_v5 }
0x17bb   : > { %6347 = vperm.xlu0 %8755, %v5013_v28   ;;  %v4983_v28 = vld [vmem:[%s10817_s5 + $0xc8] sm:$0xff] }
0x17bc   : > { %7857 = vmatmul.mubr.msk.f32.gmra.mrb[54].mxu1 %vm6358_vm5, %v5019_v27  ;;  %6520 = vperm.xlu1 %8806, %v5028_v8   ;;  %v4980_v27 = vld [vmem:[%s10817_s5 + $0xb0] sm:$0xff] }
0x17bd   : > { %7859 = vmatprep.mubr.msk.f32.mxu1 %vm6358_vm5, %v5020_v29 }
0x17c0   : > { %7860 = vmatmul.mubr.msk.f32.gmra.mrb[56].mxu1 %vm6358_vm5, %v5021_v30  ;;  %6525 = vperm.xlu1 %8806, %v5029_v7  }
0x17e3   : > { %v9129_v32 = vpop.permute.xlu0 %9128 }
0x17e4   : > { %v9131_v0 = vunpack.i.h.bf16 %v9129_v32  ;;  %v9130_v40 = vunpack.i.l.bf16 %v9129_v32  ;;  %v4982_v32 = vld [vmem:[%s10817_s5 + $0xc0] sm:$0xff] }
0x17e6   : > { %v8489_v33 = vpack.c.bf16 %v9131_v0, %v9130_v40  ;;  %v4985_v0 = vld [vmem:[%s10817_s5 + $0xd8] sm:$0xff] }
0x17e7   : > { %v9134_v34 = vpop.permute.xlu1 %9133 }
0x17e8   : > { %v9136_v13 = vunpack.i.h.bf16 %v9134_v34  ;;  %v9135_v35 = vunpack.i.l.bf16 %v9134_v34  ;;  %8490 = vmatpush1.bf16.msra.mxu0 %v8489_v33 }
0x17e9   : > { %8491 = vmatprep.subr.bf16.mxu0 %v9341_v16 }
0x17ea   : > { %v8492_v38 = vpack.c.bf16 %v9136_v13, %v9135_v35  ;;  %v4984_v35 = vld [vmem:[%s10817_s5 + $0xd0] sm:$0xff] }
0x17eb   : > { %v9139_v36 = vpop.permute.xlu0 %9138 }
0x17ec   : > { %v9141_v41 = vunpack.i.h.bf16 %v9139_v36  ;;  %v9140_v12 = vunpack.i.l.bf16 %v9139_v36  ;;  %8493 = vmatpush1.bf16.msra.mxu0 %v8492_v38  ;;  %v4987_v38 = vld [vmem:[%s10817_s5 + $0xe8] sm:$0xff] }
0x17ed   : > { %8494 = vmatprep.subr.bf16.mxu0 %v9341_v16 }
0x17ee   : > { %v8495_v43 = vpack.c.bf16 %v9141_v41, %v9140_v12 }
0x17ef   : > { %v9149_v39 = vpop.permute.xlu0 %9148 }
0x17f0   : > { %v9144_v45 = vpop.permute.xlu1 %9143  ;;  %8496 = vmatpush1.bf16.msra.mxu0 %v8495_v43  ;;  %v9151_v47 = vunpack.i.h.bf16 %v9149_v39  ;;  %v9150_v46 = vunpack.i.l.bf16 %v9149_v39  ;;  %v4986_v39 = vld [vmem:[%s10817_s5 + $0xe0] sm:$0xff] }
0x17f1   : > { %v9146_v44 = vunpack.i.h.bf16 %v9144_v45  ;;  %v9145_v14 = vunpack.i.l.bf16 %v9144_v45  ;;  %8497 = vmatprep.subr.bf16.mxu0 %v9341_v16  ;;  %v4989_v45 = vld [vmem:[%s10817_s5 + $0xf8] sm:$0xff] }
0x17f2   : > { %v8501_v53 = vpack.c.bf16 %v9151_v47, %v9150_v46 }
0x17f3   : > { %v8498_v48 = vpack.c.bf16 %v9146_v44, %v9145_v14  ;;  %v9159_v56 = vpop.permute.xlu0 %9158 }
0x17f4   : > { %v9154_v49 = vpop.permute.xlu1 %9153  ;;  %v9161_v57 = vunpack.i.h.bf16 %v9159_v56  ;;  %v9160_v37 = vunpack.i.l.bf16 %v9159_v56 }
0x17f5   : > { %8499 = vmatpush1.bf16.msra.mxu0 %v8498_v48  ;;  %v9156_v54 = vunpack.i.h.bf16 %v9154_v49  ;;  %v9155_v55 = vunpack.i.l.bf16 %v9154_v49  ;;  %v4988_v48 = vld [vmem:[%s10817_s5 + $0xf0] sm:$0xff]  ;;  %v4991_v49 = vld [vmem:[%s10817_s5 + $0x108] sm:$0xff] }
0x17f6   : > { %8500 = vmatprep.subr.bf16.mxu0 %v9341_v16  ;;  %v8507_v60 = vpack.c.bf16 %v9161_v57, %v9160_v37 }
0x17f7   : > { %v8504_v58 = vpack.c.bf16 %v9156_v54, %v9155_v55  ;;  %v9169_v62 = vpop.permute.xlu0 %9168 }
0x17f8   : > { %v9164_v59 = vpop.permute.xlu1 %9163  ;;  %v9171_v63 = vunpack.i.h.bf16 %v9169_v62  ;;  %v9170_v1 = vunpack.i.l.bf16 %v9169_v62 }
0x17f9   : > { %8502 = vmatpush1.bf16.msra.mxu0 %v8501_v53  ;;  %v9166_v61 = vunpack.i.h.bf16 %v9164_v59  ;;  %v9165_v42 = vunpack.i.l.bf16 %v9164_v59 }
0x17fa   : > { %8503 = vmatprep.subr.bf16.mxu0 %v9341_v16  ;;  %v8549_v9 = vpack.c.bf16 %v9171_v63, %v9170_v1  ;;  %v4990_v1 = vld [vmem:[%s10817_s5 + $0x100] sm:$0xff] }
0x17fb   : > { %v8510_v2 = vpack.c.bf16 %v9166_v61, %v9165_v42 }
0x17fd   : > { %8505 = vmatpush1.bf16.msra.mxu0 %v8504_v58  ;;  %v9174_v3 = vpop.permute.xlu1 %9173  ;;  %v9179_v15 = vpop.permute.xlu0 %9178 }
0x17fe   : > { %8506 = vmatprep.subr.bf16.mxu0 %v9341_v16  ;;  %v9176_v10 = vunpack.i.h.bf16 %v9174_v3  ;;  %v9175_v11 = vunpack.i.l.bf16 %v9174_v3  ;;  %v9181_v19 = vunpack.i.h.bf16 %v9179_v15  ;;  %v9180_v20 = vunpack.i.l.bf16 %v9179_v15  ;;  %v4992_v3 = vld [vmem:[%s10817_s5 + $0x110] sm:$0xff]  ;;  %v5001_v15 = vld [vmem:[%s10817_s5 + $0x158] sm:$0xff] }
0x1800   : > { %v8552_v6 = vpack.c.bf16 %v9176_v10, %v9175_v11  ;;  %v8555_v24 = vpack.c.bf16 %v9181_v19, %v9180_v20  ;;  %v4999_v10 = vld [vmem:[%s10817_s5 + $0x148] sm:$0xff]  ;;  %v4998_v11 = vld [vmem:[%s10817_s5 + $0x140] sm:$0xff]  ;;  %v5005_v20 = vld [vmem:[%s10817_s5 + $0x178] sm:$0xff] }
0x1801   : > { %8508 = vmatpush1.bf16.msra.mxu0 %v8507_v60  ;;  %v9184_v21 = vpop.permute.xlu1 %9183  ;;  %v9189_v5 = vpop.permute.xlu0 %9188  ;;  %v5002_v19 = vld [vmem:[%s10817_s5 + $0x160] sm:$0xff] }
0x1802   : > { %8509 = vmatprep.subr.bf16.mxu0 %v9341_v16  ;;  %v9186_v25 = vunpack.i.h.bf16 %v9184_v21  ;;  %v9185_v26 = vunpack.i.l.bf16 %v9184_v21  ;;  %v9191_v8 = vunpack.i.h.bf16 %v9189_v5  ;;  %v9190_v29 = vunpack.i.l.bf16 %v9189_v5 }
0x1804   : > { %v8558_v30 = vpack.c.bf16 %v9186_v25, %v9185_v26  ;;  %v8561_v40 = vpack.c.bf16 %v9191_v8, %v9190_v29 }
0x1805   : > { %8511 = vmatpush1.bf16.msra.mxu0 %v8510_v2  ;;  %v9194_v7 = vpop.permute.xlu1 %9193  ;;  %v9199_v13 = vpop.permute.xlu0 %9198  ;;  %v4993_v2 = vld [vmem:[%s10817_s5 + $0x118] sm:$0xff] }
0x1806   : > { %8548 = vmatprep.subr.bf16.mxu0 %v9341_v16  ;;  %v9196_v33 = vunpack.i.h.bf16 %v9194_v7  ;;  %v9195_v34 = vunpack.i.l.bf16 %v9194_v7  ;;  %v9201_v36 = vunpack.i.h.bf16 %v9199_v13  ;;  %v9200_v41 = vunpack.i.l.bf16 %v9199_v13 }
0x1808   : > { %5932 = vmatmul.mubr.f32.vlgmr.msra.gmra.mrb[36].mxu0 %v4974_v4  ;;  %v8564_v12 = vpack.c.bf16 %v9196_v33, %v9195_v34  ;;  %v8567_v44 = vpack.c.bf16 %v9201_v36, %v9200_v41  ;;  %v4995_v4 = vld [vmem:[%s10817_s5 + $0x128] sm:$0xff] }
0x1809   : > { %8550 = vmatpush1.bf16.msra.mxu0 %v8549_v9  ;;  %6974 = vmatprep.mubr.msk.f32.mxu0 %vm5842_vm4, %v4977_v31  ;;  %v9209_v46 = vpop.permute.xlu0 %9208  ;;  %v4994_v31 = vld [vmem:[%s10817_s5 + $0x120] sm:$0xff]  ;;  %v4996_v9 = vld [vmem:[%s10817_s5 + $0x130] sm:$0xff] }
0x180a   : > { %8551 = vmatprep.subr.bf16.mxu0 %v9341_v16  ;;  %v9204_v43 = vpop.permute.xlu1 %9203  ;;  %v9211_v50 = vunpack.i.h.bf16 %v9209_v46  ;;  %v9210_v51 = vunpack.i.l.bf16 %v9209_v46 }
0x180b   : > { %v9206_v14 = vunpack.i.h.bf16 %v9204_v43  ;;  %v9205_v47 = vunpack.i.l.bf16 %v9204_v43 }
0x180c   : > { %5937 = vmatmul.mubr.f32.gmra.mrb[38].mxu0 %v4976_v17  ;;  %v8573_v54 = vpack.c.bf16 %v9211_v50, %v9210_v51  ;;  %v5000_v17 = vld [vmem:[%s10817_s5 + $0x150] sm:$0xff] }
0x180d   : > { %8553 = vmatpush1.bf16.msra.mxu0 %v8552_v6  ;;  %6975 = vmatprep.mubr.msk.f32.mxu0 %vm5842_vm4, %v4979_v18  ;;  %v8570_v52 = vpack.c.bf16 %v9206_v14, %v9205_v47  ;;  %v9219_v57 = vpop.permute.xlu0 %9218  ;;  %v5003_v18 = vld [vmem:[%s10817_s5 + $0x168] sm:$0xff]  ;;  %v5004_v6 = vld [vmem:[%s10817_s5 + $0x170] sm:$0xff] }
0x180e   : > { %8554 = vmatprep.subr.bf16.mxu0 %v9341_v16  ;;  %v9214_v53 = vpop.permute.xlu1 %9213  ;;  %v9221_v37 = vunpack.i.h.bf16 %v9219_v57  ;;  %v9220_v58 = vunpack.i.l.bf16 %v9219_v57 }
0x180f   : > { %v9216_v55 = vunpack.i.h.bf16 %v9214_v53  ;;  %v9215_v56 = vunpack.i.l.bf16 %v9214_v53 }
0x1810   : > { %5942 = vmatmul.mubr.f32.gmra.mrb[40].mxu0 %v4978_v22  ;;  %v8579_v61 = vpack.c.bf16 %v9221_v37, %v9220_v58 }
0x1811   : > { %8556 = vmatpush1.bf16.msra.mxu0 %v8555_v24  ;;  %6976 = vmatprep.mubr.msk.f32.mxu0 %vm5842_vm4, %v4981_v23  ;;  %v8576_v59 = vpack.c.bf16 %v9216_v55, %v9215_v56 }
0x1812   : > { %8557 = vmatprep.subr.bf16.mxu0 %v9341_v16  ;;  %v9224_v60 = vpop.permute.xlu1 %9223 }
0x1813   : > { %v9226_v42 = vunpack.i.h.bf16 %v9224_v60  ;;  %v9225_v62 = vunpack.i.l.bf16 %v9224_v60 }
0x1814   : > { %5947 = vmatmul.mubr.f32.gmra.mrb[42].mxu0 %v4980_v27 }
0x1815   : > { %8559 = vmatpush1.bf16.msra.mxu0 %v8558_v30  ;;  %6977 = vmatprep.mubr.msk.f32.mxu0 %vm5842_vm4, %v4983_v28  ;;  %v8582_v63 = vpack.c.bf16 %v9226_v42, %v9225_v62 }
0x1816   : > { %8560 = vmatprep.subr.bf16.mxu0 %v9341_v16 }
0x1818   : > { %5952 = vmatmul.mubr.f32.gmra.mrb[44].mxu0 %v4982_v32 }
0x1819   : > { %8562 = vmatpush1.bf16.msra.mxu0 %v8561_v40  ;;  %6978 = vmatprep.mubr.msk.f32.mxu0 %vm5842_vm4, %v4985_v0 }
0x181a   : > { %8563 = vmatprep.subr.bf16.mxu0 %v9341_v16 }
0x181c   : > { %5957 = vmatmul.mubr.f32.gmra.mrb[46].mxu0 %v4984_v35 }
0x181d   : > { %8565 = vmatpush1.bf16.msra.mxu0 %v8564_v12  ;;  %6979 = vmatprep.mubr.msk.f32.mxu0 %vm5842_vm4, %v4987_v38 }
0x181e   : > { %8566 = vmatprep.subr.bf16.mxu0 %v9341_v16 }
0x1820   : > { %5962 = vmatmul.mubr.f32.gmra.mrb[48].mxu0 %v4986_v39 }
0x1821   : > { %8568 = vmatpush1.bf16.msra.mxu0 %v8567_v44  ;;  %6980 = vmatprep.mubr.msk.f32.mxu0 %vm5842_vm4, %v4989_v45 }
0x1822   : > { %8569 = vmatprep.subr.bf16.mxu0 %v9341_v16 }
0x1824   : > { %5967 = vmatmul.mubr.f32.gmra.mrb[50].mxu0 %v4988_v48 }
0x1825   : > { %8571 = vmatpush1.bf16.msra.mxu0 %v8570_v52  ;;  %6989 = vmatprep.mubr.msk.f32.mxu0 %vm5842_vm4, %v4991_v49 }
0x1826   : > { %8572 = vmatprep.subr.bf16.mxu0 %v9341_v16 }
0x1829   : > { %8574 = vmatpush1.bf16.msra.mxu0 %v8573_v54 }
0x182a   : > { %8575 = vmatprep.subr.bf16.mxu0 %v9341_v16 }
0x182d   : > { %8577 = vmatpush1.bf16.msra.mxu0 %v8576_v59 }
0x182e   : > { %8578 = vmatprep.subr.bf16.mxu0 %v9341_v16 }
0x1831   : > { %8580 = vmatpush1.bf16.msra.mxu0 %v8579_v61 }
0x1832   : > { %8581 = vmatprep.subr.bf16.mxu0 %v9341_v16  ;;  %v4997_v16 = vld [vmem:[%s10817_s5 + $0x138] sm:$0xff]  ;;  %s1202_s5 = scalar_lea.vmem [#allocation2], %s1201_s3 }
0x1833   : > { %s6758_s8 = sshll.u32 %s1202_s5, 4  ;;  %s10661_s8 = int_to_ptr.vmem [resolvable:$true] %s6758_s8 }
0x1834   : > { %s9227_s12 = scalar_lea.vmem %s10661_s8, 16 }
0x1835   : > { %8583 = vmatpush1.bf16.msra.mxu0 %v8582_v63  ;;  %p9228_p11 = scmp.ne.s32.totalorder %s10661_s8, %s9227_s12 }
0x1837   : > { %p9229_p12 = pnand %p9228_p11, %p9599_p5 }
0x1838   : > { %6262 = vmatmul.mubr.f32.vlgmr.msra.gmra.mrb[52].mxu0 %v4990_v1 }
0x1839   : > { %6990 = vmatprep.mubr.msk.f32.mxu0 %vm5842_vm4, %v4993_v2  ;;  %p9230_p13 = pneg %p9229_p12 }
0x183c   : > { %6267 = vmatmul.mubr.f32.gmra.mrb[54].mxu0 %v4992_v3 }
0x183d   : > { %6991 = vmatprep.mubr.msk.f32.mxu0 %vm5842_vm4, %v4995_v4 }
0x1840   : > { %6272 = vmatmul.mubr.f32.gmra.mrb[56].mxu0 %v4994_v31 }
0x1841   : > { %6992 = vmatprep.mubr.msk.f32.mxu0 %vm5842_vm4, %v4997_v16 }
0x1844   : > { %6277 = vmatmul.mubr.f32.gmra.mrb[58].mxu0 %v4996_v9 }
0x1845   : > { %6993 = vmatprep.mubr.msk.f32.mxu0 %vm5842_vm4, %v4999_v10 }
0x1848   : > { %6282 = vmatmul.mubr.f32.gmra.mrb[60].mxu0 %v4998_v11 }
0x1849   : > { %6994 = vmatprep.mubr.msk.f32.mxu0 %vm5842_vm4, %v5001_v15 }
0x184c   : > { %6287 = vmatmul.mubr.f32.gmra.mrb[62].mxu0 %v5000_v17 }
0x184d   : > { %6995 = vmatprep.mubr.msk.f32.mxu0 %vm5842_vm4, %v5003_v18 }
0x1850   : > { %6292 = vmatmul.mubr.f32.gmra.mrb[64].mxu0 %v5002_v19 }
0x1851   : > { %6996 = vmatprep.mubr.msk.f32.mxu0 %vm5842_vm4, %v5005_v20 }
0x1854   : > { %6297 = vmatmul.mubr.f32.gmra.mrb[66].mxu0 %v5004_v6 }
0x1867   : > { %v6062_v21 = vpop.f32.mrb[34].mxu1 }
0x1868   : > { %v6064_v22 = vpop.f32.mrb[35].mxu1 }
0x186b   : > { %v6067_v23 = vpop.f32.mrb[36].mxu1 }
0x186c   : > { %v6069_v24 = vpop.f32.mrb[37].mxu1 }
0x186f   : > { %v6072_v25 = vpop.f32.mrb[38].mxu1 }
0x1870   : > { %v6074_v26 = vpop.f32.mrb[39].mxu1 }
0x1873   : > { %v6077_v5 = vpop.f32.mrb[40].mxu1 }
0x1874   : > { %v6079_v27 = vpop.f32.mrb[41].mxu1 }
0x1877   : > { %v6082_v28 = vpop.f32.mrb[42].mxu1 }
0x1878   : > { %v6084_v8 = vpop.f32.mrb[43].mxu1 }
0x1879   : > { %v6318_v8 = vpop.permute.xlu1 %6317 }
0x187b   : > { %v6087_v29 = vpop.f32.mrb[44].mxu1 }
0x187c   : > { %v6089_v30 = vpop.f32.mrb[45].mxu1 }
0x187d   : > { %v6496_v30 = vpop.permute.xlu1 %6495 }
0x187f   : > { %v6092_v7 = vpop.f32.mrb[46].mxu1 }
0x1880   : > { %v6094_v32 = vpop.f32.mrb[47].mxu1 }
0x1881   : > { %v6501_v32 = vpop.permute.xlu1 %6500 }
0x1883   : > { %v6097_v0 = vpop.f32.mrb[48].mxu1 }
0x1884   : > { %v6099_v40 = vpop.f32.mrb[49].mxu1 }
0x1885   : > { %v6506_v40 = vpop.permute.xlu1 %6505 }
0x1887   : > { %v7852_v33 = vpop.f32.mrb[50].mxu1 }
0x1888   : > { %v6449_v34 = vpop.f32.mrb[51].mxu1 }
0x1889   : > { %7866 = vmatprep.mubr.msk.f32.mxu1 %vm4601_vm2, %v6449_v34  ;;  %v6511_v34 = vpop.permute.xlu1 %6510 }
0x188a   : > { %7867 = vmatmul.mubr.msk.f32.vlgmr.msra.gmra.mrb[58].mxu1 %vm4601_vm2, %v7852_v33 }
0x188b   : > { %v7855_v13 = vpop.f32.mrb[52].mxu1 }
0x188c   : > { %v6459_v35 = vpop.f32.mrb[53].mxu1 }
0x188d   : > { %7869 = vmatprep.mubr.msk.f32.mxu1 %vm4601_vm2, %v6459_v35  ;;  %v6516_v35 = vpop.permute.xlu1 %6515 }
0x188e   : > { %7870 = vmatmul.mubr.msk.f32.gmra.mrb[60].mxu1 %vm4601_vm2, %v7855_v13 }
0x188f   : > { %v7858_v38 = vpop.f32.mrb[54].mxu1 }
0x1890   : > { %v6469_v36 = vpop.f32.mrb[55].mxu1 }
0x1891   : > { %7872 = vmatprep.mubr.msk.f32.mxu1 %vm4601_vm2, %v6469_v36 }
0x1892   : > { %7873 = vmatmul.mubr.msk.f32.gmra.mrb[62].mxu1 %vm4601_vm2, %v7858_v38 }
0x1893   : > { %v7861_v41 = vpop.f32.mrb[56].mxu1 }
0x1894   : > { %v6479_v12 = vpop.f32.mrb[57].mxu1 }
0x1895   : > { %7875 = vmatprep.mubr.msk.f32.mxu1 %vm4601_vm2, %v6479_v12 }
0x1896   : > { %7876 = vmatmul.mubr.msk.f32.gmra.mrb[64].mxu1 %vm4601_vm2, %v7861_v41 }
0x18db   : > { %v5933_v43 = vpop.f32.mrb[36].mxu0 }
0x18dc   : > { %v6063_v39 = vadd.f32 %v6062_v21, %v5933_v43  ;;  %v5935_v45 = vpop.f32.mrb[37].mxu0 }
0x18df   : > { %v5938_v44 = vpop.f32.mrb[38].mxu0 }
0x18e0   : > { %v6068_v14 = vadd.f32 %v6067_v23, %v5938_v44  ;;  %v5940_v47 = vpop.f32.mrb[39].mxu0 }
0x18e1   : > { %v7013_v47 = vld [vmem:[%s10822_s4] ss:$0 sm:$0xff]  ;;  %s7014_s4 = sshll.u32 %s9582_s0, 4 }
0x18e2   : > { %s10659_s9 = scalar_lea.hbm %s9559_s27, %s7014_s4 }
0x18e3   : > { %v5943_v46 = vpop.f32.mrb[40].mxu0 }
0x18e4   : > { %v6073_v48 = vadd.f32 %v6072_v25, %v5943_v46  ;;  %v5945_v49 = vpop.f32.mrb[41].mxu0 }
0x18e7   : > { %v5948_v50 = vpop.f32.mrb[42].mxu0 }
0x18e8   : > { %v6078_v51 = vadd.f32 %v6077_v5, %v5948_v50  ;;  %v5950_v52 = vpop.f32.mrb[43].mxu0 }
0x18e9   : > { %v6521_v52 = vpop.permute.xlu1 %6520 }
0x18eb   : > { %v5953_v53 = vpop.f32.mrb[44].mxu0 }
0x18ec   : > { %v6083_v54 = vadd.f32 %v6082_v28, %v5953_v53  ;;  %v5955_v55 = vpop.f32.mrb[45].mxu0  ;;  %v6313_v28 = vpop.permute.xlu0 %6312 }
0x18ef   : > { %v5958_v56 = vpop.f32.mrb[46].mxu0 }
0x18f0   : > { %v6088_v57 = vadd.f32 %v6087_v29, %v5958_v56  ;;  %v5960_v37 = vpop.f32.mrb[47].mxu0  ;;  %v6491_v29 = vpop.permute.xlu0 %6490 }
0x18f3   : > { %v5963_v58 = vpop.f32.mrb[48].mxu0 }
0x18f4   : > { %v6093_v59 = vadd.f32 %v6092_v7, %v5963_v58  ;;  %v5965_v60 = vpop.f32.mrb[49].mxu0  ;;  %v6323_v7 = vpop.permute.xlu0 %6322 }
0x18f7   : > { %v5968_v61 = vpop.f32.mrb[50].mxu0 }
0x18f8   : > { %v6098_v42 = vadd.f32 %v6097_v0, %v5968_v61  ;;  %v5970_v62 = vpop.f32.mrb[51].mxu0  ;;  %v6328_v0 = vpop.permute.xlu0 %6327 }
0x18fc   : > { %v6333_v33 = vpop.permute.xlu0 %6332 }
0x1900   : > { %v6338_v13 = vpop.permute.xlu0 %6337 }
0x1904   : > { %v6343_v46 = vpop.permute.xlu0 %6342 }
0x190b   : > { %v6263_v63 = vpop.f32.mrb[52].mxu0 }
0x190c   : > { %v6302_v1 = vadd.f32 %v6263_v63, %v6063_v39  ;;  %v6265_v2 = vpop.f32.mrb[53].mxu0 }
0x190e   : > { %v6350_v43 = vadd.f32 %v6313_v28, %v6302_v1 }
0x190f   : > { %v6268_v3 = vpop.f32.mrb[54].mxu0 }
0x1910   : > { %v6303_v4 = vadd.f32 %v6268_v3, %v6068_v14  ;;  %v6270_v31 = vpop.f32.mrb[55].mxu0 }
0x1911   : > { %v6348_v31 = vpop.permute.xlu0 %6347 }
0x1912   : > { %v6351_v36 = vadd.f32 %v6318_v8, %v6303_v4 }
0x1913   : > { %v6273_v16 = vpop.f32.mrb[56].mxu0 }
0x1914   : > { %v6304_v9 = vadd.f32 %v6273_v16, %v6073_v48  ;;  %v6275_v10 = vpop.f32.mrb[57].mxu0 }
0x1916   : > { %v6352_v53 = vadd.f32 %v6323_v7, %v6304_v9  ;;  %v6526_v9 = vpop.permute.xlu1 %6525 }
0x1917   : > { %v6278_v11 = vpop.f32.mrb[58].mxu0 }
0x1918   : > { %v6305_v15 = vadd.f32 %v6278_v11, %v6078_v51  ;;  %v6280_v17 = vpop.f32.mrb[59].mxu0 }
0x191a   : > { %v6353_v48 = vadd.f32 %v6328_v0, %v6305_v15 }
0x191b   : > { %v6283_v18 = vpop.f32.mrb[60].mxu0 }
0x191c   : > { %v6306_v19 = vadd.f32 %v6283_v18, %v6083_v54  ;;  %v6285_v20 = vpop.f32.mrb[61].mxu0 }
0x191e   : > { %v6354_v1 = vadd.f32 %v6333_v33, %v6306_v19 }
0x191f   : > { %v6288_v6 = vpop.f32.mrb[62].mxu0 }
0x1920   : > { %v6307_v21 = vadd.f32 %v6288_v6, %v6088_v57  ;;  %v6290_v22 = vpop.f32.mrb[63].mxu0 }
0x1922   : > { %v6355_v60 = vadd.f32 %v6338_v13, %v6307_v21 }
0x1923   : > { %v6293_v23 = vpop.f32.mrb[64].mxu0 }
0x1924   : > { %v6308_v24 = vadd.f32 %v6293_v23, %v6093_v59  ;;  %v6295_v25 = vpop.f32.mrb[65].mxu0 }
0x1926   : > { %v6356_v17 = vadd.f32 %v6343_v46, %v6308_v24 }
0x1927   : > { %v6298_v26 = vpop.f32.mrb[66].mxu0 }
0x1928   : > { %v6309_v5 = vadd.f32 %v6298_v26, %v6098_v42  ;;  %v6300_v27 = vpop.f32.mrb[67].mxu0 }
0x192a   : > { %v6357_v18 = vadd.f32 %v6348_v31, %v6309_v5  ;;  %v6721_v31 = vld [vmem:[%s10823_s6] sm:$0x1]  ;;  %s9350_s6 = smov [#allocation2]  }
0x192b   : > { %s9231_s0 = sshll.u32 %s9350_s6, 4  ;;  %s9232_s0 = int_to_ptr.vmem [resolvable:$false] %s9231_s0 }
0x192c   : > { %s9233_s13 = scalar_lea.vmem %s9232_s0, 32  ;;  %p9234_p0 = scmp.lt.s32.totalorder %s10661_s8, %s9232_s0 }
0x192d   : > { %p9235_p1 = scmp.lt.s32.totalorder %s9233_s13, %s9227_s12 }
0x192f   : > { %p9236_p2 = por %p9235_p1, %p9234_p0 }
0x1931   : > { %p9237_p3 = pnand %p9236_p2, %p9230_p13 }
0x195d   : > { %v7868_v38 = vpop.f32.mrb[58].mxu1 }
0x195e   : > { %v6624_v41 = vadd.f32 %v7868_v38, %v6496_v30  ;;  %v6618_v12 = vpop.f32.mrb[59].mxu1 }
0x195f   : > { %v6619_v39 = vadd.f32 %v6618_v12, %v6491_v29 }
0x1960   : > { %v6658_v45 = vadd.f32 %v6624_v41, %v6351_v36  ;;  %v6715_v36 = vld [vmem:[%s9549_s20 + $0x10] sm:$0xff] }
0x1961   : > { %v6657_v44 = vadd.f32 %v6619_v39, %v6350_v43  ;;  %v7871_v14 = vpop.f32.mrb[60].mxu1 }
0x1962   : > { %v6666_v49 = vmax.f32 %v6658_v45, 0.0  ;;  %v6634_v50 = vadd.f32 %v7871_v14, %v6506_v40  ;;  %v6628_v51 = vpop.f32.mrb[61].mxu1  ;;  %v6716_v45 = vld [vmem:[%s9549_s20 + $0x18] sm:$0xff]  ;;  %v6717_v14 = vld [vmem:[%s9549_s20 + $0x20] sm:$0xff] }
0x1963   : > { %v6665_v54 = vmax.f32 %v6657_v44, 0.0  ;;  %v6629_v55 = vadd.f32 %v6628_v51, %v6501_v32 }
0x1964   : > { %v6660_v56 = vadd.f32 %v6634_v50, %v6353_v48  ;;  %v6681_v57 = vmul.f32 %v7013_v47, %v6666_v49  ;;  %v6718_v50 = vld [vmem:[%s9549_s20 + $0x28] sm:$0xff] }
0x1965   : > { %v6659_v37 = vadd.f32 %v6629_v55, %v6352_v53  ;;  %v7874_v58 = vpop.f32.mrb[62].mxu1  ;;  %v6680_v59 = vmul.f32 %v7013_v47, %v6665_v54  ;;  %v6719_v53 = vld [vmem:[%s9549_s20 + $0x30] sm:$0xff] }
0x1966   : > { %v6668_v61 = vmax.f32 %v6660_v56, 0.0  ;;  %v6644_v42 = vadd.f32 %v7874_v58, %v6516_v35  ;;  %v6638_v62 = vpop.f32.mrb[63].mxu1  ;;  %v6692_v63 = vsel %vm6688_vm6, %v6681_v57, 0.0  ;;  %v6713_v35 = vld [vmem:[%s9549_s20] sm:$0xff] }
0x1967   : > { %v6667_v2 = vmax.f32 %v6659_v37, 0.0  ;;  %v6639_v3 = vadd.f32 %v6638_v62, %v6511_v34  ;;  %6693 = vadd.xlane.f32.xlu1 %v6692_v63  ;;  %v6689_v4 = vsel %vm6688_vm6, %v6680_v59, 0.0  ;;  %v6714_v34 = vld [vmem:[%s9549_s20 + $0x8] sm:$0xff]  ;;  %v6720_v37 = vld [vmem:[%s9549_s20 + $0x38] sm:$0xff] }
0x1968   : > { %v6662_v16 = vadd.f32 %v6644_v42, %v6355_v60  ;;  %6690 = vadd.xlane.f32.xlu0 %v6689_v4  ;;  %v6683_v21 = vmul.f32 %v7013_v47, %v6668_v61 }
0x1969   : > { %v6661_v10 = vadd.f32 %v6639_v3, %v6354_v1  ;;  %v7877_v11 = vpop.f32.mrb[64].mxu1  ;;  %v6682_v15 = vmul.f32 %v7013_v47, %v6667_v2 }
0x196a   : > { %v6654_v20 = vadd.f32 %v7877_v11, %v6526_v9  ;;  %v6648_v6 = vpop.f32.mrb[65].mxu1  ;;  %v6670_v22 = vmax.f32 %v6662_v16, 0.0  ;;  %v6698_v8 = vsel %vm6688_vm6, %v6683_v21, 0.0 }
0x196b   : > { %v6669_v23 = vmax.f32 %v6661_v10, 0.0  ;;  %v6649_v19 = vadd.f32 %v6648_v6, %v6521_v52  ;;  %v6695_v25 = vsel %vm6688_vm6, %v6682_v15, 0.0 }
0x196c   : > { %v6664_v26 = vadd.f32 %v6654_v20, %v6357_v18  ;;  %6696 = vadd.xlane.f32.xlu0 %v6695_v25  ;;  %v6685_v5 = vmul.f32 %v7013_v47, %v6670_v22 }
0x196d   : > { %v6663_v27 = vadd.f32 %v6649_v19, %v6356_v17  ;;  %v6684_v28 = vmul.f32 %v7013_v47, %v6669_v23 }
0x196e   : > { %v6672_v29 = vmax.f32 %v6664_v26, 0.0  ;;  %v6704_v0 = vsel %vm6688_vm6, %v6685_v5, 0.0 }
0x196f   : > { %v6671_v30 = vmax.f32 %v6663_v27, 0.0  ;;  %v6701_v24 = vsel %vm6688_vm6, %v6684_v28, 0.0 }
0x1970   : > { %6702 = vadd.xlane.f32.xlu1 %v6701_v24  ;;  %6699 = vadd.xlane.f32.xlu0 %v6698_v8  ;;  %v6687_v40 = vmul.f32 %v7013_v47, %v6672_v29 }
0x1971   : > { %v6686_v7 = vmul.f32 %v7013_v47, %v6671_v30 }
0x1972   : > { %v6710_v33 = vsel %vm6688_vm6, %v6687_v40, 0.0 }
0x1973   : > { %v6707_v32 = vsel %vm6688_vm6, %v6686_v7, 0.0 }
0x1974   : > { %6708 = vadd.xlane.f32.xlu1 %v6707_v32  ;;  %6705 = vadd.xlane.f32.xlu0 %v6704_v0 }
0x1978   : > { %6711 = vadd.xlane.f32.xlu0 %v6710_v33 }
0x19f4   : > { %v6694_v13 = vpop.xlane.xlu1 %6693 }
0x19f5   : > { %v6691_v38 = vpop.xlane.xlu0 %6690  ;;  %v6723_v41 = vmul.f32 %v6714_v34, %v6694_v13 }
0x19f6   : > { %v6722_v12 = vmul.f32 %v6713_v35, %v6691_v38 }
0x19f8   : > { %v6730_v44 = vadd.f32 %v6723_v41, %v6722_v12 }
0x19f9   : > { %v6697_v43 = vpop.xlane.xlu0 %6696 }
0x19fa   : > { %v6724_v39 = vmul.f32 %v6715_v36, %v6697_v43 }
0x19fc   : > { %v6731_v48 = vadd.f32 %v6730_v44, %v6724_v39 }
0x19fd   : > { %v6703_v47 = vpop.xlane.xlu1 %6702  ;;  %v6700_v46 = vpop.xlane.xlu0 %6699 }
0x19fe   : > { %v6725_v49 = vmul.f32 %v6716_v45, %v6700_v46  ;;  %v6726_v51 = vmul.f32 %v6717_v14, %v6703_v47 }
0x1a00   : > { %v6732_v52 = vadd.f32 %v6731_v48, %v6725_v49 }
0x1a01   : > { %v6709_v54 = vpop.xlane.xlu1 %6708  ;;  %v6706_v55 = vpop.xlane.xlu0 %6705 }
0x1a02   : > { %v6733_v56 = vadd.f32 %v6732_v52, %v6726_v51  ;;  %v6727_v57 = vmul.f32 %v6718_v50, %v6706_v55  ;;  %v6728_v58 = vmul.f32 %v6719_v53, %v6709_v54 }
0x1a04   : > { %v6734_v59 = vadd.f32 %v6733_v56, %v6727_v57 }
0x1a05   : > { %v6712_v60 = vpop.xlane.xlu0 %6711 }
0x1a06   : > { %v6735_v61 = vadd.f32 %v6734_v59, %v6728_v58  ;;  %v6729_v42 = vmul.f32 %v6720_v37, %v6712_v60 }
0x1a08   : > { %v6736_v62 = vadd.f32 %v6735_v61, %v6729_v42 }
0x1a0a   : > { %v6737_v63 = vrot.slane %v6736_v62, 4 }
0x1a0c   : > { %v6738_v1 = vadd.f32 %v6737_v63, %v6736_v62 }
0x1a0e   : > { %v6739_v2 = vrot.slane %v6738_v1, 2 }
0x1a10   : > { %v6740_v3 = vadd.f32 %v6739_v2, %v6738_v1 }
0x1a12   : > { %v6741_v4 = vrot.slane %v6740_v3, 1 }
0x1a14   : > { %v6742_v16 = vadd.f32 %v6741_v4, %v6740_v3 }
0x1a16   : > { %v6743_v9 = vadd.f32 %v6742_v16, %v6721_v31 }
0x1a18   : > { %6744 = vst [vmem:[%s1202_s5] sm:$0x1] %v6743_v9 }
0x1a19   : > { %9240 = shalt.err (!%p9237_p3)
}
0x1a1a   : > { %s9241_s4 = scalar_lea.hbm %s10659_s9, 16  ;;  %s9245_s6 = scalar_lea.hbm %s9559_s27, 32 }
0x1a1b   : > { %p9242_p4 = scmp.ne.s32.totalorder %s10659_s9, %s9241_s4  ;;  %p9246_p9 = scmp.lt.u32.totalorder %s10659_s9, %s9559_s27 }
0x1a1c   : > { %p9247_p10 = scmp.lt.u32.totalorder %s9245_s6, %s9241_s4  ;;  %p9249_p12 = scmp.lt.u32.totalorder %s9241_s4, %s10659_s9 }
0x1a1d   : > { %p9243_p7 = pnand %p9242_p4, %p9599_p5 }
0x1a1e   : > { %p9248_p11 = por %p9247_p10, %p9246_p9 }
0x1a1f   : > { %p9244_p8 = pneg %p9243_p7 }
0x1a20   : > { %p9250_p0 = por %p9249_p12, %p9248_p11 }
0x1a22   : > { %p9251_p13 = pnand %p9250_p0, %p9244_p8 }
0x1a24   : > { %9254 = shalt.err (!%p9251_p13)
}
0x1a25   : > { %8657 = dma.vmem_to_hbm [thread:$0]  (%p9599_p5), %s10661_s8, 16, %s10659_s9, %s6746_s10  }
0x1a26 PF: > { %p8663_p1 = scmp.ge.s32.totalorder %s9289_s7, 2  ;;  %s6770_s13 = sand.u32 1, %s9277_s28  }
0x1a27   : > { %s6771_s12 = scalar_lea.sflag [#allocation3], %s6770_s13 }
0x1a28   : > { %p8660_p2 = pnand %p8663_p1, %p9603_p6 }
0x1a2a   : > { %9272 = dma.done.wait (!%p8660_p2), %s6771_s12, 16  }
0x1a2b   : > { %9274 = vsyncadd (!%p8660_p2), %s6771_s12, 4294967280  ;;  %p91_p3 = scmp.ge.s32.totalorder %s9586_s11, 4   ;;  %s10824_s28 = smov %s9281_s1 }
0x1a2c   : > { %s10825_s1 = smov %s9285_s2  ;;  %s10826_s2 = smov %s9597_s18 }
0x1a2d   : > { %s10827_s7 = smov %s9586_s11  ;;  %93 = sbr.rel (!%p91_p3) target bundleno = 90 (0x5a), region = 255 }
0x1a34   :  { %6775 = vsyncpa [#allocation3], 1 }
0x1a35   :  { %6777 = vsyncpa [#allocation3 + $0x1], 1 }

</bundles_post_ra>
